<compile_context>
chip_gen: v7x
topology: tpu7x:2x2x1
jax: 0.10.0
libtpu: 0.0.40
codegen_flags: <defaults>
</compile_context>

<pallas_src>
import functools
import math

import jax
import jax.numpy as jnp
from jax import lax
from jax.experimental import pallas as pl
from jax.experimental.pallas import tpu as pltpu

_VMEM_LIMIT = 48 * 1024 * 1024   # < v7x 64 MiB physical, plenty on v5e/v6e
_SELECT_ROUNDS = 16              # 3 probes/round -> exact int32 select in 16


# ----------------------------- top-m selection --------------------------------
def _monotonic_key(x_f32):
    """f32 -> int32 keys whose signed ordering matches the float ordering.

    -0.0 maps to the same key as +0.0 so exact-zero scores tie correctly.
    """
    bits = pltpu.bitcast(x_f32, jnp.int32)
    key = jnp.where(bits < 0, bits ^ jnp.int32(0x7FFFFFFF), bits)
    return jnp.where(bits == jnp.int32(-2147483648), jnp.int32(0), key)


def _ceil_avg(a, b):
    """ceil((a + b) / 2) for int32 without overflow."""
    return (a >> 1) + (b >> 1) + ((a & 1) | (b & 1))


def _topm_threshold(keys, lo, hi, top_m, ones_bf16):
    """Per-row key of the top_m-th largest score.

    Interval search with 3 probes per round; each round shrinks the candidate
    interval radius R to <= floor(R/4), so 16 rounds reach R == 0 for any int32
    key range (exact).  Counts run on the idle MXU (bf16 0/1 mask @ ones, f32
    accumulate => exact integers), keeping the XLU/VALU slots free; the three
    probes per round are independent so their MXU latencies overlap.
    """
    def count_ge(thr):
        mask = (keys >= thr).astype(jnp.bfloat16)                  # (rows, nk)
        cnt = jnp.dot(mask, ones_bf16, preferred_element_type=jnp.float32)
        return cnt[:, 0:1]                                         # (rows, 1)

    def round_fn(_, carry):
        lo_, hi_ = carry
        m2 = _ceil_avg(lo_, hi_)
        m1 = _ceil_avg(lo_, m2 - 1)
        m3 = _ceil_avg(m2, hi_)
        ok1 = count_ge(m1) >= top_m
        ok2 = count_ge(m2) >= top_m
        ok3 = count_ge(m3) >= top_m
        new_lo = jnp.where(ok3, m3, jnp.where(ok2, m2, jnp.where(ok1, m1, lo_)))
        new_hi = jnp.where(ok3, hi_,
                           jnp.where(ok2, m3 - 1,
                                     jnp.where(ok1, m2 - 1, m1 - 1)))
        return new_lo, new_hi

    thresh, _ = lax.fori_loop(0, _SELECT_ROUNDS, round_fn, (lo, hi))
    return thresh


# ------------------------------ fused block kernel ----------------------------
def _fused_block_kernel(w01_ref, x_ref, g1_ref, bln1_ref, wqkv_ref, bqkv_ref,
                        wo_ref, bo_ref, g2_ref, bln2_ref, w1_ref, bf1_ref,
                        w2_ref, bf2_ref, o_ref,
                        q_scr, k_scr, v_scr, wo_scr, acc_scr,
                        *, eps, sm_scale, top_m, nheads):
    N, C = x_ref.shape
    D = C // nheads
    nk = N

    w0 = w01_ref[0]
    w1b = w01_ref[1]

    x = x_ref[...]                                    # (N, C) f32 residual

    # ---- LayerNorm1 fused into the joint [q|k|v] projection (one MXU matmul)
    mean1 = jnp.mean(x, axis=-1, keepdims=True)
    xc = x - mean1
    var1 = jnp.mean(xc * xc, axis=-1, keepdims=True)
    xn = xc * lax.rsqrt(var1 + eps) * g1_ref[...] + bln1_ref[...]
    qkv = jnp.dot(xn.astype(jnp.bfloat16), wqkv_ref[...],
                  preferred_element_type=jnp.float32) + bqkv_ref[...]

    # Stage q/k/v (and the matching Wo row-slabs) head-major in VMEM scratch so
    # the head loop can be a lax.fori_loop (bounded live ranges) using cheap
    # dynamic leading-axis indexing instead of dynamic lane slices.
    for h in range(nheads):                            # static, tiny copies
        q_scr[h] = qkv[:, h * D:(h + 1) * D].astype(jnp.bfloat16)
        k_scr[h] = qkv[:, C + h * D:C + (h + 1) * D].astype(jnp.bfloat16)
        v_scr[h] = qkv[:, 2 * C + h * D:2 * C + (h + 1) * D].astype(jnp.bfloat16)
        wo_scr[h] = wo_ref[h * D:(h + 1) * D, :]

    # Attention accumulator = residual + projection bias; every head then adds
    # its already-projected contribution -> ONE lane-dense (N, C) result, no
    # per-head masked stores and no HBM round-trip for `attn`.
    acc_scr[...] = x + bo_ref[...]

    ones_cnt = jnp.ones((nk, 8), jnp.bfloat16)         # MXU count vector (hoisted)

    def head_body(h, carry):
        q = q_scr[h]                                   # (N, D) bf16
        k = k_scr[h]
        v = v_scr[h]

        # scores: bf16 MXU operands, f32 accumulation
        s = lax.dot_general(q, k, (((1,), (1,)), ((), ())),
                            preferred_element_type=jnp.float32) * sm_scale

        m = jnp.max(s, axis=-1, keepdims=True)
        p = jnp.exp(s - m)              # ONE shared numerator (dense & top-m)
        denom_dense = jnp.sum(p, axis=-1, keepdims=True)

        if top_m < nk:
            keys = _monotonic_key(s)
            thresh = _topm_threshold(
                keys,
                _monotonic_key(jnp.min(s, axis=-1, keepdims=True)),   # lo
                _monotonic_key(m),                                    # hi
                top_m, ones_cnt)
            keep = keys >= thresh       # == "score >= top_m-th largest score"
            denom_top = jnp.sum(jnp.where(keep, p, 0.0), axis=-1, keepdims=True)
            # Fold the learned blend + both normalizations straight into p (no
            # p_top temporary) so a single PV matmul suffices.
            c_dense = w0 / denom_dense
            c_top = w1b / denom_top
            p_blend = p * jnp.where(keep, c_dense + c_top, c_dense)
        else:
            p_blend = p * ((w0 + w1b) / denom_dense)

        out_h = jnp.dot(p_blend.astype(jnp.bfloat16), v,
                        preferred_element_type=jnp.float32)           # (N, D)
        # projected contribution of this head (output proj fused in)
        acc_scr[...] += jnp.dot(out_h.astype(jnp.bfloat16), wo_scr[h],
                                preferred_element_type=jnp.float32)
        return carry

    lax.fori_loop(0, nheads, head_body, 0)

    y = acc_scr[...]                    # x + proj(attn): first residual done

    # ---- LayerNorm2 -> fc1 -> GELU(erf) -> fc2 -> residual, all in VMEM/vregs
    mean2 = jnp.mean(y, axis=-1, keepdims=True)
    yc = y - mean2
    var2 = jnp.mean(yc * yc, axis=-1, keepdims=True)
    yn = yc * lax.rsqrt(var2 + eps) * g2_ref[...] + bln2_ref[...]
    hmid = jnp.dot(yn.astype(jnp.bfloat16), w1_ref[...],
                   preferred_element_type=jnp.float32) + bf1_ref[...]
    hmid = 0.5 * hmid * (1.0 + lax.erf(hmid * (1.0 / math.sqrt(2.0))))
    out = jnp.dot(hmid.astype(jnp.bfloat16), w2_ref[...],
                  preferred_element_type=jnp.float32) + bf2_ref[...] + y
    o_ref[...] = out.astype(o_ref.dtype)               # single lane-dense store


# ------------------------------- Parameters -----------------------------------
def init_params(key, embed_dim, dim_feedforward):
    C, F = embed_dim, dim_feedforward
    keys = jax.random.split(key, 5)
    std = 0.02
    wq = jax.random.normal(keys[0], (C, C), jnp.float32) * std
    wkv = jax.random.normal(keys[1], (C, 2 * C), jnp.float32) * std
    return {
        "norm1_g": jnp.ones((C,), jnp.float32),
        "norm1_b": jnp.zeros((C,), jnp.float32),
        # fused [q | k | v] projection weight, stored bf16 for the MXU
        "w_qkv": jnp.concatenate([wq, wkv], axis=1).astype(jnp.bfloat16),
        "b_qkv": jnp.zeros((3 * C,), jnp.float32),
        "wo": (jax.random.normal(keys[2], (C, C), jnp.float32) * std
               ).astype(jnp.bfloat16),
        "bo": jnp.zeros((C,), jnp.float32),
        "attn_w": jnp.ones((2,), jnp.float32),   # nn.Parameter(torch.ones(2))
        "norm2_g": jnp.ones((C,), jnp.float32),
        "norm2_b": jnp.zeros((C,), jnp.float32),
        "w1": (jax.random.normal(keys[3], (C, F), jnp.float32) * std
               ).astype(jnp.bfloat16),
        "b1": jnp.zeros((F,), jnp.float32),
        "w2": (jax.random.normal(keys[4], (F, C), jnp.float32) * std
               ).astype(jnp.bfloat16),
        "b2": jnp.zeros((C,), jnp.float32),
    }


# --------------------------------- Forward -------------------------------------
def topm_mhsa_block_forward(x, params, *, nhead, top_m_arg):
    # Ctor quirk: `top_m_arg` becomes qk_scale in the reference; a positive
    # rescale does not change the top-k set, so it is unused here.
    del top_m_arg
    effective_top_m = 99            # Attention_Sparse_Top_M default (see header)

    B, N, C = x.shape
    assert C % nhead == 0
    D = C // nhead
    F = params["w1"].shape[1]

    ew = jnp.exp(params["attn_w"])
    w01 = (ew / jnp.sum(ew)).astype(jnp.float32)       # softmax of self.w
    sm_scale = 1.0 / math.sqrt(D)                      # xformers default scale

    kernel = functools.partial(
        _fused_block_kernel, eps=1e-5, sm_scale=sm_scale,
        top_m=min(effective_top_m, N), nheads=nhead)

    const = lambda b: (0, 0)
    return pl.pallas_call(
        kernel,
        out_shape=jax.ShapeDtypeStruct((B, N, C), x.dtype),
        grid=(B,),                 # >= 2 steps so v7x megacore can split batches
        in_specs=[
            pl.BlockSpec(memory_space=pltpu.MemorySpace.SMEM),    # w01 (2,)
            pl.BlockSpec((None, N, C), lambda b: (b, 0, 0)),      # x (per batch)
            pl.BlockSpec((1, C), const),                          # norm1 gamma
            pl.BlockSpec((1, C), const),                          # norm1 beta
            pl.BlockSpec((C, 3 * C), const),                      # W_qkv
            pl.BlockSpec((1, 3 * C), const),                      # b_qkv
            pl.BlockSpec((C, C), const),                          # W_o
            pl.BlockSpec((1, C), const),                          # b_o
            pl.BlockSpec((1, C), const),                          # norm2 gamma
            pl.BlockSpec((1, C), const),                          # norm2 beta
            pl.BlockSpec((C, F), const),                          # W_fc1
            pl.BlockSpec((1, F), const),                          # b_fc1
            pl.BlockSpec((F, C), const),                          # W_fc2
            pl.BlockSpec((1, C), const),                          # b_fc2
        ],
        out_specs=pl.BlockSpec((None, N, C), lambda b: (b, 0, 0)),
        scratch_shapes=[
            pltpu.VMEM((nhead, N, D), jnp.bfloat16),   # q, head-major
            pltpu.VMEM((nhead, N, D), jnp.bfloat16),   # k, head-major
            pltpu.VMEM((nhead, N, D), jnp.bfloat16),   # v, head-major
            pltpu.VMEM((nhead, D, C), jnp.bfloat16),   # Wo row-slabs per head
            pltpu.VMEM((N, C), jnp.float32),           # attn + residual acc
        ],
        compiler_params=pltpu.CompilerParams(
            dimension_semantics=("parallel",),
            vmem_limit_bytes=_VMEM_LIMIT),
    )(w01, x,
      params["norm1_g"].reshape(1, C), params["norm1_b"].reshape(1, C),
      params["w_qkv"], params["b_qkv"].reshape(1, 3 * C),
      params["wo"], params["bo"].reshape(1, C),
      params["norm2_g"].reshape(1, C), params["norm2_b"].reshape(1, C),
      params["w1"], params["b1"].reshape(1, F),
      params["w2"], params["b2"].reshape(1, C))


# ----------------------------------- Main ---------------------------------------
if __name__ == "__main__":
    B, N, C = 2, 128, 64           # N > 99 so the top-m selection is non-trivial
    nhead = 4
    dim_feedforward = 128
    win_size = 8                   # unused by forward (as in the reference)
    dropout = 0.1                  # becomes qkv_bias in the reference ctor
    top_m = 16                     # becomes qk_scale in the reference ctor

    key = jax.random.PRNGKey(0)
    kx, kp = jax.random.split(key)
    x = jax.random.normal(kx, (B, N, C), jnp.float32)
    params = init_params(kp, C, dim_feedforward)

    fwd = jax.jit(functools.partial(topm_mhsa_block_forward,
                                    nhead=nhead, top_m_arg=top_m))
    out = jax.block_until_ready(fwd(x, params))

    assert out.shape == (B, N, C), out.shape
    assert bool(jnp.all(jnp.isfinite(out)))
    print("KERNEL_OK")
</pallas_src>

<mosaic_0001>
module attributes {stable_mosaic.version = 11 : i64} {
  func.func @_fused_block_kernel(%arg0: i32, %arg1: memref<2xf32, #tpu.memory_space<smem>>, %arg2: memref<1x128x64xf32, #tpu.memory_space<vmem>>, %arg3: memref<1x64xf32, #tpu.memory_space<vmem>>, %arg4: memref<1x64xf32, #tpu.memory_space<vmem>>, %arg5: memref<64x192xbf16, #tpu.memory_space<vmem>>, %arg6: memref<1x192xf32, #tpu.memory_space<vmem>>, %arg7: memref<64x64xbf16, #tpu.memory_space<vmem>>, %arg8: memref<1x64xf32, #tpu.memory_space<vmem>>, %arg9: memref<1x64xf32, #tpu.memory_space<vmem>>, %arg10: memref<1x64xf32, #tpu.memory_space<vmem>>, %arg11: memref<64x128xbf16, #tpu.memory_space<vmem>>, %arg12: memref<1x128xf32, #tpu.memory_space<vmem>>, %arg13: memref<128x64xbf16, #tpu.memory_space<vmem>>, %arg14: memref<1x64xf32, #tpu.memory_space<vmem>>, %arg15: memref<1x128x64xf32, #tpu.memory_space<vmem>>, %arg16: memref<4x128x16xbf16, #tpu.memory_space<vmem>>, %arg17: memref<4x128x16xbf16, #tpu.memory_space<vmem>>, %arg18: memref<4x128x16xbf16, #tpu.memory_space<vmem>>, %arg19: memref<4x16x64xbf16, #tpu.memory_space<vmem>>, %arg20: memref<128x64xf32, #tpu.memory_space<vmem>>) attributes {dimension_semantics = [#tpu.dimension_semantics<parallel>], iteration_bounds = array<i64: 2>, scalar_prefetch = 0 : i64, scratch_operands = 5 : i64, tpu.core_type = #tpu.core_type<tc>, window_params = [{transform_indices = @transform_0, window_bounds = array<i64: 2>}, {transform_indices = @transform_1, window_bounds = array<i64: 1, 128, 64>}, {pipeline_mode = #tpu.pipeline_mode<synchronous>, transform_indices = @transform_2, window_bounds = array<i64: 1, 64>}, {pipeline_mode = #tpu.pipeline_mode<synchronous>, transform_indices = @transform_3, window_bounds = array<i64: 1, 64>}, {pipeline_mode = #tpu.pipeline_mode<synchronous>, transform_indices = @transform_4, window_bounds = array<i64: 64, 192>}, {pipeline_mode = #tpu.pipeline_mode<synchronous>, transform_indices = @transform_5, window_bounds = array<i64: 1, 192>}, {pipeline_mode = #tpu.pipeline_mode<synchronous>, transform_indices = @transform_6, window_bounds = array<i64: 64, 64>}, {pipeline_mode = #tpu.pipeline_mode<synchronous>, transform_indices = @transform_7, window_bounds = array<i64: 1, 64>}, {pipeline_mode = #tpu.pipeline_mode<synchronous>, transform_indices = @transform_8, window_bounds = array<i64: 1, 64>}, {pipeline_mode = #tpu.pipeline_mode<synchronous>, transform_indices = @transform_9, window_bounds = array<i64: 1, 64>}, {pipeline_mode = #tpu.pipeline_mode<synchronous>, transform_indices = @transform_10, window_bounds = array<i64: 64, 128>}, {pipeline_mode = #tpu.pipeline_mode<synchronous>, transform_indices = @transform_11, window_bounds = array<i64: 1, 128>}, {pipeline_mode = #tpu.pipeline_mode<synchronous>, transform_indices = @transform_12, window_bounds = array<i64: 128, 64>}, {pipeline_mode = #tpu.pipeline_mode<synchronous>, transform_indices = @transform_13, window_bounds = array<i64: 1, 64>}, {transform_indices = @transform_14, window_bounds = array<i64: 1, 128, 64>}]} {
    %c0 = arith.constant 0 : index
    %0 = memref.load %arg1[%c0] : memref<2xf32, #tpu.memory_space<smem>>
    %c1 = arith.constant 1 : index
    %1 = memref.load %arg1[%c1] : memref<2xf32, #tpu.memory_space<smem>>
    %c0_0 = arith.constant 0 : index
    %c0_1 = arith.constant 0 : index
    %c0_2 = arith.constant 0 : index
    %2 = vector.load %arg2[%c0_0, %c0_1, %c0_2] : memref<1x128x64xf32, #tpu.memory_space<vmem>>, vector<1x128x64xf32>
    %3 = vector.shape_cast %2 : vector<1x128x64xf32> to vector<128x64xf32>
    %cst = arith.constant dense<0.000000e+00> : vector<128xf32>
    %4 = vector.multi_reduction <add>, %3, %cst [1] : vector<128x64xf32> to vector<128xf32>
    %5 = vector.shape_cast %4 : vector<128xf32> to vector<128x1xf32>
    %cst_3 = arith.constant 6.400000e+01 : f32
    %6 = vector.broadcast %cst_3 : f32 to vector<128x1xf32>
    %7 = arith.divf %5, %6 : vector<128x1xf32>
    %8 = vector.broadcast %7 : vector<128x1xf32> to vector<128x64xf32>
    %9 = arith.subf %3, %8 : vector<128x64xf32>
    %10 = arith.mulf %9, %9 : vector<128x64xf32>
    %cst_4 = arith.constant dense<0.000000e+00> : vector<128xf32>
    %11 = vector.multi_reduction <add>, %10, %cst_4 [1] : vector<128x64xf32> to vector<128xf32>
    %12 = vector.shape_cast %11 : vector<128xf32> to vector<128x1xf32>
    %cst_5 = arith.constant 6.400000e+01 : f32
    %13 = vector.broadcast %cst_5 : f32 to vector<128x1xf32>
    %14 = arith.divf %12, %13 : vector<128x1xf32>
    %cst_6 = arith.constant 9.99999974E-6 : f32
    %15 = vector.broadcast %cst_6 : f32 to vector<128x1xf32>
    %16 = arith.addf %14, %15 : vector<128x1xf32>
    %17 = math.rsqrt %16 : vector<128x1xf32>
    %18 = vector.broadcast %17 : vector<128x1xf32> to vector<128x64xf32>
    %19 = arith.mulf %9, %18 : vector<128x64xf32>
    %c0_7 = arith.constant 0 : index
    %c0_8 = arith.constant 0 : index
    %20 = vector.load %arg3[%c0_7, %c0_8] : memref<1x64xf32, #tpu.memory_space<vmem>>, vector<1x64xf32>
    %21 = vector.broadcast %20 : vector<1x64xf32> to vector<128x64xf32>
    %22 = arith.mulf %19, %21 : vector<128x64xf32>
    %c0_9 = arith.constant 0 : index
    %c0_10 = arith.constant 0 : index
    %23 = vector.load %arg4[%c0_9, %c0_10] : memref<1x64xf32, #tpu.memory_space<vmem>>, vector<1x64xf32>
    %24 = vector.broadcast %23 : vector<1x64xf32> to vector<128x64xf32>
    %25 = arith.addf %22, %24 : vector<128x64xf32>
    %26 = arith.truncf %25 : vector<128x64xf32> to vector<128x64xbf16>
    %c0_11 = arith.constant 0 : index
    %c0_12 = arith.constant 0 : index
    %27 = vector.load %arg5[%c0_11, %c0_12] : memref<64x192xbf16, #tpu.memory_space<vmem>>, vector<64x192xbf16>
    %cst_13 = arith.constant dense<0.000000e+00> : vector<128x192xf32>
    %28 = tpu.matmul %26, %27, %cst_13 {dimension_numbers = #tpu.dot_dimension_numbers<[1], [0], [0], [1], [0, 0, 1, 1], [], []>} : vector<128x64xbf16>, vector<64x192xbf16>, vector<128x192xf32> -> vector<128x192xf32>
    %c0_14 = arith.constant 0 : index
    %c0_15 = arith.constant 0 : index
    %29 = vector.load %arg6[%c0_14, %c0_15] : memref<1x192xf32, #tpu.memory_space<vmem>>, vector<1x192xf32>
    %30 = vector.broadcast %29 : vector<1x192xf32> to vector<128x192xf32>
    %31 = arith.addf %28, %30 : vector<128x192xf32>
    %32 = vector.extract_strided_slice %31 {offsets = [0, 0], sizes = [128, 16], strides = [1, 1]} : vector<128x192xf32> to vector<128x16xf32>
    %33 = arith.truncf %32 : vector<128x16xf32> to vector<128x16xbf16>
    %c0_16 = arith.constant 0 : index
    %c0_17 = arith.constant 0 : index
    %c0_18 = arith.constant 0 : index
    %34 = vector.load %arg16[%c0_16, %c0_17, %c0_18] : memref<4x128x16xbf16, #tpu.memory_space<vmem>>, vector<1x128x16xbf16>
    %35 = vector.shape_cast %34 : vector<1x128x16xbf16> to vector<128x16xbf16>
    %36 = vector.shape_cast %33 : vector<128x16xbf16> to vector<1x128x16xbf16>
    tpu.vector_store %arg16[%c0_16, %c0_17, %c0_18], %36 {strides = array<i32>} : memref<4x128x16xbf16, #tpu.memory_space<vmem>>, vector<1x128x16xbf16>,
    %37 = vector.extract_strided_slice %31 {offsets = [0, 64], sizes = [128, 16], strides = [1, 1]} : vector<128x192xf32> to vector<128x16xf32>
    %38 = arith.truncf %37 : vector<128x16xf32> to vector<128x16xbf16>
    %c0_19 = arith.constant 0 : index
    %c0_20 = arith.constant 0 : index
    %c0_21 = arith.constant 0 : index
    %39 = vector.load %arg17[%c0_19, %c0_20, %c0_21] : memref<4x128x16xbf16, #tpu.memory_space<vmem>>, vector<1x128x16xbf16>
    %40 = vector.shape_cast %39 : vector<1x128x16xbf16> to vector<128x16xbf16>
    %41 = vector.shape_cast %38 : vector<128x16xbf16> to vector<1x128x16xbf16>
    tpu.vector_store %arg17[%c0_19, %c0_20, %c0_21], %41 {strides = array<i32>} : memref<4x128x16xbf16, #tpu.memory_space<vmem>>, vector<1x128x16xbf16>,
    %42 = vector.extract_strided_slice %31 {offsets = [0, 128], sizes = [128, 16], strides = [1, 1]} : vector<128x192xf32> to vector<128x16xf32>
    %43 = arith.truncf %42 : vector<128x16xf32> to vector<128x16xbf16>
    %c0_22 = arith.constant 0 : index
    %c0_23 = arith.constant 0 : index
    %c0_24 = arith.constant 0 : index
    %44 = vector.load %arg18[%c0_22, %c0_23, %c0_24] : memref<4x128x16xbf16, #tpu.memory_space<vmem>>, vector<1x128x16xbf16>
    %45 = vector.shape_cast %44 : vector<1x128x16xbf16> to vector<128x16xbf16>
    %46 = vector.shape_cast %43 : vector<128x16xbf16> to vector<1x128x16xbf16>
    tpu.vector_store %arg18[%c0_22, %c0_23, %c0_24], %46 {strides = array<i32>} : memref<4x128x16xbf16, #tpu.memory_space<vmem>>, vector<1x128x16xbf16>,
    %c0_25 = arith.constant 0 : index
    %c0_26 = arith.constant 0 : index
    %47 = vector.load %arg7[%c0_25, %c0_26] : memref<64x64xbf16, #tpu.memory_space<vmem>>, vector<16x64xbf16>
    %c0_27 = arith.constant 0 : index
    %c0_28 = arith.constant 0 : index
    %c0_29 = arith.constant 0 : index
    %48 = vector.load %arg19[%c0_27, %c0_28, %c0_29] : memref<4x16x64xbf16, #tpu.memory_space<vmem>>, vector<1x16x64xbf16>
    %49 = vector.shape_cast %48 : vector<1x16x64xbf16> to vector<16x64xbf16>
    %50 = vector.shape_cast %47 : vector<16x64xbf16> to vector<1x16x64xbf16>
    tpu.vector_store %arg19[%c0_27, %c0_28, %c0_29], %50 {strides = array<i32>} : memref<4x16x64xbf16, #tpu.memory_space<vmem>>, vector<1x16x64xbf16>,
    %51 = vector.extract_strided_slice %31 {offsets = [0, 16], sizes = [128, 16], strides = [1, 1]} : vector<128x192xf32> to vector<128x16xf32>
    %52 = arith.truncf %51 : vector<128x16xf32> to vector<128x16xbf16>
    %c1_30 = arith.constant 1 : index
    %c0_31 = arith.constant 0 : index
    %c0_32 = arith.constant 0 : index
    %53 = vector.load %arg16[%c1_30, %c0_31, %c0_32] : memref<4x128x16xbf16, #tpu.memory_space<vmem>>, vector<1x128x16xbf16>
    %54 = vector.shape_cast %53 : vector<1x128x16xbf16> to vector<128x16xbf16>
    %55 = vector.shape_cast %52 : vector<128x16xbf16> to vector<1x128x16xbf16>
    tpu.vector_store %arg16[%c1_30, %c0_31, %c0_32], %55 {strides = array<i32>} : memref<4x128x16xbf16, #tpu.memory_space<vmem>>, vector<1x128x16xbf16>,
    %56 = vector.extract_strided_slice %31 {offsets = [0, 80], sizes = [128, 16], strides = [1, 1]} : vector<128x192xf32> to vector<128x16xf32>
    %57 = arith.truncf %56 : vector<128x16xf32> to vector<128x16xbf16>
    %c1_33 = arith.constant 1 : index
    %c0_34 = arith.constant 0 : index
    %c0_35 = arith.constant 0 : index
    %58 = vector.load %arg17[%c1_33, %c0_34, %c0_35] : memref<4x128x16xbf16, #tpu.memory_space<vmem>>, vector<1x128x16xbf16>
    %59 = vector.shape_cast %58 : vector<1x128x16xbf16> to vector<128x16xbf16>
    %60 = vector.shape_cast %57 : vector<128x16xbf16> to vector<1x128x16xbf16>
    tpu.vector_store %arg17[%c1_33, %c0_34, %c0_35], %60 {strides = array<i32>} : memref<4x128x16xbf16, #tpu.memory_space<vmem>>, vector<1x128x16xbf16>,
    %61 = vector.extract_strided_slice %31 {offsets = [0, 144], sizes = [128, 16], strides = [1, 1]} : vector<128x192xf32> to vector<128x16xf32>
    %62 = arith.truncf %61 : vector<128x16xf32> to vector<128x16xbf16>
    %c1_36 = arith.constant 1 : index
    %c0_37 = arith.constant 0 : index
    %c0_38 = arith.constant 0 : index
    %63 = vector.load %arg18[%c1_36, %c0_37, %c0_38] : memref<4x128x16xbf16, #tpu.memory_space<vmem>>, vector<1x128x16xbf16>
    %64 = vector.shape_cast %63 : vector<1x128x16xbf16> to vector<128x16xbf16>
    %65 = vector.shape_cast %62 : vector<128x16xbf16> to vector<1x128x16xbf16>
    tpu.vector_store %arg18[%c1_36, %c0_37, %c0_38], %65 {strides = array<i32>} : memref<4x128x16xbf16, #tpu.memory_space<vmem>>, vector<1x128x16xbf16>,
    %c16 = arith.constant 16 : index
    %c0_39 = arith.constant 0 : index
    %66 = vector.load %arg7[%c16, %c0_39] : memref<64x64xbf16, #tpu.memory_space<vmem>>, vector<16x64xbf16>
    %c1_40 = arith.constant 1 : index
    %c0_41 = arith.constant 0 : index
    %c0_42 = arith.constant 0 : index
    %67 = vector.load %arg19[%c1_40, %c0_41, %c0_42] : memref<4x16x64xbf16, #tpu.memory_space<vmem>>, vector<1x16x64xbf16>
    %68 = vector.shape_cast %67 : vector<1x16x64xbf16> to vector<16x64xbf16>
    %69 = vector.shape_cast %66 : vector<16x64xbf16> to vector<1x16x64xbf16>
    tpu.vector_store %arg19[%c1_40, %c0_41, %c0_42], %69 {strides = array<i32>} : memref<4x16x64xbf16, #tpu.memory_space<vmem>>, vector<1x16x64xbf16>,
    %70 = vector.extract_strided_slice %31 {offsets = [0, 32], sizes = [128, 16], strides = [1, 1]} : vector<128x192xf32> to vector<128x16xf32>
    %71 = arith.truncf %70 : vector<128x16xf32> to vector<128x16xbf16>
    %c2 = arith.constant 2 : index
    %c0_43 = arith.constant 0 : index
    %c0_44 = arith.constant 0 : index
    %72 = vector.load %arg16[%c2, %c0_43, %c0_44] : memref<4x128x16xbf16, #tpu.memory_space<vmem>>, vector<1x128x16xbf16>
    %73 = vector.shape_cast %72 : vector<1x128x16xbf16> to vector<128x16xbf16>
    %74 = vector.shape_cast %71 : vector<128x16xbf16> to vector<1x128x16xbf16>
    tpu.vector_store %arg16[%c2, %c0_43, %c0_44], %74 {strides = array<i32>} : memref<4x128x16xbf16, #tpu.memory_space<vmem>>, vector<1x128x16xbf16>,
    %75 = vector.extract_strided_slice %31 {offsets = [0, 96], sizes = [128, 16], strides = [1, 1]} : vector<128x192xf32> to vector<128x16xf32>
    %76 = arith.truncf %75 : vector<128x16xf32> to vector<128x16xbf16>
    %c2_45 = arith.constant 2 : index
    %c0_46 = arith.constant 0 : index
    %c0_47 = arith.constant 0 : index
    %77 = vector.load %arg17[%c2_45, %c0_46, %c0_47] : memref<4x128x16xbf16, #tpu.memory_space<vmem>>, vector<1x128x16xbf16>
    %78 = vector.shape_cast %77 : vector<1x128x16xbf16> to vector<128x16xbf16>
    %79 = vector.shape_cast %76 : vector<128x16xbf16> to vector<1x128x16xbf16>
    tpu.vector_store %arg17[%c2_45, %c0_46, %c0_47], %79 {strides = array<i32>} : memref<4x128x16xbf16, #tpu.memory_space<vmem>>, vector<1x128x16xbf16>,
    %80 = vector.extract_strided_slice %31 {offsets = [0, 160], sizes = [128, 16], strides = [1, 1]} : vector<128x192xf32> to vector<128x16xf32>
    %81 = arith.truncf %80 : vector<128x16xf32> to vector<128x16xbf16>
    %c2_48 = arith.constant 2 : index
    %c0_49 = arith.constant 0 : index
    %c0_50 = arith.constant 0 : index
    %82 = vector.load %arg18[%c2_48, %c0_49, %c0_50] : memref<4x128x16xbf16, #tpu.memory_space<vmem>>, vector<1x128x16xbf16>
    %83 = vector.shape_cast %82 : vector<1x128x16xbf16> to vector<128x16xbf16>
    %84 = vector.shape_cast %81 : vector<128x16xbf16> to vector<1x128x16xbf16>
    tpu.vector_store %arg18[%c2_48, %c0_49, %c0_50], %84 {strides = array<i32>} : memref<4x128x16xbf16, #tpu.memory_space<vmem>>, vector<1x128x16xbf16>,
    %c32 = arith.constant 32 : index
    %c0_51 = arith.constant 0 : index
    %85 = vector.load %arg7[%c32, %c0_51] : memref<64x64xbf16, #tpu.memory_space<vmem>>, vector<16x64xbf16>
    %c2_52 = arith.constant 2 : index
    %c0_53 = arith.constant 0 : index
    %c0_54 = arith.constant 0 : index
    %86 = vector.load %arg19[%c2_52, %c0_53, %c0_54] : memref<4x16x64xbf16, #tpu.memory_space<vmem>>, vector<1x16x64xbf16>
    %87 = vector.shape_cast %86 : vector<1x16x64xbf16> to vector<16x64xbf16>
    %88 = vector.shape_cast %85 : vector<16x64xbf16> to vector<1x16x64xbf16>
    tpu.vector_store %arg19[%c2_52, %c0_53, %c0_54], %88 {strides = array<i32>} : memref<4x16x64xbf16, #tpu.memory_space<vmem>>, vector<1x16x64xbf16>,
    %89 = vector.extract_strided_slice %31 {offsets = [0, 48], sizes = [128, 16], strides = [1, 1]} : vector<128x192xf32> to vector<128x16xf32>
    %90 = arith.truncf %89 : vector<128x16xf32> to vector<128x16xbf16>
    %c3 = arith.constant 3 : index
    %c0_55 = arith.constant 0 : index
    %c0_56 = arith.constant 0 : index
    %91 = vector.load %arg16[%c3, %c0_55, %c0_56] : memref<4x128x16xbf16, #tpu.memory_space<vmem>>, vector<1x128x16xbf16>
    %92 = vector.shape_cast %91 : vector<1x128x16xbf16> to vector<128x16xbf16>
    %93 = vector.shape_cast %90 : vector<128x16xbf16> to vector<1x128x16xbf16>
    tpu.vector_store %arg16[%c3, %c0_55, %c0_56], %93 {strides = array<i32>} : memref<4x128x16xbf16, #tpu.memory_space<vmem>>, vector<1x128x16xbf16>,
    %94 = vector.extract_strided_slice %31 {offsets = [0, 112], sizes = [128, 16], strides = [1, 1]} : vector<128x192xf32> to vector<128x16xf32>
    %95 = arith.truncf %94 : vector<128x16xf32> to vector<128x16xbf16>
    %c3_57 = arith.constant 3 : index
    %c0_58 = arith.constant 0 : index
    %c0_59 = arith.constant 0 : index
    %96 = vector.load %arg17[%c3_57, %c0_58, %c0_59] : memref<4x128x16xbf16, #tpu.memory_space<vmem>>, vector<1x128x16xbf16>
    %97 = vector.shape_cast %96 : vector<1x128x16xbf16> to vector<128x16xbf16>
    %98 = vector.shape_cast %95 : vector<128x16xbf16> to vector<1x128x16xbf16>
    tpu.vector_store %arg17[%c3_57, %c0_58, %c0_59], %98 {strides = array<i32>} : memref<4x128x16xbf16, #tpu.memory_space<vmem>>, vector<1x128x16xbf16>,
    %99 = vector.extract_strided_slice %31 {offsets = [0, 176], sizes = [128, 16], strides = [1, 1]} : vector<128x192xf32> to vector<128x16xf32>
    %100 = arith.truncf %99 : vector<128x16xf32> to vector<128x16xbf16>
    %c3_60 = arith.constant 3 : index
    %c0_61 = arith.constant 0 : index
    %c0_62 = arith.constant 0 : index
    %101 = vector.load %arg18[%c3_60, %c0_61, %c0_62] : memref<4x128x16xbf16, #tpu.memory_space<vmem>>, vector<1x128x16xbf16>
    %102 = vector.shape_cast %101 : vector<1x128x16xbf16> to vector<128x16xbf16>
    %103 = vector.shape_cast %100 : vector<128x16xbf16> to vector<1x128x16xbf16>
    tpu.vector_store %arg18[%c3_60, %c0_61, %c0_62], %103 {strides = array<i32>} : memref<4x128x16xbf16, #tpu.memory_space<vmem>>, vector<1x128x16xbf16>,
    %c48 = arith.constant 48 : index
    %c0_63 = arith.constant 0 : index
    %104 = vector.load %arg7[%c48, %c0_63] : memref<64x64xbf16, #tpu.memory_space<vmem>>, vector<16x64xbf16>
    %c3_64 = arith.constant 3 : index
    %c0_65 = arith.constant 0 : index
    %c0_66 = arith.constant 0 : index
    %105 = vector.load %arg19[%c3_64, %c0_65, %c0_66] : memref<4x16x64xbf16, #tpu.memory_space<vmem>>, vector<1x16x64xbf16>
    %106 = vector.shape_cast %105 : vector<1x16x64xbf16> to vector<16x64xbf16>
    %107 = vector.shape_cast %104 : vector<16x64xbf16> to vector<1x16x64xbf16>
    tpu.vector_store %arg19[%c3_64, %c0_65, %c0_66], %107 {strides = array<i32>} : memref<4x16x64xbf16, #tpu.memory_space<vmem>>, vector<1x16x64xbf16>,
    %c0_67 = arith.constant 0 : index
    %c0_68 = arith.constant 0 : index
    %108 = vector.load %arg8[%c0_67, %c0_68] : memref<1x64xf32, #tpu.memory_space<vmem>>, vector<1x64xf32>
    %109 = vector.broadcast %108 : vector<1x64xf32> to vector<128x64xf32>
    %110 = arith.addf %3, %109 : vector<128x64xf32>
    %c0_69 = arith.constant 0 : index
    %c0_70 = arith.constant 0 : index
    %111 = vector.load %arg20[%c0_69, %c0_70] : memref<128x64xf32, #tpu.memory_space<vmem>>, vector<128x64xf32>
    tpu.vector_store %arg20[%c0_69, %c0_70], %110 {strides = array<i32>} : memref<128x64xf32, #tpu.memory_space<vmem>>, vector<128x64xf32>,
    %cst_71 = arith.constant 1.000000e+00 : bf16
    %112 = vector.broadcast %cst_71 : bf16 to vector<128x8xbf16>
    %c0_i32 = arith.constant 0 : i32
    %c4_i32 = arith.constant 4 : i32
    %113 = arith.addi %c0_i32, %c4_i32 : i32
    %c1_i32 = arith.constant 1 : i32
    scf.for %arg21 = %c0_i32 to %113 step %c1_i32  : i32 {
      %161 = arith.index_cast %arg21 : i32 to index
      %c0_100 = arith.constant 0 : index
      %c0_101 = arith.constant 0 : index
      %162 = vector.load %arg16[%161, %c0_100, %c0_101] : memref<4x128x16xbf16, #tpu.memory_space<vmem>>, vector<1x128x16xbf16>
      %163 = vector.shape_cast %162 : vector<1x128x16xbf16> to vector<128x16xbf16>
      %164 = arith.index_cast %arg21 : i32 to index
      %c0_102 = arith.constant 0 : index
      %c0_103 = arith.constant 0 : index
      %165 = vector.load %arg17[%164, %c0_102, %c0_103] : memref<4x128x16xbf16, #tpu.memory_space<vmem>>, vector<1x128x16xbf16>
      %166 = vector.shape_cast %165 : vector<1x128x16xbf16> to vector<128x16xbf16>
      %167 = arith.index_cast %arg21 : i32 to index
      %c0_104 = arith.constant 0 : index
      %c0_105 = arith.constant 0 : index
      %168 = vector.load %arg18[%167, %c0_104, %c0_105] : memref<4x128x16xbf16, #tpu.memory_space<vmem>>, vector<1x128x16xbf16>
      %169 = vector.shape_cast %168 : vector<1x128x16xbf16> to vector<128x16xbf16>
      %cst_106 = arith.constant dense<0.000000e+00> : vector<128x128xf32>
      %170 = tpu.matmul %163, %166, %cst_106 {dimension_numbers = #tpu.dot_dimension_numbers<[1], [1], [0], [0], [0, 0, 1, 0], [], []>} : vector<128x16xbf16>, vector<128x16xbf16>, vector<128x128xf32> -> vector<128x128xf32>
      %cst_107 = arith.constant 2.500000e-01 : f32
      %171 = vector.broadcast %cst_107 : f32 to vector<128x128xf32>
      %172 = arith.mulf %170, %171 : vector<128x128xf32>
      %cst_108 = arith.constant dense<0xFF800000> : vector<128xf32>
      %173 = vector.multi_reduction <maximumf>, %172, %cst_108 [1] : vector<128x128xf32> to vector<128xf32>
      %174 = vector.shape_cast %173 : vector<128xf32> to vector<128x1xf32>
      %175 = vector.broadcast %174 : vector<128x1xf32> to vector<128x128xf32>
      %176 = arith.subf %172, %175 : vector<128x128xf32>
      %177 = math.exp %176 : vector<128x128xf32>
      %cst_109 = arith.constant dense<0.000000e+00> : vector<128xf32>
      %178 = vector.multi_reduction <add>, %177, %cst_109 [1] : vector<128x128xf32> to vector<128xf32>
      %179 = vector.shape_cast %178 : vector<128xf32> to vector<128x1xf32>
      %180 = tpu.bitcast %172 : vector<128x128xf32> -> vector<128x128xi32>
      %c0_i32_110 = arith.constant 0 : i32
      %181 = vector.broadcast %c0_i32_110 : i32 to vector<128x128xi32>
      %182 = arith.cmpi slt, %180, %181 : vector<128x128xi32>
      %c2147483647_i32 = arith.constant 2147483647 : i32
      %183 = vector.broadcast %c2147483647_i32 : i32 to vector<128x128xi32>
      %184 = arith.xori %180, %183 : vector<128x128xi32>
      %185 = arith.select %182, %184, %180 : vector<128x128xi1>, vector<128x128xi32>
      %c-2147483648_i32 = arith.constant -2147483648 : i32
      %186 = vector.broadcast %c-2147483648_i32 : i32 to vector<128x128xi32>
      %187 = arith.cmpi eq, %180, %186 : vector<128x128xi32>
      %c0_i32_111 = arith.constant 0 : i32
      %188 = vector.broadcast %c0_i32_111 : i32 to vector<128x128xi32>
      %189 = arith.select %187, %188, %185 : vector<128x128xi1>, vector<128x128xi32>
      %cst_112 = arith.constant dense<0x7F800000> : vector<128xf32>
      %190 = vector.multi_reduction <minimumf>, %172, %cst_112 [1] : vector<128x128xf32> to vector<128xf32>
      %191 = vector.shape_cast %190 : vector<128xf32> to vector<128x1xf32>
      %192 = tpu.bitcast %191 : vector<128x1xf32> -> vector<128x1xi32>
      %c0_i32_113 = arith.constant 0 : i32
      %193 = vector.broadcast %c0_i32_113 : i32 to vector<128x1xi32>
      %194 = arith.cmpi slt, %192, %193 : vector<128x1xi32>
      %c2147483647_i32_114 = arith.constant 2147483647 : i32
      %195 = vector.broadcast %c2147483647_i32_114 : i32 to vector<128x1xi32>
      %196 = arith.xori %192, %195 : vector<128x1xi32>
      %197 = arith.select %194, %196, %192 : vector<128x1xi1>, vector<128x1xi32>
      %c-2147483648_i32_115 = arith.constant -2147483648 : i32
      %198 = vector.broadcast %c-2147483648_i32_115 : i32 to vector<128x1xi32>
      %199 = arith.cmpi eq, %192, %198 : vector<128x1xi32>
      %c0_i32_116 = arith.constant 0 : i32
      %200 = vector.broadcast %c0_i32_116 : i32 to vector<128x1xi32>
      %201 = arith.select %199, %200, %197 : vector<128x1xi1>, vector<128x1xi32>
      %202 = tpu.bitcast %174 : vector<128x1xf32> -> vector<128x1xi32>
      %c0_i32_117 = arith.constant 0 : i32
      %203 = vector.broadcast %c0_i32_117 : i32 to vector<128x1xi32>
      %204 = arith.cmpi slt, %202, %203 : vector<128x1xi32>
      %c2147483647_i32_118 = arith.constant 2147483647 : i32
      %205 = vector.broadcast %c2147483647_i32_118 : i32 to vector<128x1xi32>
      %206 = arith.xori %202, %205 : vector<128x1xi32>
      %207 = arith.select %204, %206, %202 : vector<128x1xi1>, vector<128x1xi32>
      %c-2147483648_i32_119 = arith.constant -2147483648 : i32
      %208 = vector.broadcast %c-2147483648_i32_119 : i32 to vector<128x1xi32>
      %209 = arith.cmpi eq, %202, %208 : vector<128x1xi32>
      %c0_i32_120 = arith.constant 0 : i32
      %210 = vector.broadcast %c0_i32_120 : i32 to vector<128x1xi32>
      %211 = arith.select %209, %210, %207 : vector<128x1xi1>, vector<128x1xi32>
      %c0_i32_121 = arith.constant 0 : i32
      %c16_i32 = arith.constant 16 : i32
      %212 = arith.addi %c0_i32_121, %c16_i32 : i32
      %c1_i32_122 = arith.constant 1 : i32
      %213:2 = scf.for %arg22 = %c0_i32_121 to %212 step %c1_i32_122 iter_args(%arg23 = %201, %arg24 = %211) -> (vector<128x1xi32>, vector<128x1xi32>)  : i32 {
        %c1_i32_133 = arith.constant 1 : i32
        %241 = vector.broadcast %c1_i32_133 : i32 to vector<128x1xi32>
        %242 = arith.shrsi %arg23, %241 : vector<128x1xi32>
        %c1_i32_134 = arith.constant 1 : i32
        %243 = vector.broadcast %c1_i32_134 : i32 to vector<128x1xi32>
        %244 = arith.shrsi %arg24, %243 : vector<128x1xi32>
        %245 = arith.addi %242, %244 : vector<128x1xi32>
        %c1_i32_135 = arith.constant 1 : i32
        %246 = vector.broadcast %c1_i32_135 : i32 to vector<128x1xi32>
        %247 = arith.andi %arg23, %246 : vector<128x1xi32>
        %c1_i32_136 = arith.constant 1 : i32
        %248 = vector.broadcast %c1_i32_136 : i32 to vector<128x1xi32>
        %249 = arith.andi %arg24, %248 : vector<128x1xi32>
        %250 = arith.ori %247, %249 : vector<128x1xi32>
        %251 = arith.addi %245, %250 : vector<128x1xi32>
        %c1_i32_137 = arith.constant 1 : i32
        %252 = vector.broadcast %c1_i32_137 : i32 to vector<128x1xi32>
        %253 = arith.subi %251, %252 : vector<128x1xi32>
        %c1_i32_138 = arith.constant 1 : i32
        %254 = vector.broadcast %c1_i32_138 : i32 to vector<128x1xi32>
        %255 = arith.shrsi %arg23, %254 : vector<128x1xi32>
        %c1_i32_139 = arith.constant 1 : i32
        %256 = vector.broadcast %c1_i32_139 : i32 to vector<128x1xi32>
        %257 = arith.shrsi %253, %256 : vector<128x1xi32>
        %258 = arith.addi %255, %257 : vector<128x1xi32>
        %c1_i32_140 = arith.constant 1 : i32
        %259 = vector.broadcast %c1_i32_140 : i32 to vector<128x1xi32>
        %260 = arith.andi %arg23, %259 : vector<128x1xi32>
        %c1_i32_141 = arith.constant 1 : i32
        %261 = vector.broadcast %c1_i32_141 : i32 to vector<128x1xi32>
        %262 = arith.andi %253, %261 : vector<128x1xi32>
        %263 = arith.ori %260, %262 : vector<128x1xi32>
        %264 = arith.addi %258, %263 : vector<128x1xi32>
        %c1_i32_142 = arith.constant 1 : i32
        %265 = vector.broadcast %c1_i32_142 : i32 to vector<128x1xi32>
        %266 = arith.shrsi %251, %265 : vector<128x1xi32>
        %c1_i32_143 = arith.constant 1 : i32
        %267 = vector.broadcast %c1_i32_143 : i32 to vector<128x1xi32>
        %268 = arith.shrsi %arg24, %267 : vector<128x1xi32>
        %269 = arith.addi %266, %268 : vector<128x1xi32>
        %c1_i32_144 = arith.constant 1 : i32
        %270 = vector.broadcast %c1_i32_144 : i32 to vector<128x1xi32>
        %271 = arith.andi %251, %270 : vector<128x1xi32>
        %c1_i32_145 = arith.constant 1 : i32
        %272 = vector.broadcast %c1_i32_145 : i32 to vector<128x1xi32>
        %273 = arith.andi %arg24, %272 : vector<128x1xi32>
        %274 = arith.ori %271, %273 : vector<128x1xi32>
        %275 = arith.addi %269, %274 : vector<128x1xi32>
        %276 = vector.broadcast %264 : vector<128x1xi32> to vector<128x128xi32>
        %277 = arith.cmpi sge, %189, %276 : vector<128x128xi32>
        %278 = arith.extui %277 : vector<128x128xi1> to vector<128x128xi32>
        %279 = arith.sitofp %278 : vector<128x128xi32> to vector<128x128xf32>
        %280 = arith.truncf %279 : vector<128x128xf32> to vector<128x128xbf16>
        %cst_146 = arith.constant dense<0.000000e+00> : vector<128x8xf32>
        %281 = tpu.matmul %280, %112, %cst_146 {dimension_numbers = #tpu.dot_dimension_numbers<[1], [0], [0], [1], [0, 0, 1, 1], [], []>} : vector<128x128xbf16>, vector<128x8xbf16>, vector<128x8xf32> -> vector<128x8xf32>
        %282 = vector.extract_strided_slice %281 {offsets = [0, 0], sizes = [128, 1], strides = [1, 1]} : vector<128x8xf32> to vector<128x1xf32>
        %cst_147 = arith.constant 9.900000e+01 : f32
        %283 = vector.broadcast %cst_147 : f32 to vector<128x1xf32>
        %284 = arith.cmpf oge, %282, %283 : vector<128x1xf32>
        %285 = vector.broadcast %251 : vector<128x1xi32> to vector<128x128xi32>
        %286 = arith.cmpi sge, %189, %285 : vector<128x128xi32>
        %287 = arith.extui %286 : vector<128x128xi1> to vector<128x128xi32>
        %288 = arith.sitofp %287 : vector<128x128xi32> to vector<128x128xf32>
        %289 = arith.truncf %288 : vector<128x128xf32> to vector<128x128xbf16>
        %cst_148 = arith.constant dense<0.000000e+00> : vector<128x8xf32>
        %290 = tpu.matmul %289, %112, %cst_148 {dimension_numbers = #tpu.dot_dimension_numbers<[1], [0], [0], [1], [0, 0, 1, 1], [], []>} : vector<128x128xbf16>, vector<128x8xbf16>, vector<128x8xf32> -> vector<128x8xf32>
        %291 = vector.extract_strided_slice %290 {offsets = [0, 0], sizes = [128, 1], strides = [1, 1]} : vector<128x8xf32> to vector<128x1xf32>
        %cst_149 = arith.constant 9.900000e+01 : f32
        %292 = vector.broadcast %cst_149 : f32 to vector<128x1xf32>
        %293 = arith.cmpf oge, %291, %292 : vector<128x1xf32>
        %294 = vector.broadcast %275 : vector<128x1xi32> to vector<128x128xi32>
        %295 = arith.cmpi sge, %189, %294 : vector<128x128xi32>
        %296 = arith.extui %295 : vector<128x128xi1> to vector<128x128xi32>
        %297 = arith.sitofp %296 : vector<128x128xi32> to vector<128x128xf32>
        %298 = arith.truncf %297 : vector<128x128xf32> to vector<128x128xbf16>
        %cst_150 = arith.constant dense<0.000000e+00> : vector<128x8xf32>
        %299 = tpu.matmul %298, %112, %cst_150 {dimension_numbers = #tpu.dot_dimension_numbers<[1], [0], [0], [1], [0, 0, 1, 1], [], []>} : vector<128x128xbf16>, vector<128x8xbf16>, vector<128x8xf32> -> vector<128x8xf32>
        %300 = vector.extract_strided_slice %299 {offsets = [0, 0], sizes = [128, 1], strides = [1, 1]} : vector<128x8xf32> to vector<128x1xf32>
        %cst_151 = arith.constant 9.900000e+01 : f32
        %301 = vector.broadcast %cst_151 : f32 to vector<128x1xf32>
        %302 = arith.cmpf oge, %300, %301 : vector<128x1xf32>
        %303 = arith.select %284, %264, %arg23 : vector<128x1xi1>, vector<128x1xi32>
        %304 = arith.select %293, %251, %303 : vector<128x1xi1>, vector<128x1xi32>
        %305 = arith.select %302, %275, %304 : vector<128x1xi1>, vector<128x1xi32>
        %c1_i32_152 = arith.constant 1 : i32
        %306 = vector.broadcast %c1_i32_152 : i32 to vector<128x1xi32>
        %307 = arith.subi %275, %306 : vector<128x1xi32>
        %c1_i32_153 = arith.constant 1 : i32
        %308 = vector.broadcast %c1_i32_153 : i32 to vector<128x1xi32>
        %309 = arith.subi %251, %308 : vector<128x1xi32>
        %c1_i32_154 = arith.constant 1 : i32
        %310 = vector.broadcast %c1_i32_154 : i32 to vector<128x1xi32>
        %311 = arith.subi %264, %310 : vector<128x1xi32>
        %312 = arith.select %284, %309, %311 : vector<128x1xi1>, vector<128x1xi32>
        %313 = arith.select %293, %307, %312 : vector<128x1xi1>, vector<128x1xi32>
        %314 = arith.select %302, %arg24, %313 : vector<128x1xi1>, vector<128x1xi32>
        scf.yield %305, %314 : vector<128x1xi32>, vector<128x1xi32>
      }
      %214 = vector.broadcast %213#0 : vector<128x1xi32> to vector<128x128xi32>
      %215 = arith.cmpi sge, %189, %214 : vector<128x128xi32>
      %cst_123 = arith.constant 0.000000e+00 : f32
      %216 = vector.broadcast %cst_123 : f32 to vector<128x128xf32>
      %217 = arith.select %215, %177, %216 : vector<128x128xi1>, vector<128x128xf32>
      %cst_124 = arith.constant dense<0.000000e+00> : vector<128xf32>
      %218 = vector.multi_reduction <add>, %217, %cst_124 [1] : vector<128x128xf32> to vector<128xf32>
      %219 = vector.shape_cast %218 : vector<128xf32> to vector<128x1xf32>
      %220 = vector.broadcast %0 : f32 to vector<128x1xf32>
      %221 = arith.divf %220, %179 : vector<128x1xf32>
      %222 = vector.broadcast %1 : f32 to vector<128x1xf32>
      %223 = arith.divf %222, %219 : vector<128x1xf32>
      %224 = arith.addf %221, %223 : vector<128x1xf32>
      %225 = vector.shape_cast %224 : vector<128x1xf32> to vector<128x1xf32>
      %226 = vector.broadcast %225 : vector<128x1xf32> to vector<128x128xf32>
      %227 = vector.shape_cast %221 : vector<128x1xf32> to vector<128x1xf32>
      %228 = vector.broadcast %227 : vector<128x1xf32> to vector<128x128xf32>
      %229 = arith.select %215, %226, %228 : vector<128x128xi1>, vector<128x128xf32>
      %230 = arith.mulf %177, %229 : vector<128x128xf32>
      %231 = arith.truncf %230 : vector<128x128xf32> to vector<128x128xbf16>
      %cst_125 = arith.constant dense<0.000000e+00> : vector<128x16xf32>
      %232 = tpu.matmul %231, %169, %cst_125 {dimension_numbers = #tpu.dot_dimension_numbers<[1], [0], [0], [1], [0, 0, 1, 1], [], []>} : vector<128x128xbf16>, vector<128x16xbf16>, vector<128x16xf32> -> vector<128x16xf32>
      %c0_126 = arith.constant 0 : index
      %c0_127 = arith.constant 0 : index
      %233 = vector.load %arg20[%c0_126, %c0_127] : memref<128x64xf32, #tpu.memory_space<vmem>>, vector<128x64xf32>
      %234 = arith.truncf %232 : vector<128x16xf32> to vector<128x16xbf16>
      %235 = arith.index_cast %arg21 : i32 to index
      %c0_128 = arith.constant 0 : index
      %c0_129 = arith.constant 0 : index
      %236 = vector.load %arg19[%235, %c0_128, %c0_129] : memref<4x16x64xbf16, #tpu.memory_space<vmem>>, vector<1x16x64xbf16>
      %237 = vector.shape_cast %236 : vector<1x16x64xbf16> to vector<16x64xbf16>
      %cst_130 = arith.constant dense<0.000000e+00> : vector<128x64xf32>
      %238 = tpu.matmul %234, %237, %cst_130 {dimension_numbers = #tpu.dot_dimension_numbers<[1], [0], [0], [1], [0, 0, 1, 1], [], []>} : vector<128x16xbf16>, vector<16x64xbf16>, vector<128x64xf32> -> vector<128x64xf32>
      %239 = arith.addf %233, %238 : vector<128x64xf32>
      %c0_131 = arith.constant 0 : index
      %c0_132 = arith.constant 0 : index
      %240 = vector.load %arg20[%c0_131, %c0_132] : memref<128x64xf32, #tpu.memory_space<vmem>>, vector<128x64xf32>
      tpu.vector_store %arg20[%c0_131, %c0_132], %239 {strides = array<i32>} : memref<128x64xf32, #tpu.memory_space<vmem>>, vector<128x64xf32>,
    }
    %c4_i32_72 = arith.constant 4 : i32
    %c0_73 = arith.constant 0 : index
    %c0_74 = arith.constant 0 : index
    %114 = vector.load %arg20[%c0_73, %c0_74] : memref<128x64xf32, #tpu.memory_space<vmem>>, vector<128x64xf32>
    %cst_75 = arith.constant dense<0.000000e+00> : vector<128xf32>
    %115 = vector.multi_reduction <add>, %114, %cst_75 [1] : vector<128x64xf32> to vector<128xf32>
    %116 = vector.shape_cast %115 : vector<128xf32> to vector<128x1xf32>
    %cst_76 = arith.constant 6.400000e+01 : f32
    %117 = vector.broadcast %cst_76 : f32 to vector<128x1xf32>
    %118 = arith.divf %116, %117 : vector<128x1xf32>
    %119 = vector.broadcast %118 : vector<128x1xf32> to vector<128x64xf32>
    %120 = arith.subf %114, %119 : vector<128x64xf32>
    %121 = arith.mulf %120, %120 : vector<128x64xf32>
    %cst_77 = arith.constant dense<0.000000e+00> : vector<128xf32>
    %122 = vector.multi_reduction <add>, %121, %cst_77 [1] : vector<128x64xf32> to vector<128xf32>
    %123 = vector.shape_cast %122 : vector<128xf32> to vector<128x1xf32>
    %cst_78 = arith.constant 6.400000e+01 : f32
    %124 = vector.broadcast %cst_78 : f32 to vector<128x1xf32>
    %125 = arith.divf %123, %124 : vector<128x1xf32>
    %cst_79 = arith.constant 9.99999974E-6 : f32
    %126 = vector.broadcast %cst_79 : f32 to vector<128x1xf32>
    %127 = arith.addf %125, %126 : vector<128x1xf32>
    %128 = math.rsqrt %127 : vector<128x1xf32>
    %129 = vector.broadcast %128 : vector<128x1xf32> to vector<128x64xf32>
    %130 = arith.mulf %120, %129 : vector<128x64xf32>
    %c0_80 = arith.constant 0 : index
    %c0_81 = arith.constant 0 : index
    %131 = vector.load %arg9[%c0_80, %c0_81] : memref<1x64xf32, #tpu.memory_space<vmem>>, vector<1x64xf32>
    %132 = vector.broadcast %131 : vector<1x64xf32> to vector<128x64xf32>
    %133 = arith.mulf %130, %132 : vector<128x64xf32>
    %c0_82 = arith.constant 0 : index
    %c0_83 = arith.constant 0 : index
    %134 = vector.load %arg10[%c0_82, %c0_83] : memref<1x64xf32, #tpu.memory_space<vmem>>, vector<1x64xf32>
    %135 = vector.broadcast %134 : vector<1x64xf32> to vector<128x64xf32>
    %136 = arith.addf %133, %135 : vector<128x64xf32>
    %137 = arith.truncf %136 : vector<128x64xf32> to vector<128x64xbf16>
    %c0_84 = arith.constant 0 : index
    %c0_85 = arith.constant 0 : index
    %138 = vector.load %arg11[%c0_84, %c0_85] : memref<64x128xbf16, #tpu.memory_space<vmem>>, vector<64x128xbf16>
    %cst_86 = arith.constant dense<0.000000e+00> : vector<128x128xf32>
    %139 = tpu.matmul %137, %138, %cst_86 {dimension_numbers = #tpu.dot_dimension_numbers<[1], [0], [0], [1], [0, 0, 1, 1], [], []>} : vector<128x64xbf16>, vector<64x128xbf16>, vector<128x128xf32> -> vector<128x128xf32>
    %c0_87 = arith.constant 0 : index
    %c0_88 = arith.constant 0 : index
    %140 = vector.load %arg12[%c0_87, %c0_88] : memref<1x128xf32, #tpu.memory_space<vmem>>, vector<1x128xf32>
    %141 = vector.broadcast %140 : vector<1x128xf32> to vector<128x128xf32>
    %142 = arith.addf %139, %141 : vector<128x128xf32>
    %cst_89 = arith.constant 5.000000e-01 : f32
    %143 = vector.broadcast %cst_89 : f32 to vector<128x128xf32>
    %144 = arith.mulf %143, %142 : vector<128x128xf32>
    %cst_90 = arith.constant 0.707106769 : f32
    %145 = vector.broadcast %cst_90 : f32 to vector<128x128xf32>
    %146 = arith.mulf %142, %145 : vector<128x128xf32>
    %147 = math.erf %146 : vector<128x128xf32>
    %cst_91 = arith.constant 1.000000e+00 : f32
    %148 = vector.broadcast %cst_91 : f32 to vector<128x128xf32>
    %149 = arith.addf %148, %147 : vector<128x128xf32>
    %150 = arith.mulf %144, %149 : vector<128x128xf32>
    %151 = arith.truncf %150 : vector<128x128xf32> to vector<128x128xbf16>
    %c0_92 = arith.constant 0 : index
    %c0_93 = arith.constant 0 : index
    %152 = vector.load %arg13[%c0_92, %c0_93] : memref<128x64xbf16, #tpu.memory_space<vmem>>, vector<128x64xbf16>
    %cst_94 = arith.constant dense<0.000000e+00> : vector<128x64xf32>
    %153 = tpu.matmul %151, %152, %cst_94 {dimension_numbers = #tpu.dot_dimension_numbers<[1], [0], [0], [1], [0, 0, 1, 1], [], []>} : vector<128x128xbf16>, vector<128x64xbf16>, vector<128x64xf32> -> vector<128x64xf32>
    %c0_95 = arith.constant 0 : index
    %c0_96 = arith.constant 0 : index
    %154 = vector.load %arg14[%c0_95, %c0_96] : memref<1x64xf32, #tpu.memory_space<vmem>>, vector<1x64xf32>
    %155 = vector.broadcast %154 : vector<1x64xf32> to vector<128x64xf32>
    %156 = arith.addf %153, %155 : vector<128x64xf32>
    %157 = arith.addf %156, %114 : vector<128x64xf32>
    %c0_97 = arith.constant 0 : index
    %c0_98 = arith.constant 0 : index
    %c0_99 = arith.constant 0 : index
    %158 = vector.load %arg15[%c0_97, %c0_98, %c0_99] : memref<1x128x64xf32, #tpu.memory_space<vmem>>, vector<1x128x64xf32>
    %159 = vector.shape_cast %158 : vector<1x128x64xf32> to vector<128x64xf32>
    %160 = vector.shape_cast %157 : vector<128x64xf32> to vector<1x128x64xf32>
    tpu.vector_store %arg15[%c0_97, %c0_98, %c0_99], %160 {strides = array<i32>} : memref<1x128x64xf32, #tpu.memory_space<vmem>>, vector<1x128x64xf32>,
    return
  }
  func.func @transform_0(%arg0: i32) -> i32 {
    %c0_i32 = arith.constant 0 : i32
    %c0_i32_0 = arith.constant 0 : i32
    return %c0_i32 : i32
  }
  func.func @transform_1(%arg0: i32) -> (i32, i32, i32) {
    %c0_i32 = arith.constant 0 : i32
    %c0_i32_0 = arith.constant 0 : i32
    %c0_i32_1 = arith.constant 0 : i32
    return %arg0, %c0_i32, %c0_i32_0 : i32, i32, i32
  }
  func.func @transform_2(%arg0: i32) -> (i32, i32) {
    %c0_i32 = arith.constant 0 : i32
    %c0_i32_0 = arith.constant 0 : i32
    %c0_i32_1 = arith.constant 0 : i32
    return %c0_i32, %c0_i32_0 : i32, i32
  }
  func.func @transform_3(%arg0: i32) -> (i32, i32) {
    %c0_i32 = arith.constant 0 : i32
    %c0_i32_0 = arith.constant 0 : i32
    %c0_i32_1 = arith.constant 0 : i32
    return %c0_i32, %c0_i32_0 : i32, i32
  }
  func.func @transform_4(%arg0: i32) -> (i32, i32) {
    %c0_i32 = arith.constant 0 : i32
    %c0_i32_0 = arith.constant 0 : i32
    %c0_i32_1 = arith.constant 0 : i32
    return %c0_i32, %c0_i32_0 : i32, i32
  }
  func.func @transform_5(%arg0: i32) -> (i32, i32) {
    %c0_i32 = arith.constant 0 : i32
    %c0_i32_0 = arith.constant 0 : i32
    %c0_i32_1 = arith.constant 0 : i32
    return %c0_i32, %c0_i32_0 : i32, i32
  }
  func.func @transform_6(%arg0: i32) -> (i32, i32) {
    %c0_i32 = arith.constant 0 : i32
    %c0_i32_0 = arith.constant 0 : i32
    %c0_i32_1 = arith.constant 0 : i32
    return %c0_i32, %c0_i32_0 : i32, i32
  }
  func.func @transform_7(%arg0: i32) -> (i32, i32) {
    %c0_i32 = arith.constant 0 : i32
    %c0_i32_0 = arith.constant 0 : i32
    %c0_i32_1 = arith.constant 0 : i32
    return %c0_i32, %c0_i32_0 : i32, i32
  }
  func.func @transform_8(%arg0: i32) -> (i32, i32) {
    %c0_i32 = arith.constant 0 : i32
    %c0_i32_0 = arith.constant 0 : i32
    %c0_i32_1 = arith.constant 0 : i32
    return %c0_i32, %c0_i32_0 : i32, i32
  }
  func.func @transform_9(%arg0: i32) -> (i32, i32) {
    %c0_i32 = arith.constant 0 : i32
    %c0_i32_0 = arith.constant 0 : i32
    %c0_i32_1 = arith.constant 0 : i32
    return %c0_i32, %c0_i32_0 : i32, i32
  }
  func.func @transform_10(%arg0: i32) -> (i32, i32) {
    %c0_i32 = arith.constant 0 : i32
    %c0_i32_0 = arith.constant 0 : i32
    %c0_i32_1 = arith.constant 0 : i32
    return %c0_i32, %c0_i32_0 : i32, i32
  }
  func.func @transform_11(%arg0: i32) -> (i32, i32) {
    %c0_i32 = arith.constant 0 : i32
    %c0_i32_0 = arith.constant 0 : i32
    %c0_i32_1 = arith.constant 0 : i32
    return %c0_i32, %c0_i32_0 : i32, i32
  }
  func.func @transform_12(%arg0: i32) -> (i32, i32) {
    %c0_i32 = arith.constant 0 : i32
    %c0_i32_0 = arith.constant 0 : i32
    %c0_i32_1 = arith.constant 0 : i32
    return %c0_i32, %c0_i32_0 : i32, i32
  }
  func.func @transform_13(%arg0: i32) -> (i32, i32) {
    %c0_i32 = arith.constant 0 : i32
    %c0_i32_0 = arith.constant 0 : i32
    %c0_i32_1 = arith.constant 0 : i32
    return %c0_i32, %c0_i32_0 : i32, i32
  }
  func.func @transform_14(%arg0: i32) -> (i32, i32, i32) {
    %c0_i32 = arith.constant 0 : i32
    %c0_i32_0 = arith.constant 0 : i32
    %c0_i32_1 = arith.constant 0 : i32
    return %arg0, %c0_i32, %c0_i32_0 : i32, i32, i32
  }
}

</mosaic_0001>

<bundles_post_ra>
// kernel: topm_mhsa_block_forward.1
= control target key start
LH: loop header
LB: loop body
LE: loop exit
PB: predicated region body
PF: predicated region fallthrough
CT: control target
= control target key end

     0   :  { %19 = vsyncpa [#allocation8], 0  ;;  %s6151_s29 = smov 0   ;;  %s9055_s0 = inlined_call_operand.vmem [shape: f32[2], index: 0, kind: input, shape index: {}]   ;;  %s9056_s1 = inlined_call_operand.vmem [shape: f32[2,128,64], index: 1, kind: input, shape index: {}]   ;;  %s9057_s2 = inlined_call_operand.vmem [shape: f32[1,64], index: 2, kind: input, shape index: {}]   ;;  %s9058_s3 = inlined_call_operand.vmem [shape: f32[1,64], index: 3, kind: input, shape index: {}]   ;;  %s9059_s4 = inlined_call_operand.vmem [shape: bf16[64,192], index: 4, kind: input, shape index: {}]   ;;  %s9060_s5 = inlined_call_operand.vmem [shape: f32[1,192], index: 5, kind: input, shape index: {}]   ;;  %s9061_s6 = inlined_call_operand.vmem [shape: bf16[64,64], index: 6, kind: input, shape index: {}]   ;;  %s9062_s7 = inlined_call_operand.vmem [shape: f32[1,64], index: 7, kind: input, shape index: {}]   ;;  %s9063_s8 = inlined_call_operand.vmem [shape: f32[1,64], index: 8, kind: input, shape index: {}]   ;;  %s9064_s9 = inlined_call_operand.vmem [shape: f32[1,64], index: 9, kind: input, shape index: {}]   ;;  %s9065_s10 = inlined_call_operand.vmem [shape: bf16[64,128], index: 10, kind: input, shape index: {}]   ;;  %s9066_s11 = inlined_call_operand.vmem [shape: f32[1,128], index: 11, kind: input, shape index: {}]   ;;  %s9067_s12 = inlined_call_operand.vmem [shape: bf16[128,64], index: 12, kind: input, shape index: {}]   ;;  %s9068_s13 = inlined_call_operand.vmem [shape: f32[1,64], index: 13, kind: input, shape index: {}]   ;;  %s9069_s14 = inlined_call_operand.vmem [shape: f32[2,128,64], index: 14, kind: output, shape index: {}]  }
   0x1 LB: > { %s4572_s30 = sadd.s32 4294967295, %s5925_s29   ;;  %p4574_p0 = scmp.ge.s32.totalorder %s5925_s29, 1  ;;  %s5925_s29 = sphi %s6151_s29, %s25_s29  }
   0x2   : > { %p355_p1 = scmp.lt.s32.totalorder %s5925_s29, 3  ;;  %s368_s17 = sshll.u32 %s9055_s0, 4  ;;  %s369_s17 = int_to_ptr.vmem [resolvable:$true] %s368_s17 }
   0x3   : > { %p5234_p3 = scmp.eq.s32.totalorder %s4572_s30, 0  ;;  %s5764_s19 = scalar_lea.vmem %s369_s17, 16 }
   0x4   : > { %p6162_p2 = pnand %p4574_p0, %p355_p1  ;;  %p5765_p6 = scmp.ne.s32.totalorder %s369_s17, %s5764_s19 }
   0x5   : > { %p5772_p10 = scmp.lt.s32.totalorder %s369_s17, %s369_s17  ;;  %p5773_p11 = scmp.lt.s32.totalorder %s5764_s19, %s5764_s19 }
   0x6   : > { %p5230_p4 = pneg %p6162_p2 }
   0x7   : > { %p5774_p12 = por %p5773_p11, %p5772_p10 }
   0x8   : > { %p5231_p5 = pnand %p5234_p3, %p5230_p4 }
   0xa   : > { %p5766_p7 = pneg %p5231_p5 }
   0xc   : > { %p5767_p8 = pnand %p5766_p7, %p5765_p6 }
   0xe   : > { %p5768_p9 = pneg %p5767_p8 }
  0x10   : > { %p5775_p13 = pnand %p5774_p12, %p5768_p9 }
  0x12   : > { %5778 = shalt.err (!%p5775_p13)
}
  0x13   : > { %s6063_s20 = smov [#allocation7]   ;;  %425 = sbr.rel (%p6162_p2) target bundleno = 3485 (0xd9d), region = 76 }
  0x14   : > { %5233 = dma.vmem_to_smem (!%p5231_p5), %s369_s17, 16, %s6063_s20, [#allocation8]  }
  0x1a   : > { %5920 = dma.done.wait (%p5234_p3), [#allocation8], 16  }
  0x1b   : > { %5922 = vsyncadd (%p5234_p3), [#allocation8], 4294967280 }
  0x1c   : > { %431 = sfence }
  0x1d   : > { %p472_p0 = scmp.lt.s32.totalorder %s4572_s30, 1  ;;  %v4606_v0 = vld [vmem:[%s9062_s7] ss:$0 sm:$0xff]  ;;  %vm9250_vm0 = vcmask 523264   ;;  %s6418_s17 = sld [smem:[#allocation7]]  ;;  %vm9251_vm1 = vcmask 130048  }
  0x1e   : > { %s6420_s18 = sld [smem:[#allocation7 + $0x1]]  ;;  %s6065_s25 = smov 64  }
  0x1f   : > { %s9679_s30 = smov (!%p472_p0, %s4572_s30), 1  ;;  %s6067_s27 = smov 48  }
  0x20   : > { %s4798_s23 = sshll.u32 %s9679_s30, 7  ;;  %s6068_s28 = smov 96  }
  0x21   : > { %s6179_s26 = scalar_lea.vmem %s9056_s1, %s4798_s23  ;;  %s6184_s15 = scalar_lea.vmem %s9069_s14, %s4798_s23 }
  0x22   : > { %v6187_v1 = vld [vmem:[%s6179_s26] sm:$0xff]  ;;  %v6193_v3 = vld [vmem:[%s6179_s26 + $0x8] sm:$0xff]  ;;  %v6207_v11 = vld [vmem:[%s6179_s26 + $0x10] sm:$0xff]  ;;  %s6069_s30 = smov 32   ;;  %s6070_s16 = smov 80  }
  0x23   : > { %v6190_v2 = vld [vmem:[%s6179_s26 + $0x40] sm:$0xff]  ;;  %v503_v4 = vsel %vm9250_vm0, %v6187_v1, 0.0  ;;  %v1387_v5 = vadd.f32 %v4606_v0, %v6187_v1  ;;  %v6202_v8 = vld [vmem:[%s6179_s26 + $0x48] sm:$0xff]  ;;  %v1388_v9 = vadd.f32 %v4606_v0, %v6193_v3  ;;  %v6210_v12 = vld [vmem:[%s6179_s26 + $0x18] sm:$0xff]  ;;  %v506_v13 = vsel %vm9250_vm0, %v6193_v3, 0.0  ;;  %s6071_s19 = smov 16  }
  0x24   : > { %v527_v6 = vsel %vm9250_vm0, %v6190_v2, 0.0  ;;  %v1395_v7 = vadd.f32 %v4606_v0, %v6190_v2  ;;  %504 = vadd.xlane.f32.xlu0 %v503_v4  ;;  %v1396_v10 = vadd.f32 %v4606_v0, %v6202_v8  ;;  %v530_v14 = vsel %vm9250_vm0, %v6202_v8, 0.0  ;;  %v6221_v17 = vld [vmem:[%s6179_s26 + $0x50] sm:$0xff]  ;;  %v6224_v18 = vld [vmem:[%s6179_s26 + $0x58] sm:$0xff]  ;;  %v6231_v21 = vld [vmem:[%s6179_s26 + $0x20] sm:$0xff] }
  0x25   : > { %528 = vadd.xlane.f32.xlu1 %v527_v6  ;;  %1403 = vst.msk [vmem:[#allocation6] sm:$0xff] %vm9250_vm0, %v1387_v5  ;;  %v1389_v15 = vadd.f32 %v4606_v0, %v6207_v11  ;;  %v1390_v16 = vadd.f32 %v4606_v0, %v6210_v12  ;;  %1404 = vst.msk [vmem:[#allocation6 + $0x8] sm:$0xff] %vm9250_vm0, %v1388_v9  ;;  %v1397_v19 = vadd.f32 %v4606_v0, %v6221_v17  ;;  %v6234_v22 = vld [vmem:[%s6179_s26 + $0x28] sm:$0xff]  ;;  %v6241_v25 = vld [vmem:[%s6179_s26 + $0x60] sm:$0xff] }
  0x26   : > { %1411 = vst.msk [vmem:[#allocation6 + $0x40] sm:$0xff] %vm9250_vm0, %v1395_v7  ;;  %1412 = vst.msk [vmem:[#allocation6 + $0x48] sm:$0xff] %vm9250_vm0, %v1396_v10  ;;  %v1398_v20 = vadd.f32 %v4606_v0, %v6224_v18  ;;  %v1391_v23 = vadd.f32 %v4606_v0, %v6231_v21  ;;  %v1392_v24 = vadd.f32 %v4606_v0, %v6234_v22  ;;  %v6244_v26 = vld [vmem:[%s6179_s26 + $0x68] sm:$0xff]  ;;  %v6251_v29 = vld [vmem:[%s6179_s26 + $0x30] sm:$0xff]  ;;  %v509_v31 = vsel %vm9250_vm0, %v6207_v11, 0.0 }
  0x27   : > { %1405 = vst.msk [vmem:[#allocation6 + $0x10] sm:$0xff] %vm9250_vm0, %v1389_v15  ;;  %1406 = vst.msk [vmem:[#allocation6 + $0x18] sm:$0xff] %vm9250_vm0, %v1390_v16  ;;  %v1399_v27 = vadd.f32 %v4606_v0, %v6241_v25  ;;  %v1400_v28 = vadd.f32 %v4606_v0, %v6244_v26  ;;  %v6254_v30 = vld [vmem:[%s6179_s26 + $0x38] sm:$0xff]  ;;  %v512_v32 = vsel %vm9250_vm0, %v6210_v12, 0.0  ;;  %v1393_v33 = vadd.f32 %v4606_v0, %v6251_v29  ;;  %v6265_v35 = vld [vmem:[%s6179_s26 + $0x70] sm:$0xff] }
  0x28   : > { %507 = vadd.xlane.f32.xlu0 %v506_v13  ;;  %1413 = vst.msk [vmem:[#allocation6 + $0x50] sm:$0xff] %vm9250_vm0, %v1397_v19  ;;  %1414 = vst.msk [vmem:[#allocation6 + $0x58] sm:$0xff] %vm9250_vm0, %v1398_v20  ;;  %v1394_v34 = vadd.f32 %v4606_v0, %v6254_v30  ;;  %v6268_v36 = vld [vmem:[%s6179_s26 + $0x78] sm:$0xff]  ;;  %v1401_v37 = vadd.f32 %v4606_v0, %v6265_v35  ;;  %v533_v39 = vsel %vm9250_vm0, %v6221_v17, 0.0  ;;  %v536_v40 = vsel %vm9250_vm0, %v6224_v18, 0.0  ;;  %s6066_s26 = smov 112  }
  0x29   : > { %531 = vadd.xlane.f32.xlu1 %v530_v14  ;;  %1407 = vst.msk [vmem:[#allocation6 + $0x20] sm:$0xff] %vm9250_vm0, %v1391_v23  ;;  %1408 = vst.msk [vmem:[#allocation6 + $0x28] sm:$0xff] %vm9250_vm0, %v1392_v24  ;;  %v1402_v38 = vadd.f32 %v4606_v0, %v6268_v36  ;;  %v515_v41 = vsel %vm9250_vm0, %v6231_v21, 0.0  ;;  %v518_v42 = vsel %vm9250_vm0, %v6234_v22, 0.0  ;;  %v539_v43 = vsel %vm9250_vm0, %v6241_v25, 0.0 }
  0x2a   : > { %1415 = vst.msk [vmem:[#allocation6 + $0x60] sm:$0xff] %vm9250_vm0, %v1399_v27  ;;  %1416 = vst.msk [vmem:[#allocation6 + $0x68] sm:$0xff] %vm9250_vm0, %v1400_v28  ;;  %v542_v44 = vsel %vm9250_vm0, %v6244_v26, 0.0  ;;  %v521_v45 = vsel %vm9250_vm0, %v6251_v29, 0.0  ;;  %v524_v46 = vsel %vm9250_vm0, %v6254_v30, 0.0  ;;  %v545_v47 = vsel %vm9250_vm0, %v6265_v35, 0.0 }
  0x2b   : > { %1409 = vst.msk [vmem:[#allocation6 + $0x30] sm:$0xff] %vm9250_vm0, %v1393_v33  ;;  %1410 = vst.msk [vmem:[#allocation6 + $0x38] sm:$0xff] %vm9250_vm0, %v1394_v34  ;;  %v548_v48 = vsel %vm9250_vm0, %v6268_v36, 0.0 }
  0x2c   : > { %510 = vadd.xlane.f32.xlu0 %v509_v31  ;;  %1417 = vst.msk [vmem:[#allocation6 + $0x70] sm:$0xff] %vm9250_vm0, %v1401_v37  ;;  %1418 = vst.msk [vmem:[#allocation6 + $0x78] sm:$0xff] %vm9250_vm0, %v1402_v38 }
  0x2d   : > { %513 = vadd.xlane.f32.xlu1 %v512_v32 }
  0x30   : > { %534 = vadd.xlane.f32.xlu0 %v533_v39 }
  0x31   : > { %537 = vadd.xlane.f32.xlu1 %v536_v40 }
  0x34   : > { %516 = vadd.xlane.f32.xlu0 %v515_v41 }
  0x35   : > { %519 = vadd.xlane.f32.xlu1 %v518_v42 }
  0x38   : > { %540 = vadd.xlane.f32.xlu0 %v539_v43 }
  0x39   : > { %543 = vadd.xlane.f32.xlu1 %v542_v44 }
  0x3c   : > { %522 = vadd.xlane.f32.xlu0 %v521_v45 }
  0x3d   : > { %525 = vadd.xlane.f32.xlu1 %v524_v46 }
  0x40   : > { %546 = vadd.xlane.f32.xlu0 %v545_v47 }
  0x41   : > { %549 = vadd.xlane.f32.xlu1 %v548_v48 }
  0xb1   : > { %v505_v49 = vpop.xlane.xlu0 %504 }
  0xb2   : > { %v529_v50 = vpop.xlane.xlu1 %528  ;;  %v552_v51 = vmul.f32 0.015625, %v505_v49 }
  0xb3   : > { %v560_v52 = vmul.f32 0.015625, %v529_v50 }
  0xb4   : > { %v6299_v53 = vsub.f32 %v6187_v1, %v552_v51 }
  0xb5   : > { %v6302_v54 = vsub.f32 %v6190_v2, %v560_v52  ;;  %v508_v55 = vpop.xlane.xlu0 %507 }
  0xb6   : > { %v532_v56 = vpop.xlane.xlu1 %531  ;;  %v553_v57 = vmul.f32 0.015625, %v508_v55  ;;  %v584_v59 = vmul.f32 %v6299_v53, %v6299_v53 }
  0xb7   : > { %v561_v58 = vmul.f32 0.015625, %v532_v56  ;;  %v592_v60 = vmul.f32 %v6302_v54, %v6302_v54 }
  0xb8   : > { %v6309_v61 = vsub.f32 %v6193_v3, %v553_v57  ;;  %v600_v63 = vsel %vm9250_vm0, %v584_v59, 0.0 }
  0xb9   : > { %v6312_v62 = vsub.f32 %v6202_v8, %v561_v58  ;;  %601 = vadd.xlane.f32.xlu0 %v600_v63  ;;  %v511_v0 = vpop.xlane.xlu0 %510  ;;  %v624_v2 = vsel %vm9250_vm0, %v592_v60, 0.0 }
  0xba   : > { %v514_v1 = vpop.xlane.xlu1 %513  ;;  %v554_v4 = vmul.f32 0.015625, %v511_v0  ;;  %v585_v6 = vmul.f32 %v6309_v61, %v6309_v61 }
  0xbb   : > { %v555_v5 = vmul.f32 0.015625, %v514_v1  ;;  %v593_v7 = vmul.f32 %v6312_v62, %v6312_v62 }
  0xbc   : > { %v6321_v3 = vsub.f32 %v6207_v11, %v554_v4  ;;  %v603_v9 = vsel %vm9250_vm0, %v585_v6, 0.0 }
  0xbd   : > { %v6324_v8 = vsub.f32 %v6210_v12, %v555_v5  ;;  %625 = vadd.xlane.f32.xlu0 %v624_v2  ;;  %604 = vadd.xlane.f32.xlu1 %v603_v9  ;;  %v535_v10 = vpop.xlane.xlu0 %534  ;;  %v627_v14 = vsel %vm9250_vm0, %v593_v7, 0.0  ;;  %v5529_v2 = vld [vmem:[%s9059_s4 + $0x4] ss:$8 sps:$4 sm:$0xff]   ;;  %v5532_v7 = vld [vmem:[%s9059_s4 + $0x14] ss:$8 sps:$4 sm:$0xff]  }
  0xbe   : > { %v538_v13 = vpop.xlane.xlu1 %537  ;;  %v562_v15 = vmul.f32 0.015625, %v535_v10  ;;  %v586_v19 = vmul.f32 %v6321_v3, %v6321_v3  ;;  %850 = vmatprep.subr.bf16.mxu0 %v5529_v2  ;;  %5154 = vmatprep.subr.bf16.mxu1 %v5529_v2  ;;  %v5534_v10 = vld [vmem:[%s9059_s4 + $0x10] ss:$8 sps:$4 sm:$0xff]  }
  0xbf   : > { %v563_v16 = vmul.f32 0.015625, %v538_v13  ;;  %v587_v11 = vmul.f32 %v6324_v8, %v6324_v8  ;;  %v5535_v13 = vld [vmem:[%s9059_s4 + $0x24] ss:$8 sps:$4 sm:$0xff]  }
  0xc0   : > { %v6333_v20 = vsub.f32 %v6221_v17, %v562_v15  ;;  %v606_v23 = vsel %vm9250_vm0, %v586_v19, 0.0  ;;  %v5538_v15 = vld [vmem:[%s9059_s4 + $0x34] ss:$8 sps:$4 sm:$0xff]   ;;  %v6064_v19 = vmov 0  }
  0xc1   : > { %v6336_v12 = vsub.f32 %v6224_v18, %v563_v16  ;;  %628 = vadd.xlane.f32.xlu1 %v627_v14  ;;  %607 = vadd.xlane.f32.xlu0 %v606_v23  ;;  %v517_v24 = vpop.xlane.xlu0 %516  ;;  %v609_v28 = vsel %vm9250_vm0, %v587_v11, 0.0  ;;  %v5537_v14 = vld [vmem:[%s9059_s4 + $0x20] ss:$8 sps:$4 sm:$0xff]   ;;  %v5540_v16 = vld [vmem:[%s9059_s4 + $0x30] ss:$8 sps:$4 sm:$0xff]  }
  0xc2   : > { %v520_v27 = vpop.xlane.xlu1 %519  ;;  %v556_v31 = vmul.f32 0.015625, %v517_v24  ;;  %v594_v33 = vmul.f32 %v6333_v20, %v6333_v20  ;;  %882 = vmatprep.mubr.bf16.mxu0 %v6064_v19  ;;  %922 = vmatprep.mubr.bf16.mxu1 %v6064_v19 }
  0xc3   : > { %v557_v32 = vmul.f32 0.015625, %v520_v27  ;;  %v595_v17 = vmul.f32 %v6336_v12, %v6336_v12 }
  0xc4   : > { %v6345_v34 = vsub.f32 %v6231_v21, %v556_v31  ;;  %v630_v37 = vsel %vm9250_vm0, %v594_v33, 0.0 }
  0xc5   : > { %v6348_v18 = vsub.f32 %v6234_v22, %v557_v32  ;;  %610 = vadd.xlane.f32.xlu1 %v609_v28  ;;  %631 = vadd.xlane.f32.xlu0 %v630_v37  ;;  %v541_v38 = vpop.xlane.xlu0 %540  ;;  %v633_v40 = vsel %vm9250_vm0, %v595_v17, 0.0 }
  0xc6   : > { %v544_v39 = vpop.xlane.xlu1 %543  ;;  %v564_v41 = vmul.f32 0.015625, %v541_v38  ;;  %v588_v43 = vmul.f32 %v6345_v34, %v6345_v34 }
  0xc7   : > { %v565_v42 = vmul.f32 0.015625, %v544_v39  ;;  %v589_v21 = vmul.f32 %v6348_v18, %v6348_v18 }
  0xc8   : > { %v6357_v44 = vsub.f32 %v6241_v25, %v564_v41  ;;  %v612_v45 = vsel %vm9250_vm0, %v588_v43, 0.0 }
  0xc9   : > { %v6360_v22 = vsub.f32 %v6244_v26, %v565_v42  ;;  %634 = vadd.xlane.f32.xlu1 %v633_v40  ;;  %613 = vadd.xlane.f32.xlu0 %v612_v45  ;;  %v523_v46 = vpop.xlane.xlu0 %522  ;;  %v615_v48 = vsel %vm9250_vm0, %v589_v21, 0.0 }
  0xca   : > { %v526_v47 = vpop.xlane.xlu1 %525  ;;  %v558_v49 = vmul.f32 0.015625, %v523_v46  ;;  %v596_v51 = vmul.f32 %v6357_v44, %v6357_v44 }
  0xcb   : > { %v559_v50 = vmul.f32 0.015625, %v526_v47  ;;  %v597_v25 = vmul.f32 %v6360_v22, %v6360_v22 }
  0xcc   : > { %v6369_v52 = vsub.f32 %v6251_v29, %v558_v49  ;;  %v636_v55 = vsel %vm9250_vm0, %v596_v51, 0.0 }
  0xcd   : > { %v6372_v26 = vsub.f32 %v6254_v30, %v559_v50  ;;  %616 = vadd.xlane.f32.xlu1 %v615_v48  ;;  %637 = vadd.xlane.f32.xlu0 %v636_v55  ;;  %v547_v56 = vpop.xlane.xlu0 %546  ;;  %v639_v58 = vsel %vm9250_vm0, %v597_v25, 0.0 }
  0xce   : > { %v550_v57 = vpop.xlane.xlu1 %549  ;;  %v566_v59 = vmul.f32 0.015625, %v547_v56  ;;  %v590_v63 = vmul.f32 %v6369_v52, %v6369_v52 }
  0xcf   : > { %v567_v60 = vmul.f32 0.015625, %v550_v57  ;;  %v591_v29 = vmul.f32 %v6372_v26, %v6372_v26  ;;  %v6428_v57 = vld [vmem:[%s9057_s2] ss:$0 sm:$0xff] }
  0xd0   : > { %v6381_v0 = vsub.f32 %v6265_v35, %v566_v59  ;;  %v618_v1 = vsel %vm9250_vm0, %v590_v63, 0.0 }
  0xd1   : > { %v6384_v30 = vsub.f32 %v6268_v36, %v567_v60  ;;  %640 = vadd.xlane.f32.xlu1 %v639_v58  ;;  %619 = vadd.xlane.f32.xlu0 %v618_v1  ;;  %v621_v4 = vsel %vm9250_vm0, %v591_v29, 0.0  ;;  %v5531_v36 = vld [vmem:[%s9059_s4] ss:$8 sps:$4 sm:$0xff]  }
  0xd2   : > { %v598_v5 = vmul.f32 %v6381_v0, %v6381_v0  ;;  %851 = vmatpush1.bf16.msra.mxu0 %v5531_v36  ;;  %5158 = vmatpush1.bf16.msra.mxu1 %v5531_v36  ;;  %v6436_v36 = vld [vmem:[%s9058_s3] ss:$0 sm:$0xff] }
  0xd3   : > { %v599_v35 = vmul.f32 %v6384_v30, %v6384_v30  ;;  %852 = vmatprep.subr.bf16.mxu0 %v5532_v7  ;;  %5155 = vmatprep.subr.bf16.mxu1 %v5532_v7 }
  0xd4   : > { %v642_v6 = vsel %vm9250_vm0, %v598_v5, 0.0 }
  0xd5   : > { %622 = vadd.xlane.f32.xlu1 %v621_v4  ;;  %643 = vadd.xlane.f32.xlu0 %v642_v6  ;;  %v645_v9 = vsel %vm9250_vm0, %v599_v35, 0.0 }
  0xd6   : > { %853 = vmatpush1.bf16.msra.mxu0 %v5534_v10  ;;  %5159 = vmatpush1.bf16.msra.mxu1 %v5534_v10 }
  0xd7   : > { %854 = vmatprep.subr.bf16.mxu0 %v5535_v13  ;;  %5156 = vmatprep.subr.bf16.mxu1 %v5535_v13 }
  0xd9   : > { %646 = vadd.xlane.f32.xlu1 %v645_v9 }
  0xda   : > { %855 = vmatpush1.bf16.msra.mxu0 %v5537_v14  ;;  %5160 = vmatpush1.bf16.msra.mxu1 %v5537_v14 }
  0xdb   : > { %856 = vmatprep.subr.bf16.mxu0 %v5538_v15  ;;  %5157 = vmatprep.subr.bf16.mxu1 %v5538_v15 }
  0xde   : > { %857 = vmatpush1.bf16.msra.mxu0 %v5540_v16  ;;  %5161 = vmatpush1.bf16.msra.mxu1 %v5540_v16 }
 0x146   : > { %v602_v11 = vpop.xlane.xlu0 %601 }
 0x147   : > { %v648_v23 = vmul.f32 0.015625, %v602_v11 }
 0x149   : > { %v664_v24 = vadd.f32 1e-05, %v648_v23 }
 0x14a   : > { %v605_v27 = vpop.xlane.xlu1 %604  ;;  %v626_v28 = vpop.xlane.xlu0 %625 }
 0x14b   : > { %5545 = vrsqrt.f32 %v664_v24  ;;  %v649_v31 = vmul.f32 0.015625, %v605_v27  ;;  %v656_v32 = vmul.f32 0.015625, %v626_v28 }
 0x14d   : > { %v665_v33 = vadd.f32 1e-05, %v649_v31  ;;  %v672_v17 = vadd.f32 1e-05, %v656_v32 }
 0x14e   : > { %v629_v37 = vpop.xlane.xlu1 %628  ;;  %v608_v38 = vpop.xlane.xlu0 %607 }
 0x14f   : > { %5547 = vrsqrt.f32 %v665_v33  ;;  %v657_v39 = vmul.f32 0.015625, %v629_v37  ;;  %v650_v40 = vmul.f32 0.015625, %v608_v38 }
 0x150   : > { %5549 = vrsqrt.f32 %v672_v17 }
 0x151   : > { %v673_v41 = vadd.f32 1e-05, %v657_v39  ;;  %v666_v42 = vadd.f32 1e-05, %v650_v40 }
 0x152   : > { %v611_v43 = vpop.xlane.xlu1 %610  ;;  %v632_v21 = vpop.xlane.xlu0 %631 }
 0x153   : > { %5551 = vrsqrt.f32 %v673_v41  ;;  %v651_v45 = vmul.f32 0.015625, %v611_v43  ;;  %v658_v46 = vmul.f32 0.015625, %v632_v21 }
 0x154   : > { %5553 = vrsqrt.f32 %v666_v42 }
 0x155   : > { %v5546_v47 = vpop.eup %5545  ;;  %v667_v48 = vadd.f32 1e-05, %v651_v45  ;;  %v674_v49 = vadd.f32 1e-05, %v658_v46 }
 0x156   : > { %v696_v50 = vmul.f32 %v5546_v47, %v6299_v53  ;;  %v635_v51 = vpop.xlane.xlu1 %634  ;;  %v614_v25 = vpop.xlane.xlu0 %613 }
 0x157   : > { %5555 = vrsqrt.f32 %v667_v48  ;;  %v659_v55 = vmul.f32 0.015625, %v635_v51  ;;  %v652_v56 = vmul.f32 0.015625, %v614_v25 }
 0x158   : > { %5557 = vrsqrt.f32 %v674_v49  ;;  %v719_v53 = vmul.f32 %v6428_v57, %v696_v50 }
 0x159   : > { %v5548_v58 = vpop.eup %5547  ;;  %v675_v59 = vadd.f32 1e-05, %v659_v55  ;;  %v668_v60 = vadd.f32 1e-05, %v652_v56 }
 0x15a   : > { %v5550_v63 = vpop.eup %5549  ;;  %v697_v29 = vmul.f32 %v5548_v58, %v6309_v61  ;;  %v617_v1 = vpop.xlane.xlu1 %616 }
 0x15b   : > { %v638_v2 = vpop.xlane.xlu0 %637  ;;  %v704_v4 = vmul.f32 %v5550_v63, %v6302_v54  ;;  %5559 = vrsqrt.f32 %v675_v59  ;;  %v653_v5 = vmul.f32 0.015625, %v617_v1  ;;  %v742_v54 = vadd.f32 %v6436_v36, %v719_v53 }
 0x15c   : > { %v660_v35 = vmul.f32 0.015625, %v638_v2  ;;  %5561 = vrsqrt.f32 %v668_v60  ;;  %v720_v6 = vmul.f32 %v6428_v57, %v697_v29 }
 0x15d   : > { %v5552_v7 = vpop.eup %5551  ;;  %v669_v9 = vadd.f32 1e-05, %v653_v5  ;;  %v727_v11 = vmul.f32 %v6428_v57, %v704_v4 }
 0x15e   : > { %v676_v61 = vadd.f32 1e-05, %v660_v35  ;;  %v5554_v10 = vpop.eup %5553  ;;  %v705_v13 = vmul.f32 %v5552_v7, %v6312_v62  ;;  %v641_v14 = vpop.xlane.xlu1 %640  ;;  %v743_v16 = vadd.f32 %v6436_v36, %v720_v6 }
 0x15f   : > { %v620_v15 = vpop.xlane.xlu0 %619  ;;  %v698_v23 = vmul.f32 %v5554_v10, %v6321_v3  ;;  %5563 = vrsqrt.f32 %v669_v9  ;;  %v661_v24 = vmul.f32 0.015625, %v641_v14  ;;  %v750_v40 = vadd.f32 %v6436_v36, %v727_v11 }
 0x160   : > { %v654_v27 = vmul.f32 0.015625, %v620_v15  ;;  %5565 = vrsqrt.f32 %v676_v61  ;;  %v758_v28 = vpack.c.bf16 %v743_v16, %v742_v54  ;;  %v728_v31 = vmul.f32 %v6428_v57, %v705_v13 }
 0x161   : > { %v5556_v32 = vpop.eup %5555  ;;  %v677_v33 = vadd.f32 1e-05, %v661_v24  ;;  %v721_v41 = vmul.f32 %v6428_v57, %v698_v23 }
 0x162   : > { %v670_v62 = vadd.f32 1e-05, %v654_v27  ;;  %v5558_v17 = vpop.eup %5557  ;;  %v699_v37 = vmul.f32 %v5556_v32, %v6324_v8  ;;  %v623_v38 = vpop.xlane.xlu1 %622  ;;  %4594 = vmatmul.mubr.msk.bf16.vlgmr.msra.gmra.mrb[0].mxu0 %vm9250_vm0, %v758_v28  ;;  %v751_v3 = vadd.f32 %v6436_v36, %v728_v31 }
 0x163   : > { %v644_v39 = vpop.xlane.xlu0 %643  ;;  %v706_v42 = vmul.f32 %v5558_v17, %v6333_v20  ;;  %5567 = vrsqrt.f32 %v677_v33  ;;  %v655_v43 = vmul.f32 0.015625, %v623_v38  ;;  %892 = vmatprep.mubr.bf16.mxu0 %v6064_v19  ;;  %v744_v20 = vadd.f32 %v6436_v36, %v721_v41 }
 0x164   : > { %v662_v21 = vmul.f32 0.015625, %v644_v39  ;;  %5569 = vrsqrt.f32 %v670_v62  ;;  %v762_v45 = vpack.c.bf16 %v751_v3, %v750_v40  ;;  %v722_v8 = vmul.f32 %v6428_v57, %v699_v37  ;;  %v774_v3 = vld [vmem:[%s9060_s5] sm:$0x3] }
 0x165   : > { %v5560_v46 = vpop.eup %5559  ;;  %v671_v47 = vadd.f32 1e-05, %v655_v43  ;;  %v729_v55 = vmul.f32 %v6428_v57, %v706_v42  ;;  %v776_v38 = vlaneseq }
 0x166   : > { %v678_v48 = vadd.f32 1e-05, %v662_v21  ;;  %v5562_v49 = vpop.eup %5561  ;;  %v707_v50 = vmul.f32 %v5560_v46, %v6336_v12  ;;  %v647_v51 = vpop.xlane.xlu1 %646  ;;  %4598 = vmatmul.mubr.msk.bf16.vlgmr.msra.gmra.mrb[0].mxu1 %vm9250_vm0, %v762_v45  ;;  %v745_v25 = vadd.f32 %v6436_v36, %v722_v8 }
 0x167   : > { %v700_v56 = vmul.f32 %v5562_v49, %v6345_v34  ;;  %5571 = vrsqrt.f32 %v671_v47  ;;  %v663_v58 = vmul.f32 0.015625, %v647_v51  ;;  %932 = vmatprep.mubr.bf16.mxu1 %v6064_v19  ;;  %v752_v2 = vadd.f32 %v6436_v36, %v729_v55 }
 0x168   : > { %5573 = vrsqrt.f32 %v678_v48  ;;  %v759_v59 = vpack.c.bf16 %v745_v25, %v744_v20  ;;  %v730_v60 = vmul.f32 %v6428_v57, %v707_v50  ;;  %v777_v39 = vshrl.u32 %v776_v38, 7 }
 0x169   : > { %v5564_v12 = vpop.eup %5563  ;;  %v679_v63 = vadd.f32 1e-05, %v663_v58  ;;  %v723_v34 = vmul.f32 %v6428_v57, %v700_v56 }
 0x16a   : > { %v5566_v29 = vpop.eup %5565  ;;  %v701_v1 = vmul.f32 %v5564_v12, %v6348_v18  ;;  %4595 = vmatmul.mubr.msk.bf16.gmra.mrb[4].mxu0 %vm9250_vm0, %v759_v59  ;;  %v753_v53 = vadd.f32 %v6436_v36, %v730_v60  ;;  %v778_v40 = vsub.s32 0, %v777_v39 }
 0x16b   : > { %v708_v4 = vmul.f32 %v5566_v29, %v6357_v44  ;;  %5575 = vrsqrt.f32 %v679_v63  ;;  %902 = vmatprep.mubr.bf16.mxu0 %v6064_v19  ;;  %v746_v9 = vadd.f32 %v6436_v36, %v723_v34 }
 0x16c   : > { %v763_v5 = vpack.c.bf16 %v753_v53, %v752_v2  ;;  %v724_v35 = vmul.f32 %v6428_v57, %v701_v1  ;;  %v6499_v41 = vrot.slane %v774_v3, %v778_v40 }
 0x16d   : > { %v5568_v6 = vpop.eup %5567  ;;  %v731_v10 = vmul.f32 %v6428_v57, %v708_v4 }
 0x16e   : > { %v5570_v7 = vpop.eup %5569  ;;  %v709_v18 = vmul.f32 %v5568_v6, %v6360_v22  ;;  %4599 = vmatmul.mubr.msk.bf16.gmra.mrb[4].mxu1 %vm9250_vm0, %v763_v5  ;;  %v747_v61 = vadd.f32 %v6436_v36, %v724_v35 }
 0x16f   : > { %v702_v44 = vmul.f32 %v5570_v7, %v6369_v52  ;;  %942 = vmatprep.mubr.bf16.mxu1 %v6064_v19  ;;  %v754_v22 = vadd.f32 %v6436_v36, %v731_v10 }
 0x170   : > { %v760_v13 = vpack.c.bf16 %v747_v61, %v746_v9  ;;  %v732_v14 = vmul.f32 %v6428_v57, %v709_v18 }
 0x171   : > { %v5572_v15 = vpop.eup %5571  ;;  %v725_v23 = vmul.f32 %v6428_v57, %v702_v44 }
 0x172   : > { %v5574_v54 = vpop.eup %5573  ;;  %v703_v16 = vmul.f32 %v5572_v15, %v6372_v26  ;;  %4596 = vmatmul.mubr.msk.bf16.gmra.mrb[8].mxu0 %vm9250_vm0, %v760_v13  ;;  %v755_v11 = vadd.f32 %v6436_v36, %v732_v14 }
 0x173   : > { %v710_v24 = vmul.f32 %v5574_v54, %v6381_v0  ;;  %912 = vmatprep.mubr.bf16.mxu0 %v6064_v19  ;;  %v748_v26 = vadd.f32 %v6436_v36, %v725_v23 }
 0x174   : > { %v764_v52 = vpack.c.bf16 %v755_v11, %v754_v22  ;;  %v726_v27 = vmul.f32 %v6428_v57, %v703_v16 }
 0x175   : > { %v5576_v28 = vpop.eup %5575  ;;  %v733_v33 = vmul.f32 %v6428_v57, %v710_v24 }
 0x176   : > { %v711_v31 = vmul.f32 %v5576_v28, %v6384_v30  ;;  %4600 = vmatmul.mubr.msk.bf16.gmra.mrb[8].mxu1 %vm9250_vm0, %v764_v52  ;;  %v749_v32 = vadd.f32 %v6436_v36, %v726_v27 }
 0x177   : > { %952 = vmatprep.mubr.bf16.mxu1 %v6064_v19  ;;  %v756_v17 = vadd.f32 %v6436_v36, %v733_v33  ;;  %v782_v19 = vsub.s32 1, %v777_v39 }
 0x178   : > { %v761_v62 = vpack.c.bf16 %v749_v32, %v748_v26  ;;  %v734_v0 = vmul.f32 %v6428_v57, %v711_v31 }
 0x179   : > { %v6501_v42 = vrot.slane %v774_v3, %v782_v19 }
 0x17a   : > { %4597 = vmatmul.mubr.msk.bf16.gmra.mrb[12].mxu0 %vm9250_vm0, %v761_v62  ;;  %v757_v37 = vadd.f32 %v6436_v36, %v734_v0 }
 0x17c   : > { %v765_v30 = vpack.c.bf16 %v757_v37, %v756_v17 }
 0x17e   : > { %4601 = vmatmul.mubr.msk.bf16.gmra.mrb[12].mxu1 %vm9250_vm0, %v765_v30 }
 0x235   : > { %v884_v57 = vpop.f32.mrb[0].mxu0 }
 0x236   : > { %v886_v43 = vpop.f32.mrb[1].mxu0  ;;  %v885_v36 = vadd.f32 %v884_v57, %v6499_v41 }
 0x237   : > { %v888_v21 = vpop.f32.mrb[2].mxu0  ;;  %v887_v46 = vadd.f32 %v886_v43, %v6501_v42 }
 0x238   : > { %v889_v45 = vadd.f32 %v888_v21, %v6499_v41  ;;  %v890_v8 = vpop.f32.mrb[3].mxu0 }
 0x239   : > { %v891_v47 = vadd.f32 %v890_v8, %v6501_v42  ;;  %v924_v48 = vpop.f32.mrb[0].mxu1 }
 0x23a   : > { %v6507_v49 = vpack.c.bf16 %v889_v45, %v885_v36  ;;  %v926_v50 = vpop.f32.mrb[1].mxu1  ;;  %v925_v25 = vadd.f32 %v924_v48, %v6499_v41 }
 0x23b   : > { %v6509_v51 = vpack.c.bf16 %v891_v47, %v887_v46  ;;  %v928_v20 = vpop.f32.mrb[2].mxu1  ;;  %v927_v58 = vadd.f32 %v926_v50, %v6501_v42 }
 0x23c   : > { %972 = vst.msk [vmem:[#allocation2] sm:$0xff] %vm9251_vm1, %v6507_v49  ;;  %v929_v55 = vadd.f32 %v928_v20, %v6499_v41  ;;  %988 = vrot.lane.b32.xlu0 %v6507_v49, %s6065_s25  ;;  %v930_v56 = vpop.f32.mrb[3].mxu1 }
 0x23d   : > { %1028 = vst.msk [vmem:[#allocation4] sm:$0xff] %vm9251_vm1, %v6509_v51  ;;  %v931_v59 = vadd.f32 %v930_v56, %v6501_v42  ;;  %v894_v60 = vpop.f32.mrb[4].mxu0 }
 0x23e   : > { %v6521_v12 = vpack.c.bf16 %v929_v55, %v925_v25  ;;  %v896_v63 = vpop.f32.mrb[5].mxu0  ;;  %v895_v2 = vadd.f32 %v894_v60, %v6499_v41 }
 0x23f   : > { %v6523_v29 = vpack.c.bf16 %v931_v59, %v927_v58  ;;  %v898_v1 = vpop.f32.mrb[6].mxu0  ;;  %v897_v4 = vadd.f32 %v896_v63, %v6501_v42 }
 0x240   : > { %976 = vst.msk [vmem:[#allocation2 + $0x20] sm:$0xff] %vm9251_vm1, %v6521_v12  ;;  %v899_v53 = vadd.f32 %v898_v1, %v6499_v41  ;;  %996 = vrot.lane.b32.xlu0 %v6521_v12, %s6065_s25  ;;  %v900_v34 = vpop.f32.mrb[7].mxu0 }
 0x241   : > { %1032 = vst.msk [vmem:[#allocation4 + $0x20] sm:$0xff] %vm9251_vm1, %v6523_v29  ;;  %v901_v5 = vadd.f32 %v900_v34, %v6501_v42  ;;  %v934_v35 = vpop.f32.mrb[4].mxu1 }
 0x242   : > { %v6535_v6 = vpack.c.bf16 %v899_v53, %v895_v2  ;;  %v936_v7 = vpop.f32.mrb[5].mxu1  ;;  %v935_v61 = vadd.f32 %v934_v35, %v6499_v41 }
 0x243   : > { %v6537_v18 = vpack.c.bf16 %v901_v5, %v897_v4  ;;  %v938_v9 = vpop.f32.mrb[6].mxu1  ;;  %v937_v13 = vadd.f32 %v936_v7, %v6501_v42 }
 0x244   : > { %973 = vst.msk [vmem:[#allocation2 + $0x8] sm:$0xff] %vm9251_vm1, %v6535_v6  ;;  %v939_v10 = vadd.f32 %v938_v9, %v6499_v41  ;;  %1045 = vrot.lane.b32.xlu0 %v6507_v49, %s6066_s26  ;;  %990 = vrot.lane.b32.xlu1 %v6535_v6, %s6065_s25  ;;  %v940_v44 = vpop.f32.mrb[7].mxu1 }
 0x245   : > { %1029 = vst.msk [vmem:[#allocation4 + $0x8] sm:$0xff] %vm9251_vm1, %v6537_v18  ;;  %v941_v14 = vadd.f32 %v940_v44, %v6501_v42  ;;  %v904_v15 = vpop.f32.mrb[8].mxu0 }
 0x246   : > { %v6551_v54 = vpack.c.bf16 %v939_v10, %v935_v61  ;;  %v906_v16 = vpop.f32.mrb[9].mxu0  ;;  %v905_v23 = vadd.f32 %v904_v15, %v6499_v41  ;;  %v5543_v15 = vld [vmem:[%s9061_s6 + $0x10] sm:$0xff]  }
 0x247   : > { %v6553_v22 = vpack.c.bf16 %v941_v14, %v937_v13  ;;  %v908_v11 = vpop.f32.mrb[10].mxu0  ;;  %v907_v27 = vadd.f32 %v906_v16, %v6501_v42  ;;  %v5541_v13 = vld [vmem:[%s9061_s6] sm:$0xff]   ;;  %v5542_v14 = vld [vmem:[%s9061_s6 + $0x8] sm:$0xff]   ;;  %1270 = vst.msk [vmem:[#allocation5 + $0x10] sm:$0xff] %vm9250_vm0, %v5543_v15 }
 0x248   : > { %977 = vst.msk [vmem:[#allocation2 + $0x28] sm:$0xff] %vm9251_vm1, %v6551_v54  ;;  %v909_v24 = vadd.f32 %v908_v11, %v6499_v41  ;;  %1053 = vrot.lane.b32.xlu0 %v6521_v12, %s6066_s26  ;;  %998 = vrot.lane.b32.xlu1 %v6551_v54, %s6065_s25  ;;  %v910_v52 = vpop.f32.mrb[11].mxu0 }
 0x249   : > { %1033 = vst.msk [vmem:[#allocation4 + $0x28] sm:$0xff] %vm9251_vm1, %v6553_v22  ;;  %v911_v28 = vadd.f32 %v910_v52, %v6501_v42  ;;  %v944_v31 = vpop.f32.mrb[8].mxu1 }
 0x24a   : > { %v6567_v26 = vpack.c.bf16 %v909_v24, %v905_v23  ;;  %v946_v32 = vpop.f32.mrb[9].mxu1  ;;  %v945_v0 = vadd.f32 %v944_v31, %v6499_v41  ;;  %1044 = vst.msk [vmem:[#allocation5] sm:$0xff] %vm9250_vm0, %v5541_v13  ;;  %1161 = vst.msk [vmem:[#allocation5 + $0x8] sm:$0xff] %vm9250_vm0, %v5542_v14 }
 0x24b   : > { %v6569_v33 = vpack.c.bf16 %v911_v28, %v907_v27  ;;  %v948_v62 = vpop.f32.mrb[10].mxu1  ;;  %v947_v30 = vadd.f32 %v946_v32, %v6501_v42 }
 0x24c   : > { %974 = vst.msk [vmem:[#allocation2 + $0x10] sm:$0xff] %vm9251_vm1, %v6567_v26  ;;  %v949_v17 = vadd.f32 %v948_v62, %v6499_v41  ;;  %1078 = vrot.lane.b32.xlu0 %v6507_v49, %s6067_s27  ;;  %1047 = vrot.lane.b32.xlu1 %v6535_v6, %s6066_s26  ;;  %v950_v37 = vpop.f32.mrb[11].mxu1 }
 0x24d   : > { %1030 = vst.msk [vmem:[#allocation4 + $0x10] sm:$0xff] %vm9251_vm1, %v6569_v33  ;;  %v951_v38 = vadd.f32 %v950_v37, %v6501_v42  ;;  %v914_v39 = vpop.f32.mrb[12].mxu0 }
 0x24e   : > { %v6583_v40 = vpack.c.bf16 %v949_v17, %v945_v0  ;;  %v916_v3 = vpop.f32.mrb[13].mxu0  ;;  %v915_v43 = vadd.f32 %v914_v39, %v6499_v41 }
 0x24f   : > { %v6585_v19 = vpack.c.bf16 %v951_v38, %v947_v30  ;;  %v918_v57 = vpop.f32.mrb[14].mxu0  ;;  %v917_v45 = vadd.f32 %v916_v3, %v6501_v42 }
 0x250   : > { %978 = vst.msk [vmem:[#allocation2 + $0x30] sm:$0xff] %vm9251_vm1, %v6583_v40  ;;  %v919_v21 = vadd.f32 %v918_v57, %v6499_v41  ;;  %1086 = vrot.lane.b32.xlu0 %v6521_v12, %s6067_s27  ;;  %1055 = vrot.lane.b32.xlu1 %v6551_v54, %s6066_s26  ;;  %v920_v36 = vpop.f32.mrb[15].mxu0 }
 0x251   : > { %1034 = vst.msk [vmem:[#allocation4 + $0x30] sm:$0xff] %vm9251_vm1, %v6585_v19  ;;  %v921_v8 = vadd.f32 %v920_v36, %v6501_v42  ;;  %v954_v46 = vpop.f32.mrb[12].mxu1 }
 0x252   : > { %v6599_v47 = vpack.c.bf16 %v919_v21, %v915_v43  ;;  %v956_v48 = vpop.f32.mrb[13].mxu1  ;;  %v955_v25 = vadd.f32 %v954_v46, %v6499_v41 }
 0x253   : > { %v6601_v50 = vpack.c.bf16 %v921_v8, %v917_v45  ;;  %v958_v20 = vpop.f32.mrb[14].mxu1  ;;  %v957_v58 = vadd.f32 %v956_v48, %v6501_v42 }
 0x254   : > { %975 = vst.msk [vmem:[#allocation2 + $0x18] sm:$0xff] %vm9251_vm1, %v6599_v47  ;;  %v959_v55 = vadd.f32 %v958_v20, %v6499_v41  ;;  %1162 = vrot.lane.b32.xlu0 %v6507_v49, %s6068_s28  ;;  %1080 = vrot.lane.b32.xlu1 %v6535_v6, %s6067_s27  ;;  %v960_v56 = vpop.f32.mrb[15].mxu1 }
 0x255   : > { %1031 = vst.msk [vmem:[#allocation4 + $0x18] sm:$0xff] %vm9251_vm1, %v6601_v50  ;;  %v961_v59 = vadd.f32 %v960_v56, %v6501_v42 }
 0x256   : > { %v6615_v60 = vpack.c.bf16 %v959_v55, %v955_v25 }
 0x257   : > { %v6617_v63 = vpack.c.bf16 %v961_v59, %v957_v58 }
 0x258   : > { %979 = vst.msk [vmem:[#allocation2 + $0x38] sm:$0xff] %vm9251_vm1, %v6615_v60  ;;  %1170 = vrot.lane.b32.xlu0 %v6521_v12, %s6068_s28  ;;  %1088 = vrot.lane.b32.xlu1 %v6551_v54, %s6067_s27 }
 0x259   : > { %1035 = vst.msk [vmem:[#allocation4 + $0x38] sm:$0xff] %vm9251_vm1, %v6617_v63 }
 0x25c   : > { %1195 = vrot.lane.b32.xlu0 %v6507_v49, %s6069_s30  ;;  %1164 = vrot.lane.b32.xlu1 %v6535_v6, %s6068_s28 }
 0x260   : > { %1203 = vrot.lane.b32.xlu0 %v6521_v12, %s6069_s30  ;;  %1172 = vrot.lane.b32.xlu1 %v6551_v54, %s6068_s28 }
 0x264   : > { %1271 = vrot.lane.b32.xlu0 %v6507_v49, %s6070_s16  ;;  %1197 = vrot.lane.b32.xlu1 %v6535_v6, %s6069_s30 }
 0x268   : > { %1279 = vrot.lane.b32.xlu0 %v6521_v12, %s6070_s16  ;;  %1205 = vrot.lane.b32.xlu1 %v6551_v54, %s6069_s30 }
 0x26c   : > { %1304 = vrot.lane.b32.xlu0 %v6507_v49, %s6071_s19  ;;  %1273 = vrot.lane.b32.xlu1 %v6535_v6, %s6070_s16 }
 0x270   : > { %1312 = vrot.lane.b32.xlu0 %v6521_v12, %s6071_s19  ;;  %1281 = vrot.lane.b32.xlu1 %v6551_v54, %s6070_s16 }
 0x274   : > { %1119 = vrot.lane.b32.xlu0 %v6509_v51, %s6066_s26  ;;  %1306 = vrot.lane.b32.xlu1 %v6535_v6, %s6071_s19 }
 0x278   : > { %1127 = vrot.lane.b32.xlu0 %v6523_v29, %s6066_s26  ;;  %1314 = vrot.lane.b32.xlu1 %v6551_v54, %s6071_s19  ;;  %v5544_v54 = vld [vmem:[%s9061_s6 + $0x18] sm:$0xff]  }
 0x279   : > { %1379 = vst.msk [vmem:[#allocation5 + $0x18] sm:$0xff] %vm9250_vm0, %v5544_v54 }
 0x27c   : > { %1228 = vrot.lane.b32.xlu0 %v6509_v51, %s6068_s28  ;;  %1121 = vrot.lane.b32.xlu1 %v6537_v18, %s6066_s26 }
 0x280   : > { %1236 = vrot.lane.b32.xlu0 %v6523_v29, %s6068_s28  ;;  %1129 = vrot.lane.b32.xlu1 %v6553_v22, %s6066_s26 }
 0x284   : > { %1337 = vrot.lane.b32.xlu0 %v6509_v51, %s6070_s16  ;;  %1230 = vrot.lane.b32.xlu1 %v6537_v18, %s6068_s28 }
 0x288   : > { %1345 = vrot.lane.b32.xlu0 %v6523_v29, %s6070_s16  ;;  %1238 = vrot.lane.b32.xlu1 %v6553_v22, %s6068_s28 }
 0x28c   : > { %1339 = vrot.lane.b32.xlu1 %v6537_v18, %s6070_s16  ;;  %1000 = vrot.lane.b32.xlu0 %v6583_v40, %s6065_s25 }
 0x290   : > { %1347 = vrot.lane.b32.xlu1 %v6553_v22, %s6070_s16  ;;  %1049 = vrot.lane.b32.xlu0 %v6567_v26, %s6066_s26 }
 0x294   : > { %992 = vrot.lane.b32.xlu1 %v6567_v26, %s6065_s25  ;;  %1057 = vrot.lane.b32.xlu0 %v6583_v40, %s6066_s26 }
 0x298   : > { %1082 = vrot.lane.b32.xlu0 %v6567_v26, %s6067_s27  ;;  %994 = vrot.lane.b32.xlu1 %v6599_v47, %s6065_s25 }
 0x29c   : > { %1090 = vrot.lane.b32.xlu0 %v6583_v40, %s6067_s27  ;;  %1002 = vrot.lane.b32.xlu1 %v6615_v60, %s6065_s25 }
 0x2a0   : > { %1166 = vrot.lane.b32.xlu0 %v6567_v26, %s6068_s28  ;;  %1051 = vrot.lane.b32.xlu1 %v6599_v47, %s6066_s26 }
 0x2a4   : > { %1174 = vrot.lane.b32.xlu0 %v6583_v40, %s6068_s28  ;;  %1059 = vrot.lane.b32.xlu1 %v6615_v60, %s6066_s26 }
 0x2a8   : > { %1199 = vrot.lane.b32.xlu0 %v6567_v26, %s6069_s30  ;;  %1084 = vrot.lane.b32.xlu1 %v6599_v47, %s6067_s27 }
 0x2ac   : > { %1207 = vrot.lane.b32.xlu0 %v6583_v40, %s6069_s30  ;;  %1092 = vrot.lane.b32.xlu1 %v6615_v60, %s6067_s27 }
 0x2ae   : > { %v989_v41 = vpop.permute.xlu0 %988 }
 0x2af   : > { %1012 = vst.msk [vmem:[#allocation3] sm:$0xff] %vm9251_vm1, %v989_v41 }
 0x2b0   : > { %1275 = vrot.lane.b32.xlu0 %v6567_v26, %s6070_s16  ;;  %1168 = vrot.lane.b32.xlu1 %v6599_v47, %s6068_s28 }
 0x2b2   : > { %v997_v42 = vpop.permute.xlu0 %996 }
 0x2b3   : > { %1016 = vst.msk [vmem:[#allocation3 + $0x20] sm:$0xff] %vm9251_vm1, %v997_v42 }
 0x2b4   : > { %1283 = vrot.lane.b32.xlu0 %v6583_v40, %s6070_s16  ;;  %1176 = vrot.lane.b32.xlu1 %v6615_v60, %s6068_s28 }
 0x2b6   : > { %v991_v49 = vpop.permute.xlu1 %990  ;;  %v1046_v51 = vpop.permute.xlu0 %1045 }
 0x2b7   : > { %1013 = vst.msk [vmem:[#allocation3 + $0x8] sm:$0xff] %vm9251_vm1, %v991_v49  ;;  %1070 = vst.msk [vmem:[#allocation2 + $0x40] sm:$0xff] %vm9251_vm1, %v1046_v51 }
 0x2b8   : > { %1308 = vrot.lane.b32.xlu0 %v6567_v26, %s6071_s19  ;;  %1201 = vrot.lane.b32.xlu1 %v6599_v47, %s6069_s30 }
 0x2ba   : > { %v999_v12 = vpop.permute.xlu1 %998  ;;  %v1054_v29 = vpop.permute.xlu0 %1053 }
 0x2bb   : > { %1017 = vst.msk [vmem:[#allocation3 + $0x28] sm:$0xff] %vm9251_vm1, %v999_v12  ;;  %1074 = vst.msk [vmem:[#allocation2 + $0x60] sm:$0xff] %vm9251_vm1, %v1054_v29 }
 0x2bc   : > { %1316 = vrot.lane.b32.xlu0 %v6583_v40, %s6071_s19  ;;  %1209 = vrot.lane.b32.xlu1 %v6615_v60, %s6069_s30 }
 0x2be   : > { %v1048_v1 = vpop.permute.xlu1 %1047  ;;  %v1079_v2 = vpop.permute.xlu0 %1078 }
 0x2bf   : > { %1071 = vst.msk [vmem:[#allocation2 + $0x48] sm:$0xff] %vm9251_vm1, %v1048_v1  ;;  %1103 = vst.msk [vmem:[#allocation3 + $0x40] sm:$0xff] %vm9251_vm1, %v1079_v2 }
 0x2c0   : > { %1123 = vrot.lane.b32.xlu0 %v6569_v33, %s6066_s26  ;;  %1277 = vrot.lane.b32.xlu1 %v6599_v47, %s6070_s16 }
 0x2c2   : > { %v1056_v53 = vpop.permute.xlu1 %1055  ;;  %v1087_v34 = vpop.permute.xlu0 %1086 }
 0x2c3   : > { %1075 = vst.msk [vmem:[#allocation2 + $0x68] sm:$0xff] %vm9251_vm1, %v1056_v53  ;;  %1107 = vst.msk [vmem:[#allocation3 + $0x60] sm:$0xff] %vm9251_vm1, %v1087_v34 }
 0x2c4   : > { %1131 = vrot.lane.b32.xlu0 %v6585_v19, %s6066_s26  ;;  %1285 = vrot.lane.b32.xlu1 %v6615_v60, %s6070_s16 }
 0x2c6   : > { %v1081_v4 = vpop.permute.xlu1 %1080  ;;  %v1163_v5 = vpop.permute.xlu0 %1162 }
 0x2c7   : > { %1104 = vst.msk [vmem:[#allocation3 + $0x48] sm:$0xff] %vm9251_vm1, %v1081_v4  ;;  %1187 = vst.msk [vmem:[#allocation2 + $0x80] sm:$0xff] %vm9251_vm1, %v1163_v5 }
 0x2c8   : > { %1232 = vrot.lane.b32.xlu0 %v6569_v33, %s6068_s28  ;;  %1310 = vrot.lane.b32.xlu1 %v6599_v47, %s6071_s19 }
 0x2ca   : > { %v1089_v35 = vpop.permute.xlu1 %1088  ;;  %v1171_v6 = vpop.permute.xlu0 %1170 }
 0x2cb   : > { %1108 = vst.msk [vmem:[#allocation3 + $0x68] sm:$0xff] %vm9251_vm1, %v1089_v35  ;;  %1191 = vst.msk [vmem:[#allocation2 + $0xa0] sm:$0xff] %vm9251_vm1, %v1171_v6 }
 0x2cc   : > { %1240 = vrot.lane.b32.xlu0 %v6585_v19, %s6068_s28  ;;  %1318 = vrot.lane.b32.xlu1 %v6615_v60, %s6071_s19 }
 0x2ce   : > { %v1165_v7 = vpop.permute.xlu1 %1164  ;;  %v1196_v18 = vpop.permute.xlu0 %1195 }
 0x2cf   : > { %1188 = vst.msk [vmem:[#allocation2 + $0x88] sm:$0xff] %vm9251_vm1, %v1165_v7  ;;  %1220 = vst.msk [vmem:[#allocation3 + $0x80] sm:$0xff] %vm9251_vm1, %v1196_v18 }
 0x2d0   : > { %1341 = vrot.lane.b32.xlu0 %v6569_v33, %s6070_s16  ;;  %1125 = vrot.lane.b32.xlu1 %v6601_v50, %s6066_s26 }
 0x2d2   : > { %v1173_v9 = vpop.permute.xlu1 %1172  ;;  %v1204_v61 = vpop.permute.xlu0 %1203 }
 0x2d3   : > { %1192 = vst.msk [vmem:[#allocation2 + $0xa8] sm:$0xff] %vm9251_vm1, %v1173_v9  ;;  %1224 = vst.msk [vmem:[#allocation3 + $0xa0] sm:$0xff] %vm9251_vm1, %v1204_v61 }
 0x2d4   : > { %1349 = vrot.lane.b32.xlu0 %v6585_v19, %s6070_s16  ;;  %1133 = vrot.lane.b32.xlu1 %v6617_v63, %s6066_s26 }
 0x2d6   : > { %v1198_v10 = vpop.permute.xlu1 %1197  ;;  %v1272_v44 = vpop.permute.xlu0 %1271 }
 0x2d7   : > { %1221 = vst.msk [vmem:[#allocation3 + $0x88] sm:$0xff] %vm9251_vm1, %v1198_v10  ;;  %1296 = vst.msk [vmem:[#allocation2 + $0xc0] sm:$0xff] %vm9251_vm1, %v1272_v44 }
 0x2d8   : > { %1234 = vrot.lane.b32.xlu1 %v6601_v50, %s6068_s28 }
 0x2da   : > { %v1206_v16 = vpop.permute.xlu1 %1205  ;;  %v1280_v22 = vpop.permute.xlu0 %1279 }
 0x2db   : > { %1225 = vst.msk [vmem:[#allocation3 + $0xa8] sm:$0xff] %vm9251_vm1, %v1206_v16  ;;  %1300 = vst.msk [vmem:[#allocation2 + $0xe0] sm:$0xff] %vm9251_vm1, %v1280_v22 }
 0x2dc   : > { %1242 = vrot.lane.b32.xlu1 %v6617_v63, %s6068_s28  ;;  %s6855_s28 = smov 0  }
 0x2de   : > { %v1274_v11 = vpop.permute.xlu1 %1273  ;;  %v1305_v23 = vpop.permute.xlu0 %1304 }
 0x2df   : > { %1297 = vst.msk [vmem:[#allocation2 + $0xc8] sm:$0xff] %vm9251_vm1, %v1274_v11  ;;  %1329 = vst.msk [vmem:[#allocation3 + $0xc0] sm:$0xff] %vm9251_vm1, %v1305_v23 }
 0x2e0   : > { %1343 = vrot.lane.b32.xlu1 %v6601_v50, %s6070_s16 }
 0x2e2   : > { %v1282_v24 = vpop.permute.xlu1 %1281  ;;  %v1313_v52 = vpop.permute.xlu0 %1312 }
 0x2e3   : > { %1301 = vst.msk [vmem:[#allocation2 + $0xe8] sm:$0xff] %vm9251_vm1, %v1282_v24  ;;  %1333 = vst.msk [vmem:[#allocation3 + $0xe0] sm:$0xff] %vm9251_vm1, %v1313_v52 }
 0x2e4   : > { %1351 = vrot.lane.b32.xlu1 %v6617_v63, %s6070_s16 }
 0x2e6   : > { %v1307_v27 = vpop.permute.xlu1 %1306  ;;  %v1120_v28 = vpop.permute.xlu0 %1119 }
 0x2e7   : > { %1330 = vst.msk [vmem:[#allocation3 + $0xc8] sm:$0xff] %vm9251_vm1, %v1307_v27  ;;  %1144 = vst.msk [vmem:[#allocation4 + $0x40] sm:$0xff] %vm9251_vm1, %v1120_v28 }
 0x2ea   : > { %v1315_v31 = vpop.permute.xlu1 %1314  ;;  %v1128_v26 = vpop.permute.xlu0 %1127 }
 0x2eb   : > { %1334 = vst.msk [vmem:[#allocation3 + $0xe8] sm:$0xff] %vm9251_vm1, %v1315_v31  ;;  %1148 = vst.msk [vmem:[#allocation4 + $0x60] sm:$0xff] %vm9251_vm1, %v1128_v26 }
 0x2ee   : > { %v1122_v32 = vpop.permute.xlu1 %1121  ;;  %v1229_v33 = vpop.permute.xlu0 %1228 }
 0x2ef   : > { %1145 = vst.msk [vmem:[#allocation4 + $0x48] sm:$0xff] %vm9251_vm1, %v1122_v32  ;;  %1253 = vst.msk [vmem:[#allocation4 + $0x80] sm:$0xff] %vm9251_vm1, %v1229_v33 }
 0x2f2   : > { %v1130_v62 = vpop.permute.xlu1 %1129  ;;  %v1237_v0 = vpop.permute.xlu0 %1236 }
 0x2f3   : > { %1149 = vst.msk [vmem:[#allocation4 + $0x68] sm:$0xff] %vm9251_vm1, %v1130_v62  ;;  %1257 = vst.msk [vmem:[#allocation4 + $0xa0] sm:$0xff] %vm9251_vm1, %v1237_v0 }
 0x2f6   : > { %v1231_v17 = vpop.permute.xlu1 %1230  ;;  %v1338_v37 = vpop.permute.xlu0 %1337 }
 0x2f7   : > { %1254 = vst.msk [vmem:[#allocation4 + $0x88] sm:$0xff] %vm9251_vm1, %v1231_v17  ;;  %1362 = vst.msk [vmem:[#allocation4 + $0xc0] sm:$0xff] %vm9251_vm1, %v1338_v37 }
 0x2fa   : > { %v1239_v30 = vpop.permute.xlu1 %1238  ;;  %v1346_v38 = vpop.permute.xlu0 %1345 }
 0x2fb   : > { %1258 = vst.msk [vmem:[#allocation4 + $0xa8] sm:$0xff] %vm9251_vm1, %v1239_v30  ;;  %1366 = vst.msk [vmem:[#allocation4 + $0xe0] sm:$0xff] %vm9251_vm1, %v1346_v38 }
 0x2fe   : > { %v1340_v39 = vpop.permute.xlu1 %1339  ;;  %v1001_v40 = vpop.permute.xlu0 %1000 }
 0x2ff   : > { %1363 = vst.msk [vmem:[#allocation4 + $0xc8] sm:$0xff] %vm9251_vm1, %v1340_v39  ;;  %1018 = vst.msk [vmem:[#allocation3 + $0x30] sm:$0xff] %vm9251_vm1, %v1001_v40 }
 0x302   : > { %v1348_v3 = vpop.permute.xlu1 %1347  ;;  %v1050_v19 = vpop.permute.xlu0 %1049 }
 0x303   : > { %1367 = vst.msk [vmem:[#allocation4 + $0xe8] sm:$0xff] %vm9251_vm1, %v1348_v3  ;;  %1072 = vst.msk [vmem:[#allocation2 + $0x50] sm:$0xff] %vm9251_vm1, %v1050_v19 }
 0x306   : > { %v993_v57 = vpop.permute.xlu1 %992  ;;  %v1058_v43 = vpop.permute.xlu0 %1057 }
 0x307   : > { %1014 = vst.msk [vmem:[#allocation3 + $0x10] sm:$0xff] %vm9251_vm1, %v993_v57  ;;  %1076 = vst.msk [vmem:[#allocation2 + $0x70] sm:$0xff] %vm9251_vm1, %v1058_v43 }
 0x30a   : > { %v995_v21 = vpop.permute.xlu1 %994  ;;  %v1083_v36 = vpop.permute.xlu0 %1082 }
 0x30b   : > { %1015 = vst.msk [vmem:[#allocation3 + $0x18] sm:$0xff] %vm9251_vm1, %v995_v21  ;;  %1105 = vst.msk [vmem:[#allocation3 + $0x50] sm:$0xff] %vm9251_vm1, %v1083_v36 }
 0x30e   : > { %v1003_v45 = vpop.permute.xlu1 %1002  ;;  %v1091_v8 = vpop.permute.xlu0 %1090 }
 0x30f   : > { %1019 = vst.msk [vmem:[#allocation3 + $0x38] sm:$0xff] %vm9251_vm1, %v1003_v45  ;;  %1109 = vst.msk [vmem:[#allocation3 + $0x70] sm:$0xff] %vm9251_vm1, %v1091_v8 }
 0x312   : > { %v1052_v46 = vpop.permute.xlu1 %1051  ;;  %v1167_v47 = vpop.permute.xlu0 %1166 }
 0x313   : > { %1073 = vst.msk [vmem:[#allocation2 + $0x58] sm:$0xff] %vm9251_vm1, %v1052_v46  ;;  %1189 = vst.msk [vmem:[#allocation2 + $0x90] sm:$0xff] %vm9251_vm1, %v1167_v47 }
 0x316   : > { %v1060_v48 = vpop.permute.xlu1 %1059  ;;  %v1175_v50 = vpop.permute.xlu0 %1174 }
 0x317   : > { %1077 = vst.msk [vmem:[#allocation2 + $0x78] sm:$0xff] %vm9251_vm1, %v1060_v48  ;;  %1193 = vst.msk [vmem:[#allocation2 + $0xb0] sm:$0xff] %vm9251_vm1, %v1175_v50 }
 0x31a   : > { %v1085_v20 = vpop.permute.xlu1 %1084  ;;  %v1200_v25 = vpop.permute.xlu0 %1199 }
 0x31b   : > { %1106 = vst.msk [vmem:[#allocation3 + $0x58] sm:$0xff] %vm9251_vm1, %v1085_v20  ;;  %1222 = vst.msk [vmem:[#allocation3 + $0x90] sm:$0xff] %vm9251_vm1, %v1200_v25 }
 0x31e   : > { %v1093_v55 = vpop.permute.xlu1 %1092  ;;  %v1208_v56 = vpop.permute.xlu0 %1207 }
 0x31f   : > { %1110 = vst.msk [vmem:[#allocation3 + $0x78] sm:$0xff] %vm9251_vm1, %v1093_v55  ;;  %1226 = vst.msk [vmem:[#allocation3 + $0xb0] sm:$0xff] %vm9251_vm1, %v1208_v56 }
 0x322   : > { %v1169_v58 = vpop.permute.xlu1 %1168  ;;  %v1276_v59 = vpop.permute.xlu0 %1275 }
 0x323   : > { %1190 = vst.msk [vmem:[#allocation2 + $0x98] sm:$0xff] %vm9251_vm1, %v1169_v58  ;;  %1298 = vst.msk [vmem:[#allocation2 + $0xd0] sm:$0xff] %vm9251_vm1, %v1276_v59 }
 0x326   : > { %v1177_v60 = vpop.permute.xlu1 %1176  ;;  %v1284_v63 = vpop.permute.xlu0 %1283 }
 0x327   : > { %1194 = vst.msk [vmem:[#allocation2 + $0xb8] sm:$0xff] %vm9251_vm1, %v1177_v60  ;;  %1302 = vst.msk [vmem:[#allocation2 + $0xf0] sm:$0xff] %vm9251_vm1, %v1284_v63 }
 0x32a   : > { %v1202_v41 = vpop.permute.xlu1 %1201  ;;  %v1309_v42 = vpop.permute.xlu0 %1308 }
 0x32b   : > { %1223 = vst.msk [vmem:[#allocation3 + $0x98] sm:$0xff] %vm9251_vm1, %v1202_v41  ;;  %1331 = vst.msk [vmem:[#allocation3 + $0xd0] sm:$0xff] %vm9251_vm1, %v1309_v42 }
 0x32e   : > { %v1210_v49 = vpop.permute.xlu1 %1209  ;;  %v1317_v51 = vpop.permute.xlu0 %1316 }
 0x32f   : > { %1227 = vst.msk [vmem:[#allocation3 + $0xb8] sm:$0xff] %vm9251_vm1, %v1210_v49  ;;  %1335 = vst.msk [vmem:[#allocation3 + $0xf0] sm:$0xff] %vm9251_vm1, %v1317_v51 }
 0x332   : > { %v1278_v12 = vpop.permute.xlu1 %1277  ;;  %v1124_v29 = vpop.permute.xlu0 %1123 }
 0x333   : > { %1299 = vst.msk [vmem:[#allocation2 + $0xd8] sm:$0xff] %vm9251_vm1, %v1278_v12  ;;  %1146 = vst.msk [vmem:[#allocation4 + $0x50] sm:$0xff] %vm9251_vm1, %v1124_v29 }
 0x336   : > { %v1286_v1 = vpop.permute.xlu1 %1285  ;;  %v1132_v2 = vpop.permute.xlu0 %1131 }
 0x337   : > { %1303 = vst.msk [vmem:[#allocation2 + $0xf8] sm:$0xff] %vm9251_vm1, %v1286_v1  ;;  %1150 = vst.msk [vmem:[#allocation4 + $0x70] sm:$0xff] %vm9251_vm1, %v1132_v2 }
 0x33a   : > { %v1311_v53 = vpop.permute.xlu1 %1310  ;;  %v1233_v34 = vpop.permute.xlu0 %1232 }
 0x33b   : > { %1332 = vst.msk [vmem:[#allocation3 + $0xd8] sm:$0xff] %vm9251_vm1, %v1311_v53  ;;  %1255 = vst.msk [vmem:[#allocation4 + $0x90] sm:$0xff] %vm9251_vm1, %v1233_v34 }
 0x33e   : > { %v1319_v4 = vpop.permute.xlu1 %1318  ;;  %v1241_v5 = vpop.permute.xlu0 %1240 }
 0x33f   : > { %1336 = vst.msk [vmem:[#allocation3 + $0xf8] sm:$0xff] %vm9251_vm1, %v1319_v4  ;;  %1259 = vst.msk [vmem:[#allocation4 + $0xb0] sm:$0xff] %vm9251_vm1, %v1241_v5 }
 0x342   : > { %v1126_v35 = vpop.permute.xlu1 %1125  ;;  %v1342_v6 = vpop.permute.xlu0 %1341 }
 0x343   : > { %1147 = vst.msk [vmem:[#allocation4 + $0x58] sm:$0xff] %vm9251_vm1, %v1126_v35  ;;  %1364 = vst.msk [vmem:[#allocation4 + $0xd0] sm:$0xff] %vm9251_vm1, %v1342_v6 }
 0x346   : > { %v1134_v7 = vpop.permute.xlu1 %1133  ;;  %v1350_v18 = vpop.permute.xlu0 %1349 }
 0x347   : > { %1151 = vst.msk [vmem:[#allocation4 + $0x78] sm:$0xff] %vm9251_vm1, %v1134_v7  ;;  %1368 = vst.msk [vmem:[#allocation4 + $0xf0] sm:$0xff] %vm9251_vm1, %v1350_v18 }
 0x34a   : > { %v1235_v9 = vpop.permute.xlu1 %1234 }
 0x34b   : > { %1256 = vst.msk [vmem:[#allocation4 + $0x98] sm:$0xff] %vm9251_vm1, %v1235_v9 }
 0x34e   : > { %v1243_v61 = vpop.permute.xlu1 %1242 }
 0x34f   : > { %1260 = vst.msk [vmem:[#allocation4 + $0xb8] sm:$0xff] %vm9251_vm1, %v1243_v61 }
 0x352   : > { %v1344_v10 = vpop.permute.xlu1 %1343 }
 0x353   : > { %1365 = vst.msk [vmem:[#allocation4 + $0xd8] sm:$0xff] %vm9251_vm1, %v1344_v10 }
 0x356   : > { %v1352_v44 = vpop.permute.xlu1 %1351 }
 0x357   : > { %1369 = vst.msk [vmem:[#allocation4 + $0xf8] sm:$0xff] %vm9251_vm1, %v1352_v44 }
 0x358 LB: >> { %s4800_s30 = sshll.u32 %s5929_s28, 6  ;;  %vm9263_vm1 = vcmask 130048   ;;  %s7337_s21 = smov 0   ;;  %s5929_s28 = sphi %s6855_s28, %s1424_s28  }
 0x359   : >> { %s6861_s16 = scalar_lea.vmem [#allocation3], %s4800_s30  ;;  %s1447_s19 = scalar_lea.vmem [#allocation4], %s4800_s30 }
 0x35a   : >> { %v1438_v13 = vld [vmem:[%s6861_s16] sm:$0xff]  ;;  %v1439_v27 = vld [vmem:[%s6861_s16 + $0x8] sm:$0xff]  ;;  %s6886_s20 = scalar_lea.vmem [#allocation2], %s4800_s30  ;;  %v1440_v32 = vld [vmem:[%s6861_s16 + $0x10] sm:$0xff] }
 0x35b   : >> { %5210 = vmatprep.subr.msk.bf16.mxu0 %vm9263_vm1, %v1438_v13  ;;  %5211 = vmatprep.subr.msk.bf16.mxu1 %vm9263_vm1, %v1438_v13  ;;  %v1481_v11 = vsel %vm9263_vm1, %v1438_v13, 0  ;;  %v1428_v28 = vld [vmem:[%s6886_s20] sm:$0xff]  ;;  %v1484_v26 = vsel %vm9263_vm1, %v1439_v27, 0  ;;  %v1487_v33 = vsel %vm9263_vm1, %v1440_v32, 0  ;;  %v1441_v62 = vld [vmem:[%s6861_s16 + $0x18] sm:$0xff]  ;;  %v1443_v30 = vld [vmem:[%s6861_s16 + $0x28] sm:$0xff] }
 0x35c   : >> { %4921 = vmatpush3.bf16.xpose.msra.mxu0 %v1481_v11  ;;  %5170 = vmatpush3.bf16.xpose.msra.mxu1 %v1481_v11  ;;  %v1432_v31 = vld [vmem:[%s6886_s20 + $0x20] sm:$0xff]  ;;  %v1490_v0 = vsel %vm9263_vm1, %v1441_v62, 0  ;;  %v1496_v38 = vsel %vm9263_vm1, %v1443_v30, 0  ;;  %v1444_v39 = vld [vmem:[%s6861_s16 + $0x30] sm:$0xff]  ;;  %v1445_v3 = vld [vmem:[%s6861_s16 + $0x38] sm:$0xff] }
 0x35d   : >> { %5212 = vmatprep.subr.msk.bf16.mxu0 %vm9263_vm1, %v1439_v27  ;;  %5213 = vmatprep.subr.msk.bf16.mxu1 %vm9263_vm1, %v1439_v27  ;;  %v1442_v17 = vld [vmem:[%s6861_s16 + $0x20] sm:$0xff]  ;;  %v1499_v40 = vsel %vm9263_vm1, %v1444_v39, 0  ;;  %v1502_v19 = vsel %vm9263_vm1, %v1445_v3, 0  ;;  %v1429_v57 = vld [vmem:[%s6886_s20 + $0x8] sm:$0xff]  ;;  %v1430_v21 = vld [vmem:[%s6886_s20 + $0x10] sm:$0xff] }
 0x35e   : >> { %v6864_v14 = vld [vmem:[%s1447_s19] sm:$0xff]  ;;  %v6866_v15 = vld [vmem:[%s1447_s19 + $0x8] sm:$0xff]  ;;  %v6868_v54 = vld [vmem:[%s1447_s19 + $0x10] sm:$0xff]  ;;  %4936 = vmatprep.mubr.msk.bf16.mxu0 %vm9263_vm1, %v1428_v28  ;;  %4944 = vmatprep.mubr.msk.bf16.mxu1 %vm9263_vm1, %v1432_v31  ;;  %v1493_v37 = vsel %vm9263_vm1, %v1442_v17, 0 }
 0x35f   : >> { %9258 = vst [vmem:[#allocation10_spill] sm:$0xff] %v6864_v14  ;;  %9259 = vst [vmem:[#allocation11_spill] sm:$0xff] %v6866_v15  ;;  %v6870_v16 = vld [vmem:[%s1447_s19 + $0x18] sm:$0xff]  ;;  %v6872_v22 = vld [vmem:[%s1447_s19 + $0x20] sm:$0xff] }
 0x360   : >> { %9260 = vst [vmem:[#allocation12_spill] sm:$0xff] %v6868_v54  ;;  %9261 = vst [vmem:[#allocation13_spill] sm:$0xff] %v6870_v16  ;;  %v6877_v23 = vld [vmem:[%s1447_s19 + $0x28] sm:$0xff]  ;;  %v6879_v24 = vld [vmem:[%s1447_s19 + $0x30] sm:$0xff] }
 0x361   : >> { %9262 = vst [vmem:[#allocation14_spill] sm:$0xff] %v6872_v22  ;;  %9264 = vst [vmem:[#allocation15_spill] sm:$0xff] %v6877_v23  ;;  %v6881_v52 = vld [vmem:[%s1447_s19 + $0x38] sm:$0xff]  ;;  %v1433_v43 = vld [vmem:[%s6886_s20 + $0x28] sm:$0xff] }
 0x362   : >> { %9265 = vst [vmem:[#allocation16_spill] sm:$0xff] %v6879_v24  ;;  %9266 = vst [vmem:[#allocation17_spill] sm:$0xff] %v6881_v52  ;;  %v1434_v36 = vld [vmem:[%s6886_s20 + $0x30] sm:$0xff]  ;;  %v1431_v45 = vld [vmem:[%s6886_s20 + $0x18] sm:$0xff] }
 0x363   : >> { %v1435_v8 = vld [vmem:[%s6886_s20 + $0x38] sm:$0xff] }
 0x364   : >> { %4923 = vmatpush3.bf16.xpose.msra.mxu0 %v1484_v26  ;;  %5171 = vmatpush3.bf16.xpose.msra.mxu1 %v1484_v26 }
 0x365   : >> { %5214 = vmatprep.subr.msk.bf16.mxu0 %vm9263_vm1, %v1440_v32  ;;  %5215 = vmatprep.subr.msk.bf16.mxu1 %vm9263_vm1, %v1440_v32 }
 0x36c   : >> { %4925 = vmatpush3.bf16.xpose.msra.mxu0 %v1487_v33  ;;  %5172 = vmatpush3.bf16.xpose.msra.mxu1 %v1487_v33 }
 0x36d   : >> { %5216 = vmatprep.subr.msk.bf16.mxu0 %vm9263_vm1, %v1441_v62  ;;  %5217 = vmatprep.subr.msk.bf16.mxu1 %vm9263_vm1, %v1441_v62 }
 0x374   : >> { %4927 = vmatpush3.bf16.xpose.msra.mxu0 %v1490_v0  ;;  %5173 = vmatpush3.bf16.xpose.msra.mxu1 %v1490_v0 }
 0x375   : >> { %5218 = vmatprep.subr.msk.bf16.mxu0 %vm9263_vm1, %v1442_v17  ;;  %5219 = vmatprep.subr.msk.bf16.mxu1 %vm9263_vm1, %v1442_v17 }
 0x37c   : >> { %4929 = vmatpush3.bf16.xpose.msra.mxu0 %v1493_v37  ;;  %5174 = vmatpush3.bf16.xpose.msra.mxu1 %v1493_v37 }
 0x37d   : >> { %5220 = vmatprep.subr.msk.bf16.mxu0 %vm9263_vm1, %v1443_v30  ;;  %5221 = vmatprep.subr.msk.bf16.mxu1 %vm9263_vm1, %v1443_v30 }
 0x384   : >> { %4931 = vmatpush3.bf16.xpose.msra.mxu0 %v1496_v38  ;;  %5175 = vmatpush3.bf16.xpose.msra.mxu1 %v1496_v38 }
 0x385   : >> { %5222 = vmatprep.subr.msk.bf16.mxu0 %vm9263_vm1, %v1444_v39  ;;  %5223 = vmatprep.subr.msk.bf16.mxu1 %vm9263_vm1, %v1444_v39 }
 0x38c   : >> { %4933 = vmatpush3.bf16.xpose.msra.mxu0 %v1499_v40  ;;  %5176 = vmatpush3.bf16.xpose.msra.mxu1 %v1499_v40 }
 0x38d   : >> { %5224 = vmatprep.subr.msk.bf16.mxu0 %vm9263_vm1, %v1445_v3  ;;  %5225 = vmatprep.subr.msk.bf16.mxu1 %vm9263_vm1, %v1445_v3 }
 0x394   : >> { %4935 = vmatpush3.bf16.xpose.msra.mxu0 %v1502_v19  ;;  %5177 = vmatpush3.bf16.xpose.msra.mxu1 %v1502_v19 }
 0x39b   : >> { %4937 = vmatmul.mubr.msk.bf16.vlgmr.msra.gmra.mrb[0].mxu0 %vm9263_vm1, %v1429_v57  ;;  %4945 = vmatmul.mubr.msk.bf16.vlgmr.msra.gmra.mrb[0].mxu1 %vm9263_vm1, %v1433_v43 }
 0x39c   : >> { %4940 = vmatprep.mubr.msk.bf16.mxu0 %vm9263_vm1, %v1430_v21  ;;  %4948 = vmatprep.mubr.msk.bf16.mxu1 %vm9263_vm1, %v1434_v36 }
 0x3a3   : >> { %4941 = vmatmul.mubr.msk.bf16.gmra.mrb[4].mxu0 %vm9263_vm1, %v1431_v45  ;;  %4949 = vmatmul.mubr.msk.bf16.gmra.mrb[4].mxu1 %vm9263_vm1, %v1435_v8 }
 0x46e   : >> { %v4938_v46 = vpop.f32.mrb[0].mxu0  ;;  %v4946_v47 = vpop.f32.mrb[0].mxu1 }
 0x46f   : >> { %v6929_v48 = vmul.f32 0.25, %v4938_v46  ;;  %v6931_v50 = vmul.f32 0.25, %v4946_v47  ;;  %v1538_v20 = vpop.f32.mrb[1].mxu0  ;;  %v1570_v25 = vpop.f32.mrb[1].mxu1 }
 0x470   : >> { %v6933_v55 = vmul.f32 0.25, %v1538_v20  ;;  %v6935_v56 = vmul.f32 0.25, %v1570_v25  ;;  %v4939_v58 = vpop.f32.mrb[2].mxu0  ;;  %v4947_v59 = vpop.f32.mrb[2].mxu1 }
 0x471   : >> { %vm1747_vm2 = vcmp.lt.s32.totalorder %v6929_v48, 0  ;;  %v1763_v60 = vxor.u32 2147483647, %v6929_v48  ;;  %vm1795_vm3 = vcmp.eq.s32.totalorder %v6929_v48, 2147483648  ;;  %vm1755_vm4 = vcmp.lt.s32.totalorder %v6931_v50, 0  ;;  %1637 = vmax.xlane.f32.xlu0 %v6931_v50  ;;  %v1573_v63 = vpop.f32.mrb[3].mxu1  ;;  %1621 = vmax.xlane.f32.xlu1 %v6929_v48 }
 0x472   : >> { %v1771_v41 = vxor.u32 2147483647, %v6931_v50  ;;  %vm1803_vm5 = vcmp.eq.s32.totalorder %v6931_v50, 2147483648  ;;  %vm1745_vm6 = vcmp.lt.s32.totalorder %v6933_v55, 0  ;;  %v1761_v42 = vxor.u32 2147483647, %v6933_v55 }
 0x473   : >> { %v1779_v49 = vsel %vm1747_vm2, %v1763_v60, %v6929_v48  ;;  %vm1793_vm7 = vcmp.eq.s32.totalorder %v6933_v55, 2147483648  ;;  %vm1753_vm8 = vcmp.lt.s32.totalorder %v6935_v56, 0  ;;  %v1769_v51 = vxor.u32 2147483647, %v6935_v56  ;;  %v1541_v12 = vpop.f32.mrb[3].mxu0 }
 0x474   : >> { %v6951_v29 = vsel %vm1795_vm3, 0, %v1779_v49  ;;  %v1787_v1 = vsel %vm1755_vm4, %v1771_v41, %v6931_v50  ;;  %v1777_v2 = vsel %vm1745_vm6, %v1761_v42, %v6933_v55  ;;  %vm1801_vm9 = vcmp.eq.s32.totalorder %v6935_v56, 2147483648 }
 0x475   : >> { %9267 = vst [vmem:[#allocation18_spill] sm:$0xff] %v6951_v29  ;;  %v6956_v53 = vsel %vm1803_vm5, 0, %v1787_v1  ;;  %v6958_v34 = vsel %vm1793_vm7, 0, %v1777_v2  ;;  %v1785_v4 = vsel %vm1753_vm8, %v1769_v51, %v6935_v56  ;;  %v6961_v5 = vmul.f32 0.25, %v4939_v58  ;;  %1617 = vmax.xlane.f32.xlu0 %v6933_v55 }
 0x476   : >> { %9268 = vst [vmem:[#allocation19_spill] sm:$0xff] %v6956_v53  ;;  %9269 = vst [vmem:[#allocation20_spill] sm:$0xff] %v6958_v34  ;;  %v6964_v35 = vsel %vm1801_vm9, 0, %v1785_v4  ;;  %v6966_v6 = vmul.f32 0.25, %v4947_v59  ;;  %v6968_v7 = vmul.f32 0.25, %v1573_v63  ;;  %v6970_v18 = vmul.f32 0.25, %v1541_v12 }
 0x477   : >> { %9270 = vst [vmem:[#allocation21_spill] sm:$0xff] %v6964_v35  ;;  %v4942_v9 = vpop.f32.mrb[4].mxu0  ;;  %v4950_v61 = vpop.f32.mrb[4].mxu1  ;;  %vm1748_vm10 = vcmp.lt.s32.totalorder %v6961_v5, 0  ;;  %v1764_v10 = vxor.u32 2147483647, %v6961_v5  ;;  %1623 = vmax.xlane.f32.xlu1 %v6961_v5 }
 0x478   : >> { %vm1796_vm11 = vcmp.eq.s32.totalorder %v6961_v5, 2147483648  ;;  %v6976_v44 = vmul.f32 0.25, %v4942_v9  ;;  %v1554_v13 = vpop.f32.mrb[5].mxu0  ;;  %vm1756_vm12 = vcmp.lt.s32.totalorder %v6966_v6, 0  ;;  %v1772_v11 = vxor.u32 2147483647, %v6966_v6 }
 0x479   : >> { %vm1804_vm13 = vcmp.eq.s32.totalorder %v6966_v6, 2147483648  ;;  %vm1754_vm14 = vcmp.lt.s32.totalorder %v6968_v7, 0  ;;  %v4943_v27 = vpop.f32.mrb[6].mxu0  ;;  %v1780_v28 = vsel %vm1748_vm10, %v1764_v10, %v6961_v5  ;;  %v1770_v31 = vxor.u32 2147483647, %v6968_v7  ;;  %1633 = vmax.xlane.f32.xlu0 %v6935_v56  ;;  %v1586_v32 = vpop.f32.mrb[5].mxu1 }
 0x47a   : >> { %vm1802_vm15 = vcmp.eq.s32.totalorder %v6968_v7, 2147483648  ;;  %vm1746_vm2 = vcmp.lt.s32.totalorder %v6970_v18, 0  ;;  %v1557_v26 = vpop.f32.mrb[7].mxu0  ;;  %v6989_v33 = vsel %vm1796_vm11, 0, %v1780_v28  ;;  %v1788_v62 = vsel %vm1756_vm12, %v1772_v11, %v6966_v6  ;;  %v4951_v17 = vpop.f32.mrb[6].mxu1 }
 0x47b   : >> { %9271 = vst [vmem:[#allocation22_spill] sm:$0xff] %v6989_v33  ;;  %v1762_v0 = vxor.u32 2147483647, %v6970_v18  ;;  %vm1794_vm3 = vcmp.eq.s32.totalorder %v6970_v18, 2147483648  ;;  %v6994_v37 = vsel %vm1804_vm13, 0, %v1788_v62  ;;  %v1786_v30 = vsel %vm1754_vm14, %v1770_v31, %v6968_v7  ;;  %1639 = vmax.xlane.f32.xlu1 %v6966_v6  ;;  %v1589_v39 = vpop.f32.mrb[7].mxu1 }
 0x47c   : >> { %9272 = vst [vmem:[#allocation23_spill] sm:$0xff] %v6994_v37  ;;  %vm1751_vm4 = vcmp.lt.s32.totalorder %v6976_v44, 0  ;;  %v1767_v38 = vxor.u32 2147483647, %v6976_v44  ;;  %v7002_v40 = vsel %vm1802_vm15, 0, %v1786_v30  ;;  %vm1799_vm5 = vcmp.eq.s32.totalorder %v6976_v44, 2147483648 }
 0x47d   : >> { %9273 = vst [vmem:[#allocation24_spill] sm:$0xff] %v7002_v40  ;;  %v1778_v3 = vsel %vm1746_vm2, %v1762_v0, %v6970_v18  ;;  %v7008_v19 = vmul.f32 0.25, %v1554_v13  ;;  %1619 = vmax.xlane.f32.xlu0 %v6970_v18  ;;  %v7014_v21 = vmul.f32 0.25, %v4943_v27  ;;  %v7016_v36 = vmul.f32 0.25, %v1557_v26 }
 0x47e   : >> { %v7010_v57 = vsel %vm1794_vm3, 0, %v1778_v3  ;;  %v1783_v43 = vsel %vm1751_vm4, %v1767_v38, %v6976_v44  ;;  %v7031_v25 = vmul.f32 0.25, %v4950_v61  ;;  %v7037_v60 = vmul.f32 0.25, %v1586_v32 }
 0x47f   : >> { %9274 = vst [vmem:[#allocation25_spill] sm:$0xff] %v7010_v57  ;;  %v7018_v45 = vsel %vm1799_vm5, 0, %v1783_v43  ;;  %vm1749_vm6 = vcmp.lt.s32.totalorder %v7008_v19, 0  ;;  %v1765_v8 = vxor.u32 2147483647, %v7008_v19  ;;  %vm1797_vm7 = vcmp.eq.s32.totalorder %v7008_v19, 2147483648  ;;  %1635 = vmax.xlane.f32.xlu1 %v6968_v7 }
 0x480   : >> { %9275 = vst [vmem:[#allocation26_spill] sm:$0xff] %v7018_v45  ;;  %vm1752_vm8 = vcmp.lt.s32.totalorder %v7014_v21, 0  ;;  %v1768_v46 = vxor.u32 2147483647, %v7014_v21  ;;  %vm1800_vm9 = vcmp.eq.s32.totalorder %v7014_v21, 2147483648  ;;  %vm1750_vm10 = vcmp.lt.s32.totalorder %v7016_v36, 0 }
 0x481   : >> { %v1781_v47 = vsel %vm1749_vm6, %v1765_v8, %v7008_v19  ;;  %v1766_v20 = vxor.u32 2147483647, %v7016_v36  ;;  %vm1798_vm11 = vcmp.eq.s32.totalorder %v7016_v36, 2147483648  ;;  %1629 = vmax.xlane.f32.xlu0 %v6976_v44  ;;  %v7039_v63 = vmul.f32 0.25, %v4951_v17 }
 0x482   : >> { %v7033_v58 = vsel %vm1797_vm7, 0, %v1781_v47  ;;  %v1784_v59 = vsel %vm1752_vm8, %v1768_v46, %v7014_v21  ;;  %vm1759_vm12 = vcmp.lt.s32.totalorder %v7031_v25, 0  ;;  %v1775_v49 = vxor.u32 2147483647, %v7031_v25 }
 0x483   : >> { %9276 = vst [vmem:[#allocation27_spill] sm:$0xff] %v7033_v58  ;;  %v7041_v41 = vsel %vm1800_vm9, 0, %v1784_v59  ;;  %v1782_v42 = vsel %vm1750_vm10, %v1766_v20, %v7016_v36  ;;  %1631 = vmax.xlane.f32.xlu1 %v7014_v21  ;;  %vm1807_vm13 = vcmp.eq.s32.totalorder %v7031_v25, 2147483648  ;;  %vm1757_vm14 = vcmp.lt.s32.totalorder %v7037_v60, 0 }
 0x484   : >> { %9277 = vst [vmem:[#allocation28_spill] sm:$0xff] %v7041_v41  ;;  %v7046_v51 = vsel %vm1798_vm11, 0, %v1782_v42  ;;  %v1773_v12 = vxor.u32 2147483647, %v7037_v60  ;;  %v1791_v1 = vsel %vm1759_vm12, %v1775_v49, %v7031_v25  ;;  %vm1805_vm15 = vcmp.eq.s32.totalorder %v7037_v60, 2147483648 }
 0x485   : >> { %9278 = vst [vmem:[#allocation29_spill] sm:$0xff] %v7046_v51  ;;  %vm1760_vm2 = vcmp.lt.s32.totalorder %v7039_v63, 0  ;;  %v1776_v2 = vxor.u32 2147483647, %v7039_v63  ;;  %v7056_v4 = vsel %vm1807_vm13, 0, %v1791_v1  ;;  %vm1808_vm3 = vcmp.eq.s32.totalorder %v7039_v63, 2147483648  ;;  %1625 = vmax.xlane.f32.xlu0 %v7008_v19 }
 0x486   : >> { %9279 = vst [vmem:[#allocation30_spill] sm:$0xff] %v7056_v4  ;;  %v1789_v9 = vsel %vm1757_vm14, %v1773_v12, %v7037_v60  ;;  %v7060_v61 = vmul.f32 0.25, %v1589_v39 }
 0x487   : >> { %v7063_v10 = vsel %vm1805_vm15, 0, %v1789_v9  ;;  %v1792_v13 = vsel %vm1760_vm2, %v1776_v2, %v7039_v63  ;;  %1627 = vmax.xlane.f32.xlu1 %v7016_v36 }
 0x488   : >> { %9280 = vst [vmem:[#allocation31_spill] sm:$0xff] %v7063_v10  ;;  %v7066_v11 = vsel %vm1808_vm3, 0, %v1792_v13  ;;  %vm1758_vm4 = vcmp.lt.s32.totalorder %v7060_v61, 0  ;;  %v1774_v27 = vxor.u32 2147483647, %v7060_v61  ;;  %vm1806_vm5 = vcmp.eq.s32.totalorder %v7060_v61, 2147483648 }
 0x489   : >> { %9281 = vst [vmem:[#allocation32_spill] sm:$0xff] %v7066_v11  ;;  %1641 = vmax.xlane.f32.xlu0 %v7037_v60 }
 0x48a   : >> { %v1790_v28 = vsel %vm1758_vm4, %v1774_v27, %v7060_v61 }
 0x48b   : >> { %v7074_v31 = vsel %vm1806_vm5, 0, %v1790_v28  ;;  %1643 = vmax.xlane.f32.xlu1 %v7060_v61 }
 0x48c   : >> { %9282 = vst [vmem:[#allocation33_spill] sm:$0xff] %v7074_v31 }
 0x48d   : >> { %1645 = vmax.xlane.f32.xlu0 %v7031_v25 }
 0x48f   : >> { %1647 = vmax.xlane.f32.xlu1 %v7039_v63 }
 0x491   : >> { %1825 = vmin.xlane.f32.xlu0 %v6933_v55 }
 0x493   : >> { %1827 = vmin.xlane.f32.xlu1 %v6970_v18 }
 0x495   : >> { %1829 = vmin.xlane.f32.xlu0 %v6929_v48 }
 0x497   : >> { %1831 = vmin.xlane.f32.xlu1 %v6961_v5 }
 0x499   : >> { %1833 = vmin.xlane.f32.xlu0 %v7008_v19 }
 0x49b   : >> { %1839 = vmin.xlane.f32.xlu1 %v7014_v21 }
 0x49d   : >> { %1837 = vmin.xlane.f32.xlu0 %v6976_v44 }
 0x49f   : >> { %1843 = vmin.xlane.f32.xlu1 %v6968_v7 }
 0x4a1   : >> { %1841 = vmin.xlane.f32.xlu0 %v6935_v56 }
 0x4a3   : >> { %1847 = vmin.xlane.f32.xlu1 %v6966_v6 }
 0x4a5   : >> { %1845 = vmin.xlane.f32.xlu0 %v6931_v50 }
 0x4a7   : >> { %1855 = vmin.xlane.f32.xlu1 %v7039_v63 }
 0x4a9   : >> { %1849 = vmin.xlane.f32.xlu0 %v7037_v60 }
 0x4ab   : >> { %1835 = vmin.xlane.f32.xlu1 %v7016_v36 }
 0x4ad   : >> { %1853 = vmin.xlane.f32.xlu0 %v7031_v25 }
 0x4af   : >> { %1851 = vmin.xlane.f32.xlu1 %v7060_v61 }
 0x4fe   : >> { %v1638_v26 = vpop.xlane.xlu0 %1637  ;;  %v1622_v32 = vpop.xlane.xlu1 %1621 }
 0x4ff   : >> { %v1659_v62 = vsub.f32 %v6931_v50, %v1638_v26  ;;  %vm1979_vm6 = vcmp.lt.s32.totalorder %v1638_v26, 0  ;;  %v1995_v0 = vxor.u32 2147483647, %v1638_v26  ;;  %v1651_v17 = vsub.f32 %v6929_v48, %v1622_v32 }
 0x500   : >> { %vm1971_vm7 = vcmp.lt.s32.totalorder %v1622_v32, 0  ;;  %v1987_v30 = vxor.u32 2147483647, %v1622_v32  ;;  %vm2027_vm8 = vcmp.eq.s32.totalorder %v1638_v26, 2147483648  ;;  %vm2019_vm9 = vcmp.eq.s32.totalorder %v1622_v32, 2147483648 }
 0x501   : >> { %v2011_v38 = vsel %vm1979_vm6, %v1995_v0, %v1638_v26  ;;  %v1685_v39 = vmul.f32 1.442695, %v1659_v62  ;;  %v1669_v43 = vmul.f32 1.442695, %v1651_v17 }
 0x502   : >> { %v7097_v3 = vsel %vm2027_vm8, 0, %v2011_v38   ;;  %v2003_v8 = vsel %vm1971_vm7, %v1987_v30, %v1622_v32  ;;  %v1618_v46 = vpop.xlane.xlu0 %1617 }
 0x503   : >> { %v7099_v47 = vsel %vm2019_vm9, 0, %v2003_v8   ;;  %v1649_v20 = vsub.f32 %v6933_v55, %v1618_v46  ;;  %vm1969_vm10 = vcmp.lt.s32.totalorder %v1618_v46, 0  ;;  %5577 = vpow2.f32 %v1669_v43 }
 0x504   : >> { %v1985_v50 = vxor.u32 2147483647, %v1618_v46  ;;  %v1624_v59 = vpop.xlane.xlu1 %1623  ;;  %5579 = vpow2.f32 %v1685_v39  ;;  %vm2017_vm12 = vcmp.eq.s32.totalorder %v1618_v46, 2147483648 }
 0x505   : >> { %v1665_v48 = vmul.f32 1.442695, %v1649_v20  ;;  %v1652_v42 = vsub.f32 %v6961_v5, %v1624_v59  ;;  %vm1972_vm11 = vcmp.lt.s32.totalorder %v1624_v59, 0  ;;  %v1988_v49 = vxor.u32 2147483647, %v1624_v59 }
 0x506   : >> { %v2001_v12 = vsel %vm1969_vm10, %v1985_v50, %v1618_v46  ;;  %vm2020_vm13 = vcmp.eq.s32.totalorder %v1624_v59, 2147483648  ;;  %v1634_v1 = vpop.xlane.xlu0 %1633 }
 0x507   : >> { %5581 = vpow2.f32 %v1665_v48  ;;  %v7103_v2 = vsel %vm2017_vm12, 0, %v2001_v12   ;;  %v1671_v9 = vmul.f32 1.442695, %v1652_v42  ;;  %v2004_v13 = vsel %vm1972_vm11, %v1988_v49, %v1624_v59 }
 0x508   : >> { %v7105_v55 = vsel %vm2020_vm13, 0, %v2004_v13   ;;  %v1657_v27 = vsub.f32 %v6935_v56, %v1634_v1  ;;  %vm1977_vm14 = vcmp.lt.s32.totalorder %v1634_v1, 0  ;;  %v1993_v28 = vxor.u32 2147483647, %v1634_v1  ;;  %v1640_v26 = vpop.xlane.xlu1 %1639 }
 0x509   : >> { %5583 = vpow2.f32 %v1671_v9  ;;  %vm2025_vm15 = vcmp.eq.s32.totalorder %v1634_v1, 2147483648  ;;  %v1660_v5 = vsub.f32 %v6966_v6, %v1640_v26  ;;  %vm1980_vm2 = vcmp.lt.s32.totalorder %v1640_v26, 0 }
 0x50a   : >> { %v1681_v32 = vmul.f32 1.442695, %v1657_v27  ;;  %v2009_v62 = vsel %vm1977_vm14, %v1993_v28, %v1634_v1  ;;  %v1996_v0 = vxor.u32 2147483647, %v1640_v26  ;;  %vm2028_vm3 = vcmp.eq.s32.totalorder %v1640_v26, 2147483648  ;;  %v1620_v17 = vpop.xlane.xlu0 %1619 }
 0x50b   : >> { %v7109_v30 = vsel %vm2025_vm15, 0, %v2009_v62   ;;  %v1687_v38 = vmul.f32 1.442695, %v1660_v5  ;;  %v1650_v39 = vsub.f32 %v6970_v18, %v1620_v17  ;;  %vm1970_vm4 = vcmp.lt.s32.totalorder %v1620_v17, 0 }
 0x50c   : >> { %5585 = vpow2.f32 %v1681_v32  ;;  %v2012_v56 = vsel %vm1980_vm2, %v1996_v0, %v1640_v26  ;;  %v1636_v43 = vpop.xlane.xlu1 %1635  ;;  %v1986_v8 = vxor.u32 2147483647, %v1620_v17  ;;  %vm2018_vm5 = vcmp.eq.s32.totalorder %v1620_v17, 2147483648 }
 0x50d   : >> { %5587 = vpow2.f32 %v1687_v38  ;;  %v7112_v46 = vsel %vm2028_vm3, 0, %v2012_v56   ;;  %v1658_v6 = vsub.f32 %v6968_v7, %v1636_v43  ;;  %vm1978_vm6 = vcmp.lt.s32.totalorder %v1636_v43, 0  ;;  %v7115_v20 = vpop.eup %5577 }
 0x50e   : >> { %9283 = vst [vmem:[#allocation34_spill] sm:$0xff] %v7115_v20  ;;  %v1994_v50 = vxor.u32 2147483647, %v1636_v43  ;;  %vm2026_vm7 = vcmp.eq.s32.totalorder %v1636_v43, 2147483648  ;;  %v1667_v59 = vmul.f32 1.442695, %v1650_v39  ;;  %v2002_v48 = vsel %vm1970_vm4, %v1986_v8, %v1620_v17  ;;  %v1630_v42 = vpop.xlane.xlu0 %1629  ;;  %1701 = vadd.xlane.f32.xlu0 %v7115_v20  ;;  %v7121_v1 = vpop.eup %5579 }
 0x50f   : >> { %v1683_v18 = vmul.f32 1.442695, %v1658_v6  ;;  %v7117_v49 = vsel %vm2018_vm5, 0, %v2002_v48   ;;  %v1655_v12 = vsub.f32 %v6976_v44, %v1630_v42  ;;  %vm1975_vm8 = vcmp.lt.s32.totalorder %v1630_v42, 0  ;;  %9284 = vst [vmem:[#allocation35_spill] sm:$0xff] %v7121_v1 }
 0x510   : >> { %v2010_v9 = vsel %vm1978_vm6, %v1994_v50, %v1636_v43  ;;  %5589 = vpow2.f32 %v1667_v59  ;;  %v1991_v7 = vxor.u32 2147483647, %v1630_v42  ;;  %vm2023_vm9 = vcmp.eq.s32.totalorder %v1630_v42, 2147483648  ;;  %v1632_v13 = vpop.xlane.xlu1 %1631 }
 0x511   : >> { %v7123_v27 = vpop.eup %5581  ;;  %5591 = vpow2.f32 %v1683_v18  ;;  %v7126_v28 = vsel %vm2026_vm7, 0, %v2010_v9   ;;  %v1677_v26 = vmul.f32 1.442695, %v1655_v12  ;;  %v1656_v5 = vsub.f32 %v7014_v21, %v1632_v13 }
 0x512   : >> { %9285 = vst [vmem:[#allocation36_spill] sm:$0xff] %v7123_v27  ;;  %v2007_v44 = vsel %vm1975_vm8, %v1991_v7, %v1630_v42  ;;  %vm1976_vm10 = vcmp.lt.s32.totalorder %v1632_v13, 0  ;;  %v1992_v32 = vxor.u32 2147483647, %v1632_v13  ;;  %vm2024_vm11 = vcmp.eq.s32.totalorder %v1632_v13, 2147483648  ;;  %v1626_v62 = vpop.xlane.xlu0 %1625  ;;  %1717 = vadd.xlane.f32.xlu0 %v7121_v1 }
 0x513   : >> { %v7129_v0 = vpop.eup %5583  ;;  %5593 = vpow2.f32 %v1677_v26  ;;  %v7131_v17 = vsel %vm2023_vm9, 0, %v2007_v44   ;;  %v1653_v38 = vsub.f32 %v7008_v19, %v1626_v62  ;;  %v1679_v39 = vmul.f32 1.442695, %v1656_v5 }
 0x514   : >> { %9286 = vst [vmem:[#allocation37_spill] sm:$0xff] %v7129_v0  ;;  %v2008_v56 = vsel %vm1976_vm10, %v1992_v32, %v1632_v13  ;;  %vm1973_vm12 = vcmp.lt.s32.totalorder %v1626_v62, 0  ;;  %v1989_v43 = vxor.u32 2147483647, %v1626_v62  ;;  %1703 = vadd.xlane.f32.xlu1 %v7129_v0  ;;  %v1628_v21 = vpop.xlane.xlu1 %1627  ;;  %vm2021_vm13 = vcmp.eq.s32.totalorder %v1626_v62, 2147483648 }
 0x515   : >> { %v7136_v8 = vsel %vm2024_vm11, 0, %v2008_v56   ;;  %v1673_v6 = vmul.f32 1.442695, %v1653_v38  ;;  %v1654_v50 = vsub.f32 %v7016_v36, %v1628_v21  ;;  %vm1974_vm14 = vcmp.lt.s32.totalorder %v1628_v21, 0 }
 0x516   : >> { %v7139_v59 = vpop.eup %5585  ;;  %v2005_v48 = vsel %vm1973_vm12, %v1989_v43, %v1626_v62  ;;  %v1990_v42 = vxor.u32 2147483647, %v1628_v21  ;;  %vm2022_vm15 = vcmp.eq.s32.totalorder %v1628_v21, 2147483648  ;;  %v1642_v19 = vpop.xlane.xlu0 %1641  ;;  %1697 = vadd.xlane.f32.xlu0 %v7123_v27 }
 0x517   : >> { %9287 = vst [vmem:[#allocation38_spill] sm:$0xff] %v7139_v59  ;;  %v7141_v18 = vpop.eup %5587  ;;  %5595 = vpow2.f32 %v1673_v6  ;;  %v7143_v12 = vsel %vm2021_vm13, 0, %v2005_v48   ;;  %v1675_v9 = vmul.f32 1.442695, %v1654_v50  ;;  %v1661_v7 = vsub.f32 %v7037_v60, %v1642_v19 }
 0x518   : >> { %9288 = vst [vmem:[#allocation39_spill] sm:$0xff] %v7141_v18  ;;  %v2006_v13 = vsel %vm1974_vm14, %v1990_v42, %v1628_v21  ;;  %vm1981_vm2 = vcmp.lt.s32.totalorder %v1642_v19, 0  ;;  %v1997_v36 = vxor.u32 2147483647, %v1642_v19  ;;  %vm2029_vm3 = vcmp.eq.s32.totalorder %v1642_v19, 2147483648  ;;  %1719 = vadd.xlane.f32.xlu1 %v7141_v18  ;;  %v1644_v26 = vpop.xlane.xlu1 %1643 }
 0x519   : >> { %5597 = vpow2.f32 %v1679_v39  ;;  %v7148_v5 = vsel %vm2022_vm15, 0, %v2006_v13   ;;  %v1689_v44 = vmul.f32 1.442695, %v1661_v7  ;;  %v1662_v32 = vsub.f32 %v7060_v61, %v1644_v26 }
 0x51a   : >> { %v7151_v62 = vpop.eup %5589  ;;  %v2013_v38 = vsel %vm1981_vm2, %v1997_v36, %v1642_v19  ;;  %vm1982_vm4 = vcmp.lt.s32.totalorder %v1644_v26, 0  ;;  %v1998_v56 = vxor.u32 2147483647, %v1644_v26  ;;  %vm2030_vm5 = vcmp.eq.s32.totalorder %v1644_v26, 2147483648  ;;  %v1646_v60 = vpop.xlane.xlu0 %1645  ;;  %1713 = vadd.xlane.f32.xlu0 %v7139_v59 }
 0x51b   : >> { %9289 = vst [vmem:[#allocation40_spill] sm:$0xff] %v7151_v62  ;;  %v7153_v43 = vpop.eup %5591  ;;  %5599 = vpow2.f32 %v1689_v44  ;;  %v7155_v21 = vsel %vm2029_vm3, 0, %v2013_v38   ;;  %v1663_v39 = vsub.f32 %v7031_v25, %v1646_v60  ;;  %vm1983_vm6 = vcmp.lt.s32.totalorder %v1646_v60, 0 }
 0x51c   : >> { %9290 = vst [vmem:[#allocation41_spill] sm:$0xff] %v7153_v43  ;;  %5601 = vpow2.f32 %v1675_v9  ;;  %v2014_v6 = vsel %vm1982_vm4, %v1998_v56, %v1644_v26  ;;  %v1999_v61 = vxor.u32 2147483647, %v1646_v60  ;;  %1699 = vadd.xlane.f32.xlu1 %v7151_v62  ;;  %v1648_v50 = vpop.xlane.xlu1 %1647  ;;  %v1691_v42 = vmul.f32 1.442695, %v1662_v32 }
 0x51d   : >> { %v7160_v48 = vpop.eup %5593  ;;  %v7162_v19 = vsel %vm2030_vm5, 0, %v2014_v6   ;;  %v1693_v7 = vmul.f32 1.442695, %v1663_v39  ;;  %v1664_v13 = vsub.f32 %v7039_v63, %v1648_v50  ;;  %vm2031_vm7 = vcmp.eq.s32.totalorder %v1646_v60, 2147483648 }
 0x51e   : >> { %9291 = vst [vmem:[#allocation42_spill] sm:$0xff] %v7160_v48  ;;  %v2015_v36 = vsel %vm1983_vm6, %v1999_v61, %v1646_v60  ;;  %vm1984_vm8 = vcmp.lt.s32.totalorder %v1648_v50, 0  ;;  %v2000_v44 = vxor.u32 2147483647, %v1648_v50  ;;  %v1826_v25 = vpop.xlane.xlu0 %1825  ;;  %1709 = vadd.xlane.f32.xlu0 %v7160_v48  ;;  %vm2032_vm10 = vcmp.eq.s32.totalorder %v1648_v50, 2147483648 }
 0x51f   : >> { %5603 = vpow2.f32 %v1693_v7  ;;  %v7165_v9 = vsel %vm2031_vm7, 0, %v2015_v36   ;;  %vm1873_vm9 = vcmp.lt.s32.totalorder %v1826_v25, 0  ;;  %v1695_v26 = vmul.f32 1.442695, %v1664_v13 }
 0x520   : >> { %v2016_v38 = vsel %vm1984_vm8, %v2000_v44, %v1648_v50  ;;  %v1889_v32 = vxor.u32 2147483647, %v1826_v25  ;;  %1715 = vadd.xlane.f32.xlu1 %v7153_v43  ;;  %v1828_v56 = vpop.xlane.xlu1 %1827  ;;  %5605 = vpow2.f32 %v1691_v42  ;;  %vm1921_vm12 = vcmp.eq.s32.totalorder %v1826_v25, 2147483648 }
 0x521   : >> { %v7169_v39 = vpop.eup %5595  ;;  %v7171_v63 = vsel %vm2032_vm10, 0, %v2016_v38   ;;  %vm1874_vm11 = vcmp.lt.s32.totalorder %v1828_v56, 0  ;;  %v1890_v60 = vxor.u32 2147483647, %v1828_v56  ;;  %vm1922_vm13 = vcmp.eq.s32.totalorder %v1828_v56, 2147483648 }
 0x522   : >> { %9292 = vst [vmem:[#allocation43_spill] sm:$0xff] %v7169_v39  ;;  %v1905_v6 = vsel %vm1873_vm9, %v1889_v32, %v1826_v25  ;;  %v1830_v61 = vpop.xlane.xlu0 %1829  ;;  %1705 = vadd.xlane.f32.xlu0 %v7169_v39  ;;  %5607 = vpow2.f32 %v1695_v26 }
 0x523   : >> { %v7173_v7 = vpop.eup %5597  ;;  %v7175_v13 = vsel %vm1921_vm12, 0, %v1905_v6   ;;  %v1906_v50 = vsel %vm1874_vm11, %v1890_v60, %v1828_v56  ;;  %vm1875_vm14 = vcmp.lt.s32.totalorder %v1830_v61, 0  ;;  %v1891_v36 = vxor.u32 2147483647, %v1830_v61 }
 0x524   : >> { %9293 = vst [vmem:[#allocation44_spill] sm:$0xff] %v7173_v7  ;;  %v7178_v44 = vsel %vm1922_vm13, 0, %v1906_v50   ;;  %1711 = vadd.xlane.f32.xlu1 %v7173_v7  ;;  %v1832_v42 = vpop.xlane.xlu1 %1831  ;;  %vm1923_vm15 = vcmp.eq.s32.totalorder %v1830_v61, 2147483648 }
 0x525   : >> { %v7181_v38 = vpop.eup %5599  ;;  %v1907_v25 = vsel %vm1875_vm14, %v1891_v36, %v1830_v61  ;;  %vm1876_vm2 = vcmp.lt.s32.totalorder %v1832_v42, 0  ;;  %v1892_v32 = vxor.u32 2147483647, %v1832_v42  ;;  %vm1924_vm3 = vcmp.eq.s32.totalorder %v1832_v42, 2147483648 }
 0x526   : >> { %9294 = vst [vmem:[#allocation45_spill] sm:$0xff] %v7181_v38  ;;  %v7183_v18 = vpop.eup %5601  ;;  %v7185_v6 = vsel %vm1923_vm15, 0, %v1907_v25   ;;  %v1834_v56 = vpop.xlane.xlu0 %1833  ;;  %1721 = vadd.xlane.f32.xlu0 %v7181_v38 }
 0x527   : >> { %9295 = vst [vmem:[#allocation46_spill] sm:$0xff] %v7183_v18  ;;  %v1908_v60 = vsel %vm1876_vm2, %v1892_v32, %v1832_v42  ;;  %vm1877_vm4 = vcmp.lt.s32.totalorder %v1834_v56, 0  ;;  %v1893_v26 = vxor.u32 2147483647, %v1834_v56  ;;  %vm1925_vm5 = vcmp.eq.s32.totalorder %v1834_v56, 2147483648 }
 0x528   : >> { %v7188_v50 = vsel %vm1924_vm3, 0, %v1908_v60   ;;  %1707 = vadd.xlane.f32.xlu1 %v7183_v18  ;;  %v1840_v1 = vpop.xlane.xlu1 %1839 }
 0x529   : >> { %v7191_v36 = vpop.eup %5603  ;;  %v1909_v61 = vsel %vm1877_vm4, %v1893_v26, %v1834_v56  ;;  %vm1880_vm6 = vcmp.lt.s32.totalorder %v1840_v1, 0  ;;  %v1896_v43 = vxor.u32 2147483647, %v1840_v1  ;;  %vm1928_vm7 = vcmp.eq.s32.totalorder %v1840_v1, 2147483648 }
 0x52a   : >> { %9296 = vst [vmem:[#allocation47_spill] sm:$0xff] %v7191_v36  ;;  %v7193_v25 = vsel %vm1925_vm5, 0, %v1909_v61   ;;  %v1838_v59 = vpop.xlane.xlu0 %1837  ;;  %v7195_v32 = vpop.eup %5605  ;;  %1725 = vadd.xlane.f32.xlu0 %v7191_v36 }
 0x52b   : >> { %9297 = vst [vmem:[#allocation48_spill] sm:$0xff] %v7195_v32  ;;  %v1912_v42 = vsel %vm1880_vm6, %v1896_v43, %v1840_v1  ;;  %vm1879_vm8 = vcmp.lt.s32.totalorder %v1838_v59, 0  ;;  %v1895_v60 = vxor.u32 2147483647, %v1838_v59  ;;  %vm1927_vm9 = vcmp.eq.s32.totalorder %v1838_v59, 2147483648 }
 0x52c   : >> { %v7198_v38 = vsel %vm1928_vm7, 0, %v1912_v42   ;;  %1723 = vadd.xlane.f32.xlu1 %v7195_v32  ;;  %v1844_v7 = vpop.xlane.xlu1 %1843  ;;  %v7201_v61 = vpop.eup %5607 }
 0x52d   : >> { %v1911_v26 = vsel %vm1879_vm8, %v1895_v60, %v1838_v59  ;;  %vm1882_vm10 = vcmp.lt.s32.totalorder %v1844_v7, 0  ;;  %v1898_v56 = vxor.u32 2147483647, %v1844_v7  ;;  %9298 = vst [vmem:[#allocation49_spill] sm:$0xff] %v7201_v61  ;;  %vm1930_vm11 = vcmp.eq.s32.totalorder %v1844_v7, 2147483648 }
 0x52e   : >> { %v7203_v48 = vsel %vm1927_vm9, 0, %v1911_v26   ;;  %v1842_v18 = vpop.xlane.xlu0 %1841 }
 0x52f   : >> { %v1914_v43 = vsel %vm1882_vm10, %v1898_v56, %v1844_v7  ;;  %vm1881_vm12 = vcmp.lt.s32.totalorder %v1842_v18, 0  ;;  %v1897_v1 = vxor.u32 2147483647, %v1842_v18  ;;  %vm1929_vm13 = vcmp.eq.s32.totalorder %v1842_v18, 2147483648 }
 0x530   : >> { %v7205_v36 = vsel %vm1930_vm11, 0, %v1914_v43   ;;  %1727 = vadd.xlane.f32.xlu1 %v7201_v61  ;;  %v1848_v42 = vpop.xlane.xlu1 %1847 }
 0x531   : >> { %v1913_v32 = vsel %vm1881_vm12, %v1897_v1, %v1842_v18  ;;  %vm1884_vm14 = vcmp.lt.s32.totalorder %v1848_v42, 0  ;;  %v1900_v59 = vxor.u32 2147483647, %v1848_v42  ;;  %vm1932_vm15 = vcmp.eq.s32.totalorder %v1848_v42, 2147483648 }
 0x532   : >> { %v7208_v60 = vsel %vm1929_vm13, 0, %v1913_v32   ;;  %v1846_v39 = vpop.xlane.xlu0 %1845 }
 0x533   : >> { %v1916_v0 = vsel %vm1884_vm14, %v1900_v59, %v1848_v42  ;;  %vm1883_vm2 = vcmp.lt.s32.totalorder %v1846_v39, 0  ;;  %v1899_v26 = vxor.u32 2147483647, %v1846_v39  ;;  %vm1931_vm3 = vcmp.eq.s32.totalorder %v1846_v39, 2147483648 }
 0x534   : >> { %v7210_v56 = vsel %vm1932_vm15, 0, %v1916_v0   ;;  %v1856_v7 = vpop.xlane.xlu1 %1855 }
 0x535   : >> { %v1915_v62 = vsel %vm1883_vm2, %v1899_v26, %v1846_v39  ;;  %vm1888_vm4 = vcmp.lt.s32.totalorder %v1856_v7, 0  ;;  %v1904_v43 = vxor.u32 2147483647, %v1856_v7  ;;  %vm1936_vm5 = vcmp.eq.s32.totalorder %v1856_v7, 2147483648 }
 0x536   : >> { %v7212_v61 = vsel %vm1931_vm3, 0, %v1915_v62   ;;  %v1850_v1 = vpop.xlane.xlu0 %1849 }
 0x537   : >> { %v1920_v18 = vsel %vm1888_vm4, %v1904_v43, %v1856_v7  ;;  %vm1885_vm6 = vcmp.lt.s32.totalorder %v1850_v1, 0  ;;  %v1901_v32 = vxor.u32 2147483647, %v1850_v1  ;;  %vm1933_vm7 = vcmp.eq.s32.totalorder %v1850_v1, 2147483648 }
 0x538   : >> { %v1952_v20 = vsel %vm1936_vm5, 0, %v1920_v18   ;;  %v1836_v27 = vpop.xlane.xlu1 %1835 }
 0x539   : >> { %v1917_v59 = vsel %vm1885_vm6, %v1901_v32, %v1850_v1  ;;  %vm1878_vm8 = vcmp.lt.s32.totalorder %v1836_v27, 0  ;;  %v1894_v42 = vxor.u32 2147483647, %v1836_v27  ;;  %vm1926_vm9 = vcmp.eq.s32.totalorder %v1836_v27, 2147483648 }
 0x53a   : >> { %v1949_v0 = vsel %vm1933_vm7, 0, %v1917_v59   ;;  %v1854_v52 = vpop.xlane.xlu0 %1853 }
 0x53b   : >> { %v1910_v24 = vsel %vm1878_vm8, %v1894_v42, %v1836_v27  ;;  %vm1887_vm10 = vcmp.lt.s32.totalorder %v1854_v52, 0  ;;  %v1903_v39 = vxor.u32 2147483647, %v1854_v52  ;;  %vm1935_vm11 = vcmp.eq.s32.totalorder %v1854_v52, 2147483648 }
 0x53c   : >> { %v1942_v26 = vsel %vm1926_vm9, 0, %v1910_v24   ;;  %v1852_v62 = vpop.xlane.xlu1 %1851 }
 0x53d   : >> { %v1919_v23 = vsel %vm1887_vm10, %v1903_v39, %v1854_v52  ;;  %vm1886_vm12 = vcmp.lt.s32.totalorder %v1852_v62, 0  ;;  %v1902_v7 = vxor.u32 2147483647, %v1852_v62  ;;  %vm1934_vm13 = vcmp.eq.s32.totalorder %v1852_v62, 2147483648 }
 0x53e   : >> { %v1951_v43 = vsel %vm1935_vm11, 0, %v1919_v23  }
 0x53f   : >> { %v1918_v22 = vsel %vm1886_vm12, %v1902_v7, %v1852_v62 }
 0x540   : >> { %v1950_v18 = vsel %vm1934_vm13, 0, %v1918_v22  }
 0x59b   : >> { %v7214_v32 = vpop.xlane.xlu0 %1701 }
 0x59c   : >> { %9299 = vst [vmem:[#allocation50_spill] sm:$0xff] %v7214_v32 }
 0x59f   : >> { %v7216_v1 = vpop.xlane.xlu0 %1717 }
 0x5a0   : >> { %9300 = vst [vmem:[#allocation51_spill] sm:$0xff] %v7216_v1 }
 0x5a1   : >> { %v7218_v59 = vpop.xlane.xlu1 %1703 }
 0x5a2   : >> { %9301 = vst [vmem:[#allocation52_spill] sm:$0xff] %v7218_v59 }
 0x5a3   : >> { %v7220_v42 = vpop.xlane.xlu0 %1697 }
 0x5a4   : >> { %9302 = vst [vmem:[#allocation53_spill] sm:$0xff] %v7220_v42 }
 0x5a5   : >> { %v7222_v27 = vpop.xlane.xlu1 %1719 }
 0x5a6   : >> { %9303 = vst [vmem:[#allocation54_spill] sm:$0xff] %v7222_v27 }
 0x5a7   : >> { %v7224_v24 = vpop.xlane.xlu0 %1713 }
 0x5a8   : >> { %9304 = vst [vmem:[#allocation55_spill] sm:$0xff] %v7224_v24 }
 0x5a9   : >> { %v7226_v39 = vpop.xlane.xlu1 %1699 }
 0x5aa   : >> { %9305 = vst [vmem:[#allocation56_spill] sm:$0xff] %v7226_v39 }
 0x5ab   : >> { %v7228_v52 = vpop.xlane.xlu0 %1709 }
 0x5ac   : >> { %9306 = vst [vmem:[#allocation57_spill] sm:$0xff] %v7228_v52 }
 0x5ad   : >> { %v7230_v23 = vpop.xlane.xlu1 %1715 }
 0x5ae   : >> { %9307 = vst [vmem:[#allocation58_spill] sm:$0xff] %v7230_v23 }
 0x5af   : >> { %v7232_v62 = vpop.xlane.xlu0 %1705 }
 0x5b0   : >> { %9308 = vst [vmem:[#allocation59_spill] sm:$0xff] %v7232_v62 }
 0x5b1   : >> { %v7234_v22 = vpop.xlane.xlu1 %1711 }
 0x5b2   : >> { %9309 = vst [vmem:[#allocation60_spill] sm:$0xff] %v7234_v22 }
 0x5b3   : >> { %v7236_v7 = vpop.xlane.xlu0 %1721 }
 0x5b4   : >> { %9310 = vst [vmem:[#allocation61_spill] sm:$0xff] %v7236_v7 }
 0x5b5   : >> { %v7238_v1 = vpop.xlane.xlu1 %1707 }
 0x5b6   : >> { %9311 = vst [vmem:[#allocation62_spill] sm:$0xff] %v7238_v1 }
 0x5b7   : >> { %v7240_v59 = vpop.xlane.xlu0 %1725 }
 0x5b8   : >> { %9312 = vst [vmem:[#allocation63_spill] sm:$0xff] %v7240_v59 }
 0x5b9   : >> { %v7242_v32 = vpop.xlane.xlu1 %1723 }
 0x5ba   : >> { %9313 = vst [vmem:[#allocation64_spill] sm:$0xff] %v7242_v32 }
 0x5bd   : >> { %v7244_v27 = vpop.xlane.xlu1 %1727 }
 0x5be   : >> { %9314 = vst [vmem:[#allocation65_spill] sm:$0xff] %v7244_v27 }
 0x5bf LB: >>> { %v9315_v29 = vld [vmem:[#allocation18_spill] sm:$0xff]  ;;  %v9316_v34 = vld [vmem:[#allocation20_spill] sm:$0xff]  ;;  %v9317_v57 = vld [vmem:[#allocation25_spill] sm:$0xff]  ;;  %9323 = vst [vmem:[#allocation66_spill] sm:$0xff] %v5933_v63  ;;  %v6072_v27 = vmov 0   ;;  %v2087_v59 = vshra.s32 %v6057_v13, 1  ;;  %v5961_v30 = vphi %v7109_v30, %v9511_v30   ;;  %v5957_v28 = vphi %v7126_v28, %v9510_v28   ;;  %v5953_v3 = vphi %v7097_v3, %v3148_v3   ;;  %v5949_v46 = vphi %v7112_v46, %v3149_v46   ;;  %v5945_v21 = vphi %v7155_v21, %v3150_v21   ;;  %v5941_v19 = vphi %v7162_v19, %v3151_v19   ;;  %v5937_v9 = vphi %v7165_v9, %v9509_v9   ;;  %v5933_v63 = vphi %v7171_v63, %v3153_v63   ;;  %s6061_s21 = sphi %s7337_s21, %s9531_s21   ;;  %v6057_v13 = vphi %v7175_v13, %v9530_v13   ;;  %v6053_v44 = vphi %v7178_v44, %v9529_v44   ;;  %v6049_v6 = vphi %v7185_v6, %v9528_v6   ;;  %v6045_v50 = vphi %v7188_v50, %v9527_v50   ;;  %v6041_v25 = vphi %v7193_v25, %v9526_v25   ;;  %v6037_v26 = vphi %v1942_v26, %v9525_v26   ;;  %v6033_v48 = vphi %v7203_v48, %v9524_v48   ;;  %v6029_v38 = vphi %v7198_v38, %v9523_v38   ;;  %v6025_v60 = vphi %v7208_v60, %v9522_v60   ;;  %v6021_v36 = vphi %v7205_v36, %v9521_v36   ;;  %v6017_v61 = vphi %v7212_v61, %v9520_v61   ;;  %v6013_v56 = vphi %v7210_v56, %v9519_v56   ;;  %v6009_v0 = vphi %v1949_v0, %v9518_v0   ;;  %v6005_v18 = vphi %v1950_v18, %v9517_v18   ;;  %v6001_v43 = vphi %v1951_v43, %v9516_v43   ;;  %v5997_v20 = vphi %v1952_v20, %v9515_v20   ;;  %v5993_v2 = vphi %v7103_v2, %v8210_v2   ;;  %v5989_v49 = vphi %v7117_v49, %v8226_v49   ;;  %v5985_v47 = vphi %v7099_v47, %v9514_v47   ;;  %v5981_v55 = vphi %v7105_v55, %v8218_v55   ;;  %v5977_v12 = vphi %v7143_v12, %v9513_v12   ;;  %v5973_v5 = vphi %v7148_v5, %v3143_v5   ;;  %v5969_v17 = vphi %v7131_v17, %v3144_v17   ;;  %v5965_v8 = vphi %v7136_v8, %v9512_v8  }
 0x5c0   : >>> { %v9318_v33 = vld [vmem:[#allocation22_spill] sm:$0xff]  ;;  %v9319_v58 = vld [vmem:[#allocation27_spill] sm:$0xff]  ;;  %v9320_v51 = vld [vmem:[#allocation29_spill] sm:$0xff]  ;;  %9324 = vst [vmem:[#allocation67_spill] sm:$0xff] %v5937_v9  ;;  %5609 = vset.pattern.permute.xlu1 %v6072_v27  ;;  %5610 = vset.pattern.permute.xlu0 %v6072_v27  ;;  %v9109_v32 = vshra.s32 %v5993_v2, 1  ;;  %v2135_v7 = vand.u32 1, %v6057_v13 }
 0x5c1   : >>> { %v9321_v45 = vld [vmem:[#allocation26_spill] sm:$0xff]  ;;  %v9322_v41 = vld [vmem:[#allocation28_spill] sm:$0xff]  ;;  %9325 = vst [vmem:[#allocation68_spill] sm:$0xff] %v5941_v19  ;;  %9326 = vst [vmem:[#allocation69_spill] sm:$0xff] %v5945_v21  ;;  %v9110_v23 = vand.u32 1, %v5993_v2  ;;  %v9113_v24 = vshra.s32 %v5989_v49, 1 }
 0x5c2   : >>> { %9327 = vst [vmem:[#allocation70_spill] sm:$0xff] %v5949_v46  ;;  %9328 = vst [vmem:[#allocation71_spill] sm:$0xff] %v5953_v3  ;;  %v9112_v22 = vand.u32 1, %v5989_v49  ;;  %v2119_v52 = vadd.s32 %v9109_v32, %v2087_v59  ;;  %v2088_v27 = vshra.s32 %v6053_v44, 1  ;;  %v2136_v62 = vand.u32 1, %v6053_v44  ;;  %s2054_s22 = sadd.s32 1, %s6061_s21  }
 0x5c3   : >>> { %9329 = vst [vmem:[#allocation72_spill] sm:$0xff] %v5957_v28  ;;  %9330 = vst [vmem:[#allocation73_spill] sm:$0xff] %v5961_v30  ;;  %v2167_v1 = vor.u32 %v9110_v23, %v2135_v7  ;;  %v2089_v54 = vshra.s32 %v6049_v6, 1  ;;  %v9119_v15 = vshra.s32 %v5985_v47, 1  ;;  %v2137_v32 = vand.u32 1, %v6049_v6  ;;  %p8303_p1 = scmp.ge.s32.totalorder %s2054_s22, 16   ;;  %s9531_s21 = smov %s2054_s22 }
 0x5c4   : >>> { %9331 = vst [vmem:[#allocation74_spill] sm:$0xff] %v5965_v8  ;;  %9332 = vst [vmem:[#allocation75_spill] sm:$0xff] %v5969_v17  ;;  %v2120_v42 = vadd.s32 %v9113_v24, %v2088_v27  ;;  %v2168_v16 = vor.u32 %v9112_v22, %v2136_v62  ;;  %v9122_v23 = vand.u32 1, %v5985_v47  ;;  %v2090_v24 = vshra.s32 %v6045_v50, 1  ;;  %s4763_s24 = sshll.u32 (%p8303_p1), %s5929_s28, 3  ;;  %s1424_s28 = sadd.s32 (%p8303_p1), 1, %s5929_s28  }
 0x5c5   : >>> { %9333 = vst [vmem:[#allocation76_spill] sm:$0xff] %v5973_v5  ;;  %9334 = vst [vmem:[#allocation77_spill] sm:$0xff] %v5977_v12  ;;  %v7450_v39 = vadd.s32 %v2167_v1, %v2119_v52  ;;  %v2121_v52 = vadd.s32 %v9119_v15, %v2089_v54  ;;  %v2092_v53 = vshra.s32 %v6037_v26, 1  ;;  %s3510_s25 = scalar_lea.vmem (%p8303_p1), [#allocation5], %s4763_s24  ;;  %p1421_p2 = scmp.ge.s32.totalorder (%p8303_p1), %s1424_s28, 4  }
 0x5c6   : >>> { %9335 = vst [vmem:[#allocation78_spill] sm:$0xff] %v5981_v55  ;;  %9336 = vst [vmem:[#allocation79_spill] sm:$0xff] %v5985_v47  ;;  %v7461_v14 = vadd.s32 %v2168_v16, %v2120_v42  ;;  %v2169_v22 = vor.u32 %v9122_v23, %v2137_v32  ;;  %v2138_v16 = vand.u32 1, %v6045_v50  ;;  %v9132_v42 = vand.u32 1, %v5981_v55 }
 0x5c7   : >>> { %9337 = vst [vmem:[#allocation80_spill] sm:$0xff] %v5989_v49  ;;  %9338 = vst [vmem:[#allocation81_spill] sm:$0xff] %v5993_v2  ;;  %2593 = vperm.xlu1 %5609, %v7450_v39   ;;  %v7464_v1 = vadd.s32 4294967295, %v7450_v39 }
 0x5c8   : >>> { %9339 = vst [vmem:[#allocation82_spill] sm:$0xff] %v5997_v20  ;;  %9340 = vst [vmem:[#allocation83_spill] sm:$0xff] %v6001_v43  ;;  %v7476_v4 = vadd.s32 %v2169_v22, %v2121_v52  ;;  %v7481_v11 = vadd.s32 4294967295, %v7461_v14  ;;  %v2170_v31 = vor.u32 %v9132_v42, %v2138_v16 }
 0x5c9   : >>> { %9341 = vst [vmem:[#allocation84_spill] sm:$0xff] %v6005_v18  ;;  %9342 = vst [vmem:[#allocation85_spill] sm:$0xff] %v6009_v0 }
 0x5ca   : >>> { %9343 = vst [vmem:[#allocation86_spill] sm:$0xff] %v6013_v56  ;;  %9344 = vst [vmem:[#allocation87_spill] sm:$0xff] %v6017_v61  ;;  %2599 = vperm.xlu0 %5610, %v7476_v4   ;;  %v2248_v22 = vand.u32 1, %v7481_v11  ;;  %v7490_v52 = vadd.s32 4294967295, %v7476_v4 }
 0x5cb   : >>> { %9345 = vst [vmem:[#allocation88_spill] sm:$0xff] %v6021_v36  ;;  %9346 = vst [vmem:[#allocation89_spill] sm:$0xff] %v6025_v60  ;;  %2596 = vperm.xlu1 %5609, %v7461_v14  }
 0x5cc   : >>> { %9347 = vst [vmem:[#allocation90_spill] sm:$0xff] %v6029_v38  ;;  %9348 = vst [vmem:[#allocation91_spill] sm:$0xff] %v6033_v48 }
 0x5cd   : >>> { %9349 = vst [vmem:[#allocation92_spill] sm:$0xff] %v6037_v26  ;;  %9350 = vst [vmem:[#allocation93_spill] sm:$0xff] %v6041_v25 }
 0x5ce   : >>> { %9351 = vst [vmem:[#allocation94_spill] sm:$0xff] %v6045_v50  ;;  %9352 = vst [vmem:[#allocation95_spill] sm:$0xff] %v6049_v6  ;;  %v2247_v6 = vand.u32 1, %v7464_v1  ;;  %v2216_v50 = vshra.s32 %v7481_v11, 1 }
 0x5cf   : >>> { %9353 = vst [vmem:[#allocation96_spill] sm:$0xff] %v6053_v44  ;;  %9354 = vst [vmem:[#allocation97_spill] sm:$0xff] %v6057_v13  ;;  %v9128_v44 = vshra.s32 %v5981_v55, 1  ;;  %v2215_v13 = vshra.s32 %v7464_v1, 1 }
 0x5d0   : >>> { %9355 = vst [vmem:[#allocation98_spill] sm:$0xff] %v7461_v14  ;;  %9356 = vst [vmem:[#allocation99_spill] sm:$0xff] %v7464_v1  ;;  %v2263_v10 = vor.u32 %v2247_v6, %v2135_v7  ;;  %v2264_v6 = vor.u32 %v2248_v22, %v2136_v62  ;;  %v2249_v7 = vand.u32 1, %v7490_v52 }
 0x5d1   : >>> { %v2122_v15 = vadd.s32 %v9128_v44, %v2090_v24  ;;  %9357 = vst [vmem:[#allocation100_spill] sm:$0xff] %v7481_v11  ;;  %v2231_v23 = vadd.s32 %v2215_v13, %v2087_v59  ;;  %9358 = vst [vmem:[#allocation101_spill] sm:$0xff] %v7490_v52  ;;  %v2232_v13 = vadd.s32 %v2216_v50, %v2088_v27  ;;  %v2217_v59 = vshra.s32 %v7490_v52, 1 }
 0x5d2   : >>> { %v9145_v11 = vshra.s32 %v5973_v5, 1 }
 0x5d3   : >>> { %v7492_v44 = vadd.s32 %v2263_v10, %v2231_v23  ;;  %v7494_v1 = vadd.s32 %v2170_v31, %v2122_v15  ;;  %v2140_v10 = vand.u32 1, %v6037_v26  ;;  %v9144_v15 = vand.u32 1, %v5973_v5 }
 0x5d4   : >>> { %v7507_v31 = vadd.s32 %v2264_v6, %v2232_v13  ;;  %v2233_v50 = vadd.s32 %v2217_v59, %v2089_v54  ;;  %v2265_v23 = vor.u32 %v2249_v7, %v2137_v32  ;;  %v2124_v22 = vadd.s32 %v9145_v11, %v2092_v53 }
 0x5d5   : >>> { %9359 = vst [vmem:[#allocation102_spill] sm:$0xff] %v7492_v44  ;;  %2602 = vperm.xlu1 %5609, %v7494_v1   ;;  %v7501_v42 = vadd.s32 4294967295, %v7494_v1  ;;  %2376 = vperm.xlu0 %5610, %v7492_v44   ;;  %v2172_v52 = vor.u32 %v9144_v15, %v2140_v10  ;;  %v2091_v54 = vshra.s32 %v6041_v25, 1  ;;  %v9143_v32 = vshra.s32 %v5977_v12, 1 }
 0x5d6   : >>> { %9361 = vst [vmem:[#allocation104_spill] sm:$0xff] %v7507_v31  ;;  %v7515_v37 = vadd.s32 %v2265_v23, %v2233_v50  ;;  %v2139_v13 = vand.u32 1, %v6041_v25  ;;  %v9142_v6 = vand.u32 1, %v5977_v12 }
 0x5d7   : >>> { %9360 = vst [vmem:[#allocation103_spill] sm:$0xff] %v7501_v42  ;;  %v2218_v62 = vshra.s32 %v7501_v42, 1  ;;  %v2250_v27 = vand.u32 1, %v7501_v42  ;;  %v7517_v40 = vadd.s32 %v2172_v52, %v2124_v22  ;;  %v9149_v52 = vshra.s32 %v5965_v8, 1 }
 0x5d8   : >>> { %v2096_v42 = vshra.s32 %v6021_v36, 1 }
 0x5d9   : >>> { %v2234_v26 = vadd.s32 %v2218_v62, %v2090_v24  ;;  %v2266_v35 = vor.u32 %v2250_v27, %v2138_v16  ;;  %2379 = vperm.xlu0 %5610, %v7507_v31   ;;  %v7527_v7 = vadd.s32 4294967295, %v7517_v40  ;;  %v2123_v24 = vadd.s32 %v9143_v32, %v2091_v54 }
 0x5da   : >>> { %v2171_v16 = vor.u32 %v9142_v6, %v2139_v13  ;;  %v9148_v27 = vand.u32 1, %v5965_v8  ;;  %v9167_v31 = vshra.s32 %v5961_v30, 1 }
 0x5db   : >>> { %v7524_v59 = vadd.s32 %v2266_v35, %v2234_v26  ;;  %9363 = vst [vmem:[#allocation106_spill] sm:$0xff] %v7527_v7  ;;  %v2220_v50 = vshra.s32 %v7527_v7, 1  ;;  %v2252_v23 = vand.u32 1, %v7527_v7  ;;  %v2094_v35 = vshra.s32 %v6029_v38, 1 }
 0x5dc   : >>> { %v2142_v26 = vand.u32 1, %v6029_v38  ;;  %v7540_v62 = vadd.s32 %v2171_v16, %v2123_v24  ;;  %v2093_v7 = vshra.s32 %v6033_v48, 1  ;;  %v9154_v24 = vshra.s32 %v5969_v17, 1 }
 0x5dd   : >>> { %9362 = vst [vmem:[#allocation105_spill] sm:$0xff] %v7524_v59  ;;  %2385 = vperm.xlu1 %5609, %v7524_v59   ;;  %2382 = vperm.xlu0 %5610, %v7515_v37   ;;  %v2236_v22 = vadd.s32 %v2220_v50, %v2092_v53  ;;  %v2268_v6 = vor.u32 %v2252_v23, %v2140_v10  ;;  %v2141_v16 = vand.u32 1, %v6033_v48  ;;  %v9157_v53 = vand.u32 1, %v5969_v17 }
 0x5de   : >>> { %v2126_v32 = vadd.s32 %v9149_v52, %v2094_v35  ;;  %v7546_v15 = vadd.s32 4294967295, %v7540_v62  ;;  %v2174_v11 = vor.u32 %v9148_v27, %v2142_v26  ;;  %v2125_v27 = vadd.s32 %v9154_v24, %v2093_v7 }
 0x5df   : >>> { %v7551_v38 = vadd.s32 %v2268_v6, %v2236_v22  ;;  %v2173_v6 = vor.u32 %v9157_v53, %v2141_v16  ;;  %v2095_v53 = vshra.s32 %v6025_v60, 1  ;;  %v9385_v59 = vshra.s32 %v5993_v2, 1 }
 0x5e0   : >>> { %9364 = vst [vmem:[#allocation107_spill] sm:$0xff] %v7546_v15  ;;  %v2219_v10 = vshra.s32 %v7546_v15, 1  ;;  %v2251_v50 = vand.u32 1, %v7546_v15  ;;  %v7558_v23 = vadd.s32 %v2174_v11, %v2126_v32  ;;  %v9162_v11 = vshra.s32 %v5957_v28, 1 }
 0x5e1   : >>> { %9365 = vst [vmem:[#allocation108_spill] sm:$0xff] %v7551_v38  ;;  %2391 = vperm.xlu1 %5609, %v7551_v38   ;;  %v7568_v48 = vadd.s32 %v2173_v6, %v2125_v27  ;;  %v2144_v32 = vand.u32 1, %v6021_v36 }
 0x5e2   : >>> { %v2235_v22 = vadd.s32 %v2219_v10, %v2091_v54  ;;  %v2267_v52 = vor.u32 %v2251_v50, %v2139_v13  ;;  %v7566_v25 = vadd.s32 4294967295, %v7558_v23  ;;  %v9165_v54 = vand.u32 1, %v5957_v28 }
 0x5e3   : >>> { %v7580_v13 = vadd.s32 4294967295, %v7568_v48  ;;  %v2128_v27 = vadd.s32 %v9162_v11, %v2096_v42  ;;  %v2143_v11 = vand.u32 1, %v6025_v60  ;;  %v2145_v60 = vand.u32 1, %v6017_v61 }
 0x5e4   : >>> { %9366 = vst [vmem:[#allocation109_spill] sm:$0xff] %v7566_v25  ;;  %v7573_v15 = vadd.s32 %v2267_v52, %v2235_v22  ;;  %v2222_v24 = vshra.s32 %v7566_v25, 1  ;;  %v2254_v38 = vand.u32 1, %v7566_v25  ;;  %v2176_v52 = vor.u32 %v9165_v54, %v2144_v32 }
 0x5e5   : >>> { %2608 = vperm.xlu1 %5609, %v7517_v40   ;;  %9368 = vst [vmem:[#allocation111_spill] sm:$0xff] %v7580_v13  ;;  %v2221_v6 = vshra.s32 %v7580_v13, 1  ;;  %v2253_v22 = vand.u32 1, %v7580_v13  ;;  %v9171_v54 = vand.u32 1, %v5949_v46 }
 0x5e6   : >>> { %9367 = vst [vmem:[#allocation110_spill] sm:$0xff] %v7573_v15  ;;  %2388 = vperm.xlu0 %5610, %v7573_v15   ;;  %v2238_v10 = vadd.s32 %v2222_v24, %v2094_v35  ;;  %v2270_v50 = vor.u32 %v2254_v38, %v2142_v26  ;;  %v7592_v25 = vadd.s32 %v2176_v52, %v2128_v27  ;;  %v9166_v38 = vand.u32 1, %v5961_v30 }
 0x5e7   : >>> { %v2237_v15 = vadd.s32 %v2221_v6, %v2093_v7  ;;  %v2269_v35 = vor.u32 %v2253_v22, %v2141_v16  ;;  %v2127_v24 = vadd.s32 %v9167_v31, %v2095_v53  ;;  %v9172_v7 = vshra.s32 %v5949_v46, 1 }
 0x5e8   : >>> { %v7590_v36 = vadd.s32 %v2270_v50, %v2238_v10  ;;  %v7600_v26 = vadd.s32 4294967295, %v7592_v25  ;;  %v2175_v10 = vor.u32 %v9166_v38, %v2143_v11  ;;  %v2098_v52 = vshra.s32 %v6013_v56, 1 }
 0x5e9   : >>> { %v7604_v27 = vadd.s32 %v2269_v35, %v2237_v15  ;;  %v2146_v6 = vand.u32 1, %v6013_v56  ;;  %v9178_v56 = vshra.s32 %v5953_v3, 1 }
 0x5ea   : >>> { %9369 = vst [vmem:[#allocation112_spill] sm:$0xff] %v7590_v36  ;;  %2605 = vperm.xlu0 %5610, %v7540_v62   ;;  %2397 = vperm.xlu1 %5609, %v7590_v36   ;;  %9370 = vst [vmem:[#allocation113_spill] sm:$0xff] %v7600_v26  ;;  %v2224_v16 = vshra.s32 %v7600_v26, 1  ;;  %v2256_v50 = vand.u32 1, %v7600_v26  ;;  %v7613_v22 = vadd.s32 %v2175_v10, %v2127_v24  ;;  %v2097_v24 = vshra.s32 %v6017_v61, 1 }
 0x5eb   : >>> { %9371 = vst [vmem:[#allocation114_spill] sm:$0xff] %v7604_v27  ;;  %v2130_v38 = vadd.s32 %v9172_v7, %v2098_v52  ;;  %v2178_v26 = vor.u32 %v9171_v54, %v2146_v6 }
 0x5ec   : >>> { %v2240_v15 = vadd.s32 %v2224_v16, %v2096_v42  ;;  %v2272_v35 = vor.u32 %v2256_v50, %v2144_v32  ;;  %v7621_v31 = vadd.s32 4294967295, %v7613_v22  ;;  %v9181_v42 = vand.u32 1, %v5953_v3 }
 0x5ed   : >>> { %v7633_v50 = vadd.s32 %v2178_v26, %v2130_v38  ;;  %v2100_v38 = vshra.s32 %v6005_v18, 1  ;;  %v9186_v26 = vshra.s32 %v5941_v19, 1 }
 0x5ee   : >>> { %2394 = vperm.xlu0 %5610, %v7604_v27   ;;  %2614 = vperm.xlu1 %5609, %v7558_v23   ;;  %9372 = vst [vmem:[#allocation115_spill] sm:$0xff] %v7621_v31  ;;  %v7626_v10 = vadd.s32 %v2272_v35, %v2240_v15  ;;  %v2223_v32 = vshra.s32 %v7621_v31, 1  ;;  %v2255_v16 = vand.u32 1, %v7621_v31  ;;  %v2129_v15 = vadd.s32 %v9178_v56, %v2097_v24 }
 0x5ef   : >>> { %v2177_v35 = vor.u32 %v9181_v42, %v2145_v60  ;;  %v7642_v61 = vadd.s32 4294967295, %v7633_v50  ;;  %v2148_v31 = vand.u32 1, %v6005_v18  ;;  %v2099_v42 = vshra.s32 %v6009_v0, 1 }
 0x5f0   : >>> { %9373 = vst [vmem:[#allocation116_spill] sm:$0xff] %v7626_v10  ;;  %v2239_v54 = vadd.s32 %v2223_v32, %v2095_v53  ;;  %v2271_v7 = vor.u32 %v2255_v16, %v2143_v11  ;;  %v9189_v53 = vand.u32 1, %v5941_v19  ;;  %v2132_v32 = vadd.s32 %v9186_v26, %v2100_v38 }
 0x5f1   : >>> { %9374 = vst [vmem:[#allocation117_spill] sm:$0xff] %v7642_v61  ;;  %v7644_v13 = vadd.s32 %v2177_v35, %v2129_v15  ;;  %v2226_v56 = vshra.s32 %v7642_v61, 1  ;;  %v2258_v36 = vand.u32 1, %v7642_v61  ;;  %v9191_v27 = vshra.s32 %v5945_v21, 1 }
 0x5f2   : >>> { %2611 = vperm.xlu0 %5610, %v7568_v48   ;;  %2403 = vperm.xlu1 %5609, %v7626_v10   ;;  %v7649_v10 = vadd.s32 %v2271_v7, %v2239_v54  ;;  %v2180_v54 = vor.u32 %v9189_v53, %v2148_v31  ;;  %v2147_v26 = vand.u32 1, %v6009_v0  ;;  %v9196_v53 = vand.u32 1, %v5933_v63 }
 0x5f3   : >>> { %v7656_v11 = vadd.s32 4294967295, %v7644_v13  ;;  %v2242_v16 = vadd.s32 %v2226_v56, %v2098_v52  ;;  %v2274_v15 = vor.u32 %v2258_v36, %v2146_v6  ;;  %v9190_v36 = vand.u32 1, %v5945_v21 }
 0x5f4   : >>> { %9375 = vst [vmem:[#allocation118_spill] sm:$0xff] %v7649_v10  ;;  %v7668_v61 = vadd.s32 %v2180_v54, %v2132_v32  ;;  %v2131_v6 = vadd.s32 %v9191_v27, %v2099_v42  ;;  %v2102_v54 = vshra.s32 %v5997_v20, 1  ;;  %v2149_v0 = vand.u32 1, %v6001_v43 }
 0x5f5   : >>> { %9376 = vst [vmem:[#allocation119_spill] sm:$0xff] %v7656_v11  ;;  %v2225_v7 = vshra.s32 %v7656_v11, 1  ;;  %v2257_v35 = vand.u32 1, %v7656_v11  ;;  %v7666_v18 = vadd.s32 %v2274_v15, %v2242_v16  ;;  %v2179_v16 = vor.u32 %v9190_v36, %v2147_v26 }
 0x5f6   : >>> { %2620 = vperm.xlu1 %5609, %v7592_v25   ;;  %2400 = vperm.xlu0 %5610, %v7649_v10   ;;  %v7676_v52 = vadd.s32 4294967295, %v7668_v61 }
 0x5f7   : >>> { %9377 = vst [vmem:[#allocation120_spill] sm:$0xff] %v7666_v18  ;;  %v2241_v10 = vadd.s32 %v2225_v7, %v2097_v24  ;;  %v2273_v56 = vor.u32 %v2257_v35, %v2145_v60  ;;  %v9195_v24 = vshra.s32 %v5933_v63, 1  ;;  %v2150_v7 = vand.u32 1, %v5997_v20 }
 0x5f8   : >>> { %9378 = vst [vmem:[#allocation121_spill] sm:$0xff] %v7676_v52  ;;  %v2228_v60 = vshra.s32 %v7676_v52, 1  ;;  %v2260_v15 = vand.u32 1, %v7676_v52  ;;  %v7689_v35 = vadd.s32 %v2179_v16, %v2131_v6  ;;  %v2101_v6 = vshra.s32 %v6001_v43, 1 }
 0x5f9   : >>> { %v7680_v32 = vadd.s32 %v2273_v56, %v2241_v10  ;;  %v2134_v36 = vadd.s32 %v9195_v24, %v2102_v54  ;;  %v2182_v52 = vor.u32 %v9196_v53, %v2150_v7  ;;  %v9206_v20 = vshra.s32 %v5937_v9, 1 }
 0x5fa   : >>> { %2617 = vperm.xlu0 %5610, %v7613_v22   ;;  %2409 = vperm.xlu1 %5609, %v7666_v18   ;;  %v2244_v10 = vadd.s32 %v2228_v60, %v2100_v38  ;;  %v2276_v56 = vor.u32 %v2260_v15, %v2148_v31  ;;  %v7697_v27 = vadd.s32 4294967295, %v7689_v35  ;;  %v9209_v38 = vand.u32 1, %v5937_v9 }
 0x5fb   : >>> { %9379 = vst [vmem:[#allocation122_spill] sm:$0xff] %v7680_v32  ;;  %v7709_v15 = vadd.s32 %v2182_v52, %v2134_v36  ;;  %v2296_v24 = vshra.s32 %v7461_v14, 1  ;;  %v2328_v53 = vand.u32 1, %v7461_v14  ;;  %v2295_v43 = vshra.s32 %v7450_v39, 1 }
 0x5fc   : >>> { %9380 = vst [vmem:[#allocation123_spill] sm:$0xff] %v7697_v27  ;;  %v7702_v16 = vadd.s32 %v2276_v56, %v2244_v10  ;;  %v2227_v31 = vshra.s32 %v7697_v27, 1  ;;  %v2259_v60 = vand.u32 1, %v7697_v27  ;;  %v2133_v10 = vadd.s32 %v9206_v20, %v2101_v6 }
 0x5fd   : >>> { %v2181_v56 = vor.u32 %v9209_v38, %v2149_v0  ;;  %v7721_v36 = vadd.s32 4294967295, %v7709_v15  ;;  %v9383_v52 = vshra.s32 %v5989_v49, 1  ;;  %v2311_v38 = vadd.s32 %v2295_v43, %v9385_v59 }
 0x5fe   : >>> { %2406 = vperm.xlu0 %5610, %v7680_v32   ;;  %2626 = vperm.xlu1 %5609, %v7633_v50   ;;  %9381 = vst [vmem:[#allocation124_spill] sm:$0xff] %v7702_v16  ;;  %v2243_v11 = vadd.s32 %v2227_v31, %v2099_v42  ;;  %v2275_v27 = vor.u32 %v2259_v60, %v2147_v26  ;;  %v2327_v14 = vand.u32 1, %v7450_v39 }
 0x5ff   : >>> { %9382 = vst [vmem:[#allocation125_spill] sm:$0xff] %v7721_v36  ;;  %v2312_v18 = vadd.s32 %v2296_v24, %v9383_v52  ;;  %v7725_v32 = vadd.s32 %v2181_v56, %v2133_v10  ;;  %v2230_v42 = vshra.s32 %v7721_v36, 1  ;;  %v2262_v26 = vand.u32 1, %v7721_v36 }
 0x600   : >>> { %v7732_v44 = vadd.s32 %v2275_v27, %v2243_v11 }
 0x601   : >>> { %v7738_v24 = vadd.s32 4294967295, %v7725_v32  ;;  %v2246_v43 = vadd.s32 %v2230_v42, %v2102_v54  ;;  %v2278_v59 = vor.u32 %v2262_v26, %v2150_v7  ;;  %v2330_v54 = vand.u32 1, %v7494_v1 }
 0x602   : >>> { %2623 = vperm.xlu0 %5610, %v7644_v13   ;;  %2415 = vperm.xlu1 %5609, %v7702_v16   ;;  %v9384_v16 = vand.u32 1, %v5989_v49  ;;  %v2335_v42 = vand.u32 1, %v7613_v22  ;;  %v9389_v26 = vand.u32 1, %v5981_v55  ;;  %v2329_v49 = vand.u32 1, %v7476_v4 }
 0x603   : >>> { %v2229_v27 = vshra.s32 %v7738_v24, 1  ;;  %v2261_v11 = vand.u32 1, %v7738_v24  ;;  %v7749_v10 = vadd.s32 %v2278_v59, %v2246_v43  ;;  %v9391_v59 = vand.u32 1, %v5957_v28 }
 0x604   : >>> { %v2344_v20 = vor.u32 %v2328_v53, %v9384_v16  ;;  %v9387_v53 = vand.u32 1, %v5993_v2  ;;  %v2305_v2 = vshra.s32 %v7644_v13, 1 }
 0x605   : >>> { %v2245_v56 = vadd.s32 %v2229_v27, %v2101_v6  ;;  %v2277_v52 = vor.u32 %v2261_v11, %v2149_v0  ;;  %v9388_v0 = vshra.s32 %v5981_v55, 1 }
 0x606   : >>> { %2632 = vperm.xlu1 %5609, %v7668_v61   ;;  %v7740_v31 = vadd.s32 %v2344_v20, %v2312_v18  ;;  %v2343_v16 = vor.u32 %v2327_v14, %v9387_v53  ;;  %2412 = vperm.xlu0 %5610, %v7732_v44   ;;  %v2304_v20 = vshra.s32 %v7592_v25, 1  ;;  %v2298_v18 = vshra.s32 %v7494_v1, 1 }
 0x607   : >>> { %v2336_v14 = vand.u32 1, %v7592_v25  ;;  %v7757_v7 = vadd.s32 %v2277_v52, %v2245_v56  ;;  %v2346_v53 = vor.u32 %v2330_v54, %v9389_v26  ;;  %v2300_v56 = vshra.s32 %v7517_v40, 1 }
 0x608   : >>> { %9386 = vst [vmem:[#allocation126_spill] sm:$0xff] %v7740_v31  ;;  %v7747_v60 = vadd.s32 %v2343_v16, %v2311_v38  ;;  %v2303_v38 = vshra.s32 %v7613_v22, 1  ;;  %v2314_v6 = vadd.s32 %v2298_v18, %v9388_v0  ;;  %v9390_v16 = vshra.s32 %v5957_v28, 1 }
 0x609   : >>> { %v2352_v27 = vor.u32 %v2336_v14, %v9391_v59  ;;  %v2332_v52 = vand.u32 1, %v7517_v40  ;;  %v9393_v18 = vshra.s32 %v5961_v30, 1  ;;  %v9394_v54 = vand.u32 1, %v5961_v30 }
 0x60a   : >>> { %2629 = vperm.xlu0 %5610, %v7689_v35   ;;  %2421 = vperm.xlu1 %5609, %v7749_v10   ;;  %v2320_v43 = vadd.s32 %v2304_v20, %v9390_v16  ;;  %v7771_v11 = vadd.s32 %v2346_v53, %v2314_v6  ;;  %v2299_v20 = vshra.s32 %v7540_v62, 1  ;;  %v2297_v16 = vshra.s32 %v7476_v4, 1 }
 0x60b   : >>> { %v2319_v0 = vadd.s32 %v2303_v38, %v9393_v18  ;;  %v2351_v26 = vor.u32 %v2335_v42, %v9394_v54  ;;  %v9395_v14 = vshra.s32 %v5973_v5, 1  ;;  %v9396_v53 = vand.u32 1, %v5973_v5 }
 0x60c   : >>> { %9392 = vst [vmem:[#allocation127_spill] sm:$0xff] %v7771_v11  ;;  %v9397_v28 = vshra.s32 %v5977_v12, 1  ;;  %v2331_v38 = vand.u32 1, %v7540_v62  ;;  %v7791_v42 = vadd.s32 %v2352_v27, %v2320_v43  ;;  %v2306_v18 = vshra.s32 %v7633_v50, 1 }
 0x60d   : >>> { %v2316_v6 = vadd.s32 %v2300_v56, %v9395_v14  ;;  %v2348_v59 = vor.u32 %v2332_v52, %v9396_v53  ;;  %v2338_v54 = vand.u32 1, %v7633_v50  ;;  %v7797_v56 = vadd.s32 %v2351_v26, %v2319_v0 }
 0x60e   : >>> { %2418 = vperm.xlu0 %5610, %v7757_v7   ;;  %2638 = vperm.xlu1 %5609, %v7709_v15   ;;  %v2315_v55 = vadd.s32 %v2299_v20, %v9397_v28  ;;  %v9399_v52 = vand.u32 1, %v5977_v12  ;;  %v2302_v28 = vshra.s32 %v7558_v23, 1  ;;  %v2334_v20 = vand.u32 1, %v7558_v23 }
 0x60f   : >>> { %v7795_v30 = vadd.s32 %v2348_v59, %v2316_v6  ;;  %v9400_v53 = vshra.s32 %v5985_v47, 1  ;;  %v9401_v43 = vand.u32 1, %v5985_v47  ;;  %v2301_v6 = vshra.s32 %v7568_v48, 1 }
 0x610   : >>> { %v2347_v14 = vor.u32 %v2331_v38, %v9399_v52  ;;  %v2337_v0 = vand.u32 1, %v7644_v13  ;;  %v9402_v59 = vshra.s32 %v5965_v8, 1  ;;  %v9403_v52 = vand.u32 1, %v5965_v8 }
 0x611   : >>> { %9398 = vst [vmem:[#allocation128_spill] sm:$0xff] %v7795_v30  ;;  %v2313_v5 = vadd.s32 %v2297_v16, %v9400_v53  ;;  %v2345_v27 = vor.u32 %v2329_v49, %v9401_v43  ;;  %v9404_v49 = vshra.s32 %v5949_v46, 1  ;;  %v9405_v53 = vand.u32 1, %v5949_v46 }
 0x612   : >>> { %2635 = vperm.xlu0 %5610, %v7725_v32   ;;  %2813 = vperm.xlu1 %5609, %v7740_v31   ;;  %v7810_v26 = vadd.s32 %v2347_v14, %v2315_v55  ;;  %v2318_v38 = vadd.s32 %v2302_v28, %v9402_v59  ;;  %v2350_v12 = vor.u32 %v2334_v20, %v9403_v52  ;;  %v9406_v47 = vshra.s32 %v5969_v17, 1 }
 0x613   : >>> { %v2322_v16 = vadd.s32 %v2306_v18, %v9404_v49  ;;  %v2354_v43 = vor.u32 %v2338_v54, %v9405_v53  ;;  %v2333_v14 = vand.u32 1, %v7568_v48  ;;  %v9408_v28 = vand.u32 1, %v5969_v17 }
 0x614   : >>> { %v2317_v55 = vadd.s32 %v2301_v6, %v9406_v47  ;;  %v7825_v36 = vadd.s32 %v2350_v12, %v2318_v38  ;;  %v7829_v59 = vadd.s32 %v2345_v27, %v2313_v5  ;;  %v9409_v52 = vshra.s32 %v5953_v3, 1 }
 0x615   : >>> { %v2349_v20 = vor.u32 %v2333_v14, %v9408_v28  ;;  %v9410_v18 = vand.u32 1, %v5953_v3  ;;  %v6073_v46 = vmov 1065369472   ;;  %v7839_v47 = vadd.s32 %v2354_v43, %v2322_v16 }
 0x616   : >>> { %2810 = vperm.xlu0 %5610, %v7747_v60   ;;  %2837 = vperm.xlu1 %5609, %v7791_v42   ;;  %9407 = vst [vmem:[#allocation129_spill] sm:$0xff] %v7825_v36  ;;  %v2321_v8 = vadd.s32 %v2305_v2, %v9409_v52  ;;  %v2308_v12 = vshra.s32 %v7668_v61, 1  ;;  %v2340_v5 = vand.u32 1, %v7668_v61  ;;  %v2307_v2 = vshra.s32 %v7689_v35, 1 }
 0x617   : >>> { %v2353_v49 = vor.u32 %v2337_v0, %v9410_v18  ;;  %4984 = vmatprep.subr.bf16.mxu1 %v6073_v46  ;;  %4952 = vmatprep.subr.bf16.mxu0 %v6073_v46  ;;  %v7843_v54 = vadd.s32 %v2349_v20, %v2317_v55  ;;  %v2339_v27 = vand.u32 1, %v7689_v35  ;;  %v9411_v0 = vshra.s32 %v5941_v19, 1 }
 0x618   : >>> { %4985 = vmatpush3.bf16.msra.mxu1 %v6073_v46  ;;  %4953 = vmatpush3.bf16.msra.mxu0 %v6073_v46  ;;  %v9412_v16 = vand.u32 1, %v5941_v19  ;;  %v9413_v43 = vshra.s32 %v5945_v21, 1  ;;  %v2310_v20 = vshra.s32 %v7709_v15, 1  ;;  %v2342_v52 = vand.u32 1, %v7709_v15  ;;  %v9425_v19 = vld [vmem:[#allocation32_spill] sm:$0xff] }
 0x619   : >>> { %4986 = vmatprep.subr.bf16.mxu1 %v6073_v46  ;;  %4954 = vmatprep.subr.bf16.mxu0 %v6073_v46  ;;  %v7853_v6 = vadd.s32 %v2353_v49, %v2321_v8  ;;  %v2324_v38 = vadd.s32 %v2308_v12, %v9411_v0  ;;  %v9414_v8 = vand.u32 1, %v5945_v21  ;;  %v9415_v49 = vshra.s32 %v5933_v63, 1  ;;  %v9433_v21 = vld [vmem:[#allocation99_spill] sm:$0xff] }
 0x61a   : >>> { %2834 = vperm.xlu0 %5610, %v7797_v56   ;;  %2819 = vperm.xlu1 %5609, %v7771_v11   ;;  %v2356_v53 = vor.u32 %v2340_v5, %v9412_v16  ;;  %v2323_v55 = vadd.s32 %v2307_v2, %v9413_v43  ;;  %v9416_v5 = vand.u32 1, %v5933_v63  ;;  %v2341_v0 = vand.u32 1, %v7725_v32  ;;  %v9426_v63 = vld [vmem:[#allocation30_spill] sm:$0xff] }
 0x61b   : >>> { %v2355_v14 = vor.u32 %v2339_v27, %v9414_v8  ;;  %v2326_v12 = vadd.s32 %v2310_v20, %v9415_v49  ;;  %v2309_v27 = vshra.s32 %v7725_v32, 1  ;;  %v9417_v16 = vshra.s32 %v5937_v9, 1 }
 0x61c   : >>> { %4987 = vmatpush3.bf16.msra.mxu1 %v6073_v46  ;;  %4955 = vmatpush3.bf16.msra.mxu0 %v6073_v46  ;;  %v7869_v28 = vadd.s32 %v2356_v53, %v2324_v38  ;;  %v2358_v2 = vor.u32 %v2342_v52, %v9416_v5  ;;  %v9418_v43 = vand.u32 1, %v5937_v9  ;;  %v6074_v49 = vmov 1.0|1.0  }
 0x61d   : >>> { %4988 = vmatprep.subr.bf16.mxu1 %v6073_v46  ;;  %4956 = vmatprep.subr.bf16.mxu0 %v6073_v46  ;;  %v7877_v18 = vadd.s32 %v2355_v14, %v2323_v55  ;;  %v2325_v53 = vadd.s32 %v2309_v27, %v9417_v16 }
 0x61e   : >>> { %2816 = vperm.xlu0 %5610, %v7829_v59   ;;  %2843 = vperm.xlu1 %5609, %v7839_v47   ;;  %v7893_v38 = vadd.s32 %v2358_v2, %v2326_v12  ;;  %v2357_v55 = vor.u32 %v2341_v0, %v9418_v43 }
 0x620   : >>> { %4989 = vmatpush3.bf16.msra.mxu1 %v6073_v46  ;;  %4957 = vmatpush3.bf16.msra.mxu0 %v6073_v46  ;;  %v7905_v8 = vadd.s32 %v2357_v55, %v2325_v53 }
 0x621   : >>> { %4990 = vmatprep.subr.bf16.mxu1 %v6073_v46  ;;  %4958 = vmatprep.subr.bf16.mxu0 %v6073_v46 }
 0x622   : >>> { %2840 = vperm.xlu0 %5610, %v7853_v6   ;;  %2825 = vperm.xlu1 %5609, %v7795_v30  }
 0x624   : >>> { %4991 = vmatpush3.bf16.msra.mxu1 %v6073_v46  ;;  %4959 = vmatpush3.bf16.msra.mxu0 %v6073_v46 }
 0x625   : >>> { %4992 = vmatprep.subr.bf16.mxu1 %v6073_v46  ;;  %4960 = vmatprep.subr.bf16.mxu0 %v6073_v46 }
 0x626   : >>> { %2822 = vperm.xlu0 %5610, %v7810_v26   ;;  %2849 = vperm.xlu1 %5609, %v7869_v28  }
 0x628   : >>> { %4993 = vmatpush3.bf16.msra.mxu1 %v6073_v46  ;;  %4961 = vmatpush3.bf16.msra.mxu0 %v6073_v46 }
 0x629   : >>> { %4994 = vmatprep.subr.bf16.mxu1 %v6073_v46  ;;  %4962 = vmatprep.subr.bf16.mxu0 %v6073_v46 }
 0x62a   : >>> { %2846 = vperm.xlu0 %5610, %v7877_v18   ;;  %2831 = vperm.xlu1 %5609, %v7825_v36  }
 0x62c   : >>> { %4995 = vmatpush3.bf16.msra.mxu1 %v6073_v46  ;;  %4963 = vmatpush3.bf16.msra.mxu0 %v6073_v46 }
 0x62d   : >>> { %4996 = vmatprep.subr.bf16.mxu1 %v6073_v46  ;;  %4964 = vmatprep.subr.bf16.mxu0 %v6073_v46 }
 0x62e   : >>> { %2828 = vperm.xlu0 %5610, %v7843_v54   ;;  %2855 = vperm.xlu1 %5609, %v7893_v38  }
 0x630   : >>> { %4997 = vmatpush3.bf16.msra.mxu1 %v6073_v46  ;;  %4965 = vmatpush3.bf16.msra.mxu0 %v6073_v46 }
 0x631   : >>> { %4998 = vmatprep.subr.bf16.mxu1 %v6073_v46  ;;  %4966 = vmatprep.subr.bf16.mxu0 %v6073_v46 }
 0x632   : >>> { %2852 = vperm.xlu0 %5610, %v7905_v8  }
 0x634   : >>> { %4999 = vmatpush3.bf16.msra.mxu1 %v6073_v46  ;;  %4967 = vmatpush3.bf16.msra.mxu0 %v6073_v46 }
 0x635   : >>> { %5016 = vmatprep.subr.bf16.mxu0 %v6073_v46  ;;  %5178 = vmatprep.subr.bf16.mxu1 %v6073_v46 }
 0x646   : >>> { %v2594_v14 = vpop.permute.xlu1 %2593 }
 0x647   : >>> { %vm2640_vm14 = vcmp.ge.s32.totalorder %v9316_v34, %v2594_v14 }
 0x649   : >>> { %v2600_v52 = vpop.permute.xlu0 %2599 }
 0x64a   : >>> { %v2597_v20 = vpop.permute.xlu1 %2596  ;;  %vm2642_vm3 = vcmp.ge.s32.totalorder %v9315_v29, %v2600_v52 }
 0x64b   : >>> { %vm2641_vm15 = vcmp.ge.s32.totalorder %v9317_v57, %v2597_v20 }
 0x64c   : >>> { %vm4683_vm2 = vmpackc.low %vm2641_vm15, %vm2640_vm14 }
 0x64d   : >>> { %5000 = vmatprep.mubr.msk.bf16.mxu1 %vm4683_vm2, %v6074_v49 }
 0x654   : >>> { %v2603_v12 = vpop.permute.xlu1 %2602  ;;  %v2377_v5 = vpop.permute.xlu0 %2376 }
 0x655   : >>> { %vm2643_vm4 = vcmp.ge.s32.totalorder %v9318_v33, %v2603_v12  ;;  %vm2423_vm6 = vcmp.ge.s32.totalorder %v9316_v34, %v2377_v5 }
 0x656   : >>> { %vm4685_vm5 = vmpackc.low %vm2643_vm4, %vm2642_vm3 }
 0x657   : >>> { %5001 = vmatmul.mubr.msk.bf16.vlgmr.msra.gmra.mrb[0].mxu1 %vm4685_vm5, %v6074_v49 }
 0x658   : >>> { %5186 = vmatpush3.bf16.msra.mxu1 %v6073_v46  ;;  %v2380_v2 = vpop.permute.xlu0 %2379 }
 0x659   : >>> { %5179 = vmatprep.subr.bf16.mxu1 %v6073_v46  ;;  %vm2424_vm7 = vcmp.ge.s32.totalorder %v9317_v57, %v2380_v2 }
 0x65a   : >>> { %vm4651_vm8 = vmpackc.low %vm2424_vm7, %vm2423_vm6 }
 0x65b   : >>> { %4968 = vmatprep.mubr.msk.bf16.mxu0 %vm4651_vm8, %v6074_v49 }
 0x65c   : >>> { %v2386_v27 = vpop.permute.xlu1 %2385  ;;  %5187 = vmatpush3.bf16.msra.mxu1 %v6073_v46  ;;  %v2383_v0 = vpop.permute.xlu0 %2382 }
 0x65d   : >>> { %5180 = vmatprep.subr.bf16.mxu1 %v6073_v46  ;;  %vm2426_vm9 = vcmp.ge.s32.totalorder %v9318_v33, %v2386_v27  ;;  %vm2425_vm10 = vcmp.ge.s32.totalorder %v9315_v29, %v2383_v0  ;;  %v9419_v0 = vld [vmem:[#allocation24_spill] sm:$0xff] }
 0x65e   : >>> { %vm4653_vm11 = vmpackc.low %vm2426_vm9, %vm2425_vm10 }
 0x65f   : >>> { %4969 = vmatmul.mubr.msk.bf16.vlgmr.msra.gmra.mrb[0].mxu0 %vm4653_vm11, %v6074_v49 }
 0x660   : >>> { %5188 = vmatpush3.bf16.msra.mxu1 %v6073_v46  ;;  %5017 = vmatpush3.bf16.msra.mxu0 %v6073_v46  ;;  %v2392_v16 = vpop.permute.xlu1 %2391 }
 0x661   : >>> { %5181 = vmatprep.subr.bf16.mxu1 %v6073_v46  ;;  %5018 = vmatprep.subr.bf16.mxu0 %v6073_v46  ;;  %vm2428_vm12 = vcmp.ge.s32.totalorder %v9320_v51, %v2392_v16  ;;  %v9420_v16 = vld [vmem:[#allocation21_spill] sm:$0xff] }
 0x664   : >>> { %5189 = vmatpush3.bf16.msra.mxu1 %v6073_v46  ;;  %5019 = vmatpush3.bf16.msra.mxu0 %v6073_v46  ;;  %v2609_v53 = vpop.permute.xlu1 %2608 }
 0x665   : >>> { %5182 = vmatprep.subr.bf16.mxu1 %v6073_v46  ;;  %5020 = vmatprep.subr.bf16.mxu0 %v6073_v46  ;;  %v2389_v43 = vpop.permute.xlu0 %2388  ;;  %vm2645_vm15 = vcmp.ge.s32.totalorder %v9320_v51, %v2609_v53 }
 0x666   : >>> { %vm2427_vm13 = vcmp.ge.s32.totalorder %v9319_v58, %v2389_v43 }
 0x667   : >>> { %vm4655_vm14 = vmpackc.low %vm2428_vm12, %vm2427_vm13 }
 0x668   : >>> { %5190 = vmatpush3.bf16.msra.mxu1 %v6073_v46  ;;  %5021 = vmatpush3.bf16.msra.mxu0 %v6073_v46 }
 0x669   : >>> { %5183 = vmatprep.subr.bf16.mxu1 %v6073_v46  ;;  %4972 = vmatprep.mubr.msk.bf16.mxu0 %vm4655_vm14, %v6074_v49  ;;  %v2606_v55 = vpop.permute.xlu0 %2605  ;;  %v2398_v14 = vpop.permute.xlu1 %2397 }
 0x66a   : >>> { %5022 = vmatprep.subr.bf16.mxu0 %v6073_v46  ;;  %vm2644_vm2 = vcmp.ge.s32.totalorder %v9319_v58, %v2606_v55  ;;  %vm2430_vm4 = vcmp.ge.s32.totalorder %v9322_v41, %v2398_v14 }
 0x66b   : >>> { %vm4687_vm3 = vmpackc.low %vm2645_vm15, %vm2644_vm2 }
 0x66c   : >>> { %5191 = vmatpush3.bf16.msra.mxu1 %v6073_v46  ;;  %5023 = vmatpush3.bf16.msra.mxu0 %v6073_v46 }
 0x66d   : >>> { %5184 = vmatprep.subr.bf16.mxu1 %v6073_v46  ;;  %5004 = vmatprep.mubr.msk.bf16.mxu1 %vm4687_vm3, %v6074_v49  ;;  %v2395_v20 = vpop.permute.xlu0 %2394  ;;  %v2615_v52 = vpop.permute.xlu1 %2614 }
 0x66e   : >>> { %5024 = vmatprep.subr.bf16.mxu0 %v6073_v46  ;;  %vm2429_vm5 = vcmp.ge.s32.totalorder %v9321_v45, %v2395_v20  ;;  %vm2647_vm7 = vcmp.ge.s32.totalorder %v9322_v41, %v2615_v52  ;;  %v9421_v20 = vld [vmem:[#allocation23_spill] sm:$0xff] }
 0x66f   : >>> { %vm4657_vm6 = vmpackc.low %vm2430_vm4, %vm2429_vm5  ;;  %v9422_v52 = vld [vmem:[#allocation19_spill] sm:$0xff] }
 0x670   : >>> { %5192 = vmatpush3.bf16.msra.mxu1 %v6073_v46  ;;  %5025 = vmatpush3.bf16.msra.mxu0 %v6073_v46 }
 0x671   : >>> { %5185 = vmatprep.subr.bf16.mxu1 %v6073_v46  ;;  %4973 = vmatmul.mubr.msk.bf16.gmra.mrb[4].mxu0 %vm4657_vm6, %v6074_v49  ;;  %v2612_v12 = vpop.permute.xlu0 %2611  ;;  %v2404_v5 = vpop.permute.xlu1 %2403 }
 0x672   : >>> { %5026 = vmatprep.subr.bf16.mxu0 %v6073_v46  ;;  %vm2646_vm8 = vcmp.ge.s32.totalorder %v9321_v45, %v2612_v12  ;;  %vm2432_vm10 = vcmp.ge.s32.totalorder %v9419_v0, %v2404_v5 }
 0x673   : >>> { %vm4689_vm9 = vmpackc.low %vm2647_vm7, %vm2646_vm8 }
 0x674   : >>> { %5193 = vmatpush3.bf16.msra.mxu1 %v6073_v46  ;;  %5027 = vmatpush3.bf16.msra.mxu0 %v6073_v46 }
 0x675   : >>> { %5005 = vmatmul.mubr.msk.bf16.gmra.mrb[4].mxu1 %vm4689_vm9, %v6074_v49  ;;  %5028 = vmatprep.subr.bf16.mxu0 %v6073_v46  ;;  %v2621_v2 = vpop.permute.xlu1 %2620  ;;  %v2401_v27 = vpop.permute.xlu0 %2400 }
 0x676   : >>> { %vm2431_vm11 = vcmp.ge.s32.totalorder %v9420_v16, %v2401_v27  ;;  %vm2649_vm13 = vcmp.ge.s32.totalorder %v9419_v0, %v2621_v2  ;;  %v9423_v27 = vld [vmem:[#allocation33_spill] sm:$0xff] }
 0x677   : >>> { %vm4659_vm12 = vmpackc.low %vm2432_vm10, %vm2431_vm11 }
 0x678   : >>> { %5029 = vmatpush3.bf16.msra.mxu0 %v6073_v46  ;;  %4976 = vmatprep.mubr.msk.bf16.mxu0 %vm4659_vm12, %v6074_v49 }
 0x679   : >>> { %5030 = vmatprep.subr.bf16.mxu0 %v6073_v46  ;;  %v2618_v53 = vpop.permute.xlu0 %2617  ;;  %v2410_v43 = vpop.permute.xlu1 %2409 }
 0x67a   : >>> { %vm2648_vm14 = vcmp.ge.s32.totalorder %v9420_v16, %v2618_v53  ;;  %vm2434_vm2 = vcmp.ge.s32.totalorder %v9421_v20, %v2410_v43  ;;  %v9424_v53 = vld [vmem:[#allocation31_spill] sm:$0xff] }
 0x67b   : >>> { %vm4691_vm15 = vmpackc.low %vm2649_vm13, %vm2648_vm14 }
 0x67c   : >>> { %5031 = vmatpush3.bf16.msra.mxu0 %v6073_v46  ;;  %5008 = vmatprep.mubr.msk.bf16.mxu1 %vm4691_vm15, %v6074_v49 }
 0x67d   : >>> { %v2407_v55 = vpop.permute.xlu0 %2406  ;;  %v2627_v14 = vpop.permute.xlu1 %2626 }
 0x67e   : >>> { %vm2433_vm3 = vcmp.ge.s32.totalorder %v9422_v52, %v2407_v55  ;;  %vm2651_vm5 = vcmp.ge.s32.totalorder %v9421_v20, %v2627_v14 }
 0x67f   : >>> { %vm4661_vm4 = vmpackc.low %vm2434_vm2, %vm2433_vm3 }
 0x680   : >>> { %4977 = vmatmul.mubr.msk.bf16.gmra.mrb[8].mxu0 %vm4661_vm4, %v6074_v49 }
 0x681   : >>> { %v2624_v12 = vpop.permute.xlu0 %2623  ;;  %v2416_v5 = vpop.permute.xlu1 %2415 }
 0x682   : >>> { %vm2650_vm6 = vcmp.ge.s32.totalorder %v9422_v52, %v2624_v12  ;;  %vm2436_vm8 = vcmp.ge.s32.totalorder %v9423_v27, %v2416_v5 }
 0x683   : >>> { %vm4693_vm7 = vmpackc.low %vm2651_vm5, %vm2650_vm6 }
 0x684   : >>> { %5009 = vmatmul.mubr.msk.bf16.gmra.mrb[8].mxu1 %vm4693_vm7, %v6074_v49 }
 0x685   : >>> { %v2633_v46 = vpop.permute.xlu1 %2632  ;;  %v2413_v2 = vpop.permute.xlu0 %2412 }
 0x686   : >>> { %vm2435_vm9 = vcmp.ge.s32.totalorder %v9424_v53, %v2413_v2  ;;  %vm2653_vm11 = vcmp.ge.s32.totalorder %v9423_v27, %v2633_v46 }
 0x687   : >>> { %vm4663_vm10 = vmpackc.low %vm2436_vm8, %vm2435_vm9 }
 0x688   : >>> { %4980 = vmatprep.mubr.msk.bf16.mxu0 %vm4663_vm10, %v6074_v49 }
 0x689   : >>> { %v2630_v43 = vpop.permute.xlu0 %2629  ;;  %v2422_v55 = vpop.permute.xlu1 %2421 }
 0x68a   : >>> { %vm2652_vm12 = vcmp.ge.s32.totalorder %v9424_v53, %v2630_v43  ;;  %vm2438_vm14 = vcmp.ge.s32.totalorder %v9425_v19, %v2422_v55 }
 0x68b   : >>> { %vm4695_vm13 = vmpackc.low %vm2653_vm11, %vm2652_vm12 }
 0x68c   : >>> { %5012 = vmatprep.mubr.msk.bf16.mxu1 %vm4695_vm13, %v6074_v49 }
 0x68d   : >>> { %v2419_v14 = vpop.permute.xlu0 %2418  ;;  %v2639_v12 = vpop.permute.xlu1 %2638 }
 0x68e   : >>> { %vm2437_vm15 = vcmp.ge.s32.totalorder %v9426_v63, %v2419_v14  ;;  %vm2655_vm3 = vcmp.ge.s32.totalorder %v9425_v19, %v2639_v12 }
 0x68f   : >>> { %vm4665_vm2 = vmpackc.low %vm2438_vm14, %vm2437_vm15 }
 0x690   : >>> { %4981 = vmatmul.mubr.msk.bf16.gmra.mrb[12].mxu0 %vm4665_vm2, %v6074_v49 }
 0x691   : >>> { %v2636_v5 = vpop.permute.xlu0 %2635  ;;  %v2814_v2 = vpop.permute.xlu1 %2813 }
 0x692   : >>> { %vm2654_vm4 = vcmp.ge.s32.totalorder %v9426_v63, %v2636_v5  ;;  %vm2858_vm6 = vcmp.ge.s32.totalorder %v9317_v57, %v2814_v2 }
 0x693   : >>> { %vm4697_vm5 = vmpackc.low %vm2655_vm3, %vm2654_vm4 }
 0x694   : >>> { %5013 = vmatmul.mubr.msk.bf16.gmra.mrb[12].mxu1 %vm4697_vm5, %v6074_v49 }
 0x695   : >>> { %v2811_v46 = vpop.permute.xlu0 %2810  ;;  %v2838_v43 = vpop.permute.xlu1 %2837 }
 0x696   : >>> { %vm2857_vm7 = vcmp.ge.s32.totalorder %v9316_v34, %v2811_v46  ;;  %vm2866_vm9 = vcmp.ge.s32.totalorder %v9419_v0, %v2838_v43  ;;  %v9432_v34 = vld [vmem:[#allocation97_spill] sm:$0xff] }
 0x697   : >>> { %vm4715_vm8 = vmpackc.low %vm2858_vm6, %vm2857_vm7 }
 0x698   : >>> { %5032 = vmatprep.mubr.msk.bf16.mxu0 %vm4715_vm8, %v6074_v49 }
 0x699   : >>> { %v2835_v55 = vpop.permute.xlu0 %2834  ;;  %v2820_v14 = vpop.permute.xlu1 %2819 }
 0x69a   : >>> { %vm2865_vm10 = vcmp.ge.s32.totalorder %v9420_v16, %v2835_v55  ;;  %vm2860_vm12 = vcmp.ge.s32.totalorder %v9318_v33, %v2820_v14 }
 0x69b   : >>> { %vm4723_vm11 = vmpackc.low %vm2866_vm9, %vm2865_vm10 }
 0x69c   : >>> { %5040 = vmatprep.mubr.msk.bf16.mxu1 %vm4723_vm11, %v6074_v49 }
 0x69d   : >>> { %v2817_v12 = vpop.permute.xlu0 %2816  ;;  %v2844_v5 = vpop.permute.xlu1 %2843 }
 0x69e   : >>> { %vm2859_vm13 = vcmp.ge.s32.totalorder %v9315_v29, %v2817_v12  ;;  %vm2868_vm15 = vcmp.ge.s32.totalorder %v9421_v20, %v2844_v5 }
 0x69f   : >>> { %vm4717_vm14 = vmpackc.low %vm2860_vm12, %vm2859_vm13 }
 0x6a0   : >>> { %5033 = vmatmul.mubr.msk.bf16.vlgmr.msra.gmra.mrb[16].mxu0 %vm4717_vm14, %v6074_v49 }
 0x6a1   : >>> { %v2841_v2 = vpop.permute.xlu0 %2840  ;;  %v2826_v46 = vpop.permute.xlu1 %2825 }
 0x6a2   : >>> { %vm2867_vm2 = vcmp.ge.s32.totalorder %v9422_v52, %v2841_v2  ;;  %vm2862_vm4 = vcmp.ge.s32.totalorder %v9320_v51, %v2826_v46  ;;  %v4749_v2 = vadd.s32 4294967295, %v7515_v37  ;;  %v4732_v46 = vadd.s32 4294967295, %v7740_v31 }
 0x6a3   : >>> { %vm4725_vm3 = vmpackc.low %vm2868_vm15, %vm2867_vm2 }
 0x6a4   : >>> { %5041 = vmatmul.mubr.msk.bf16.vlgmr.msra.gmra.mrb[16].mxu1 %vm4725_vm3, %v6074_v49 }
 0x6a5   : >>> { %v2823_v0 = vpop.permute.xlu0 %2822  ;;  %v2850_v16 = vpop.permute.xlu1 %2849 }
 0x6a6   : >>> { %vm2861_vm5 = vcmp.ge.s32.totalorder %v9319_v58, %v2823_v0  ;;  %vm2870_vm7 = vcmp.ge.s32.totalorder %v9423_v27, %v2850_v16  ;;  %v4731_v0 = vadd.s32 4294967295, %v7747_v60  ;;  %v9427_v16 = vld [vmem:[#allocation102_spill] sm:$0xff]  ;;  %v9431_v58 = vld [vmem:[#allocation101_spill] sm:$0xff] }
 0x6a7   : >>> { %vm4719_vm6 = vmpackc.low %vm2862_vm4, %vm2861_vm5 }
 0x6a8   : >>> { %5036 = vmatprep.mubr.msk.bf16.mxu0 %vm4719_vm6, %v6074_v49 }
 0x6a9   : >>> { %v2847_v43 = vpop.permute.xlu0 %2846  ;;  %v2832_v55 = vpop.permute.xlu1 %2831 }
 0x6aa   : >>> { %vm2869_vm8 = vcmp.ge.s32.totalorder %v9424_v53, %v2847_v43  ;;  %vm2864_vm10 = vcmp.ge.s32.totalorder %v9322_v41, %v2832_v55  ;;  %v4747_v43 = vadd.s32 4294967295, %v9427_v16  ;;  %v4734_v55 = vadd.s32 4294967295, %v7771_v11  ;;  %v9435_v11 = vld [vmem:[#allocation103_spill] sm:$0xff] }
 0x6ab   : >>> { %vm4727_vm9 = vmpackc.low %vm2870_vm7, %vm2869_vm8 }
 0x6ac   : >>> { %5044 = vmatprep.mubr.msk.bf16.mxu1 %vm4727_vm9, %v6074_v49 }
 0x6ad   : >>> { %v2829_v20 = vpop.permute.xlu0 %2828  ;;  %v2856_v52 = vpop.permute.xlu1 %2855 }
 0x6ae   : >>> { %vm2863_vm11 = vcmp.ge.s32.totalorder %v9321_v45, %v2829_v20  ;;  %vm2872_vm13 = vcmp.ge.s32.totalorder %v9425_v19, %v2856_v52  ;;  %v4733_v19 = vadd.s32 4294967295, %v7829_v59  ;;  %v9428_v20 = vld [vmem:[#allocation105_spill] sm:$0xff]  ;;  %v9430_v45 = vld [vmem:[#allocation95_spill] sm:$0xff] }
 0x6af   : >>> { %vm4721_vm12 = vmpackc.low %vm2864_vm10, %vm2863_vm11  ;;  %v4750_v52 = vadd.s32 4294967295, %v9428_v20 }
 0x6b0   : >>> { %5037 = vmatmul.mubr.msk.bf16.gmra.mrb[20].mxu0 %vm4721_vm12, %v6074_v49 }
 0x6b1   : >>> { %v2853_v14 = vpop.permute.xlu0 %2852 }
 0x6b2   : >>> { %vm2871_vm14 = vcmp.ge.s32.totalorder %v9426_v63, %v2853_v14 }
 0x6b3   : >>> { %vm4729_vm15 = vmpackc.low %vm2872_vm13, %vm2871_vm14 }
 0x6b4   : >>> { %5045 = vmatmul.mubr.msk.bf16.gmra.mrb[20].mxu1 %vm4729_vm15, %v6074_v49  ;;  %v9429_v49 = vld [vmem:[#allocation104_spill] sm:$0xff] }
 0x6b5   : >>> { %v4748_v14 = vadd.s32 4294967295, %v9429_v49 }
 0x72a   : >>> { %v5002_v27 = vpop.f32.mrb[0].mxu1 }
 0x72b   : >>> { %v2730_v53 = vpop.f32.mrb[1].mxu1  ;;  %vm2795_vm2 = vcmp.ge.f32.partialorder %v5002_v27, 99.0 }
 0x72c   : >>> { %v5003_v12 = vpop.f32.mrb[2].mxu1  ;;  %vm2793_vm3 = vcmp.ge.f32.partialorder %v2730_v53, 99.0  ;;  %v9440_v53 = vld [vmem:[#allocation110_spill] sm:$0xff] }
 0x72d   : >>> { %v2733_v5 = vpop.f32.mrb[3].mxu1  ;;  %vm2796_vm4 = vcmp.ge.f32.partialorder %v5003_v12, 99.0 }
 0x72e   : >>> { %vm2794_vm6 = vcmp.ge.f32.partialorder %v2733_v5, 99.0  ;;  %v4735_v5 = vadd.s32 4294967295, %v7810_v26 }
 0x732   : >>> { %v4970_v63 = vpop.f32.mrb[0].mxu0 }
 0x733   : >>> { %vm2578_vm5 = vcmp.ge.f32.partialorder %v4970_v63, 99.0  ;;  %v2513_v41 = vpop.f32.mrb[1].mxu0  ;;  %v9434_v63 = vld [vmem:[#allocation94_spill] sm:$0xff] }
 0x734   : >>> { %v3028_v51 = vsel %vm2578_vm5, %v7515_v37, %v9430_v45  ;;  %v3108_v33 = vsel %vm2578_vm5, %v9431_v58, %v4749_v2  ;;  %vm2576_vm7 = vcmp.ge.f32.partialorder %v2513_v41, 99.0  ;;  %v4971_v57 = vpop.f32.mrb[2].mxu0  ;;  %v9436_v58 = vld [vmem:[#allocation96_spill] sm:$0xff] }
 0x735   : >>> { %v3026_v29 = vsel %vm2576_vm7, %v9427_v16, %v9432_v34  ;;  %v3106_v9 = vsel %vm2576_vm7, %v9433_v21, %v4747_v43  ;;  %vm2579_vm8 = vcmp.ge.f32.partialorder %v4971_v57, 99.0  ;;  %v2516_v17 = vpop.f32.mrb[3].mxu0  ;;  %v8038_v3 = vsel %vm2795_vm2, %v7476_v4, %v3028_v51  ;;  %v9437_v41 = vld [vmem:[#allocation100_spill] sm:$0xff] }
 0x736   : >>> { %v3029_v31 = vsel %vm2579_vm8, %v9428_v20, %v9434_v63  ;;  %v3109_v37 = vsel %vm2579_vm8, %v9435_v11, %v4750_v52  ;;  %vm2577_vm9 = vcmp.ge.f32.partialorder %v2516_v17, 99.0  ;;  %v8044_v45 = vsel %vm2795_vm2, %v4733_v19, %v3108_v33  ;;  %v9438_v33 = vld [vmem:[#allocation98_spill] sm:$0xff]  ;;  %v9443_v20 = vld [vmem:[#allocation91_spill] sm:$0xff] }
 0x737   : >>> { %v3027_v34 = vsel %vm2577_vm9, %v9429_v49, %v9436_v58  ;;  %v3107_v21 = vsel %vm2577_vm9, %v9437_v41, %v4748_v14  ;;  %v8051_v57 = vsel %vm2793_vm3, %v7450_v39, %v3026_v29  ;;  %v8054_v51 = vsel %vm2793_vm3, %v4731_v0, %v3106_v9  ;;  %v9439_v29 = vld [vmem:[#allocation114_spill] sm:$0xff]  ;;  %v9444_v49 = vld [vmem:[#allocation111_spill] sm:$0xff]  ;;  %v9445_v58 = vld [vmem:[#allocation93_spill] sm:$0xff] }
 0x738   : >>> { %v8058_v4 = vsel %vm2796_vm4, %v7494_v1, %v3029_v31  ;;  %v8061_v17 = vsel %vm2796_vm4, %v4734_v55, %v3109_v37  ;;  %v8065_v11 = vsel %vm2794_vm6, %v9438_v33, %v3027_v34  ;;  %v8068_v27 = vsel %vm2794_vm6, %v4732_v46, %v3107_v21  ;;  %v9441_v31 = vld [vmem:[#allocation112_spill] sm:$0xff]  ;;  %v9446_v41 = vld [vmem:[#allocation107_spill] sm:$0xff]  ;;  %v9447_v33 = vld [vmem:[#allocation90_spill] sm:$0xff] }
 0x739   : >>> { %v4753_v39 = vadd.s32 4294967295, %v9439_v29  ;;  %v4751_v0 = vadd.s32 4294967295, %v9440_v53  ;;  %v4754_v12 = vadd.s32 4294967295, %v9441_v31  ;;  %v4737_v16 = vadd.s32 4294967295, %v7843_v54  ;;  %v9442_v55 = vld [vmem:[#allocation108_spill] sm:$0xff] }
 0x73a   : >>> { %v4752_v19 = vadd.s32 4294967295, %v9442_v55  ;;  %v4738_v46 = vadd.s32 4294967295, %v7825_v36  ;;  %v4736_v37 = vadd.s32 4294967295, %v7795_v30 }
 0x744   : >>> { %v4974_v2 = vpop.f32.mrb[4].mxu0 }
 0x745   : >>> { %vm2582_vm10 = vcmp.ge.f32.partialorder %v4974_v2, 99.0  ;;  %v2529_v9 = vpop.f32.mrb[5].mxu0 }
 0x746   : >>> { %vm2580_vm11 = vcmp.ge.f32.partialorder %v2529_v9, 99.0  ;;  %v4975_v1 = vpop.f32.mrb[6].mxu0  ;;  %v3032_v52 = vsel %vm2582_vm10, %v9439_v29, %v9443_v20  ;;  %v3112_v14 = vsel %vm2582_vm10, %v9444_v49, %v4753_v39  ;;  %v9449_v49 = vld [vmem:[#allocation92_spill] sm:$0xff] }
 0x747   : >>> { %vm2583_vm12 = vcmp.ge.f32.partialorder %v4975_v1, 99.0  ;;  %v2532_v43 = vpop.f32.mrb[7].mxu0  ;;  %v3030_v34 = vsel %vm2580_vm11, %v9440_v53, %v9445_v58  ;;  %v3110_v21 = vsel %vm2580_vm11, %v9446_v41, %v4751_v0  ;;  %v9448_v1 = vld [vmem:[#allocation109_spill] sm:$0xff]  ;;  %v9455_v41 = vld [vmem:[#allocation118_spill] sm:$0xff] }
 0x748   : >>> { %vm2581_vm13 = vcmp.ge.f32.partialorder %v2532_v43, 99.0  ;;  %v5006_v63 = vpop.f32.mrb[4].mxu1  ;;  %v3033_v2 = vsel %vm2583_vm12, %v9441_v31, %v9447_v33  ;;  %v3113_v36 = vsel %vm2583_vm12, %v9448_v1, %v4754_v12  ;;  %v9457_v33 = vld [vmem:[#allocation116_spill] sm:$0xff] }
 0x749   : >>> { %vm2799_vm14 = vcmp.ge.f32.partialorder %v5006_v63, 99.0  ;;  %v2746_v9 = vpop.f32.mrb[5].mxu1  ;;  %v3031_v53 = vsel %vm2581_vm13, %v9442_v55, %v9449_v49  ;;  %v9450_v63 = vld [vmem:[#allocation106_spill] sm:$0xff] }
 0x74a   : >>> { %v8088_v29 = vsel %vm2799_vm14, %v7568_v48, %v3032_v52  ;;  %v8090_v39 = vsel %vm2799_vm14, %v4737_v16, %v3112_v14  ;;  %vm2797_vm15 = vcmp.ge.f32.partialorder %v2746_v9, 99.0  ;;  %v5007_v20 = vpop.f32.mrb[6].mxu1  ;;  %v3111_v12 = vsel %vm2581_vm13, %v9450_v63, %v4752_v19  ;;  %v9454_v14 = vld [vmem:[#allocation122_spill] sm:$0xff]  ;;  %v9456_v19 = vld [vmem:[#allocation120_spill] sm:$0xff]  ;;  %v9458_v9 = vld [vmem:[#allocation87_spill] sm:$0xff] }
 0x74b   : >>> { %v8096_v0 = vsel %vm2797_vm15, %v7540_v62, %v3030_v34  ;;  %v8098_v58 = vsel %vm2797_vm15, %v4735_v5, %v3110_v21  ;;  %vm2800_vm2 = vcmp.ge.f32.partialorder %v5007_v20, 99.0  ;;  %v2749_v31 = vpop.f32.mrb[7].mxu1  ;;  %v4757_v5 = vadd.s32 4294967295, %v9454_v14  ;;  %v9459_v20 = vld [vmem:[#allocation119_spill] sm:$0xff]  ;;  %v9460_v63 = vld [vmem:[#allocation89_spill] sm:$0xff] }
 0x74c   : >>> { %v8103_v48 = vsel %vm2800_vm2, %v7558_v23, %v3033_v2  ;;  %v8105_v16 = vsel %vm2800_vm2, %v4738_v46, %v3113_v36  ;;  %vm2798_vm3 = vcmp.ge.f32.partialorder %v2749_v31, 99.0  ;;  %v4755_v21 = vadd.s32 4294967295, %v9455_v41 }
 0x74d   : >>> { %9451 = vst [vmem:[#allocation102_spill] sm:$0xff] %v8105_v16  ;;  %v8108_v52 = vsel %vm2798_vm3, %v7517_v40, %v3031_v53  ;;  %v8110_v55 = vsel %vm2798_vm3, %v4736_v37, %v3111_v12  ;;  %v4758_v23 = vadd.s32 4294967295, %v9456_v19  ;;  %v4741_v36 = vadd.s32 4294967295, %v7853_v6 }
 0x74e   : >>> { %9452 = vst [vmem:[#allocation105_spill] sm:$0xff] %v8108_v52  ;;  %9453 = vst [vmem:[#allocation104_spill] sm:$0xff] %v8110_v55  ;;  %v4756_v40 = vadd.s32 4294967295, %v9457_v33  ;;  %v4739_v37 = vadd.s32 4294967295, %v7797_v56  ;;  %v4742_v2 = vadd.s32 4294967295, %v7839_v47  ;;  %v4740_v31 = vadd.s32 4294967295, %v7791_v42 }
 0x74f   : >>> { %v9463_v52 = vld [vmem:[#allocation117_spill] sm:$0xff] }
 0x753   : >>> { %v4978_v62 = vpop.f32.mrb[8].mxu0 }
 0x754   : >>> { %vm2586_vm4 = vcmp.ge.f32.partialorder %v4978_v62, 99.0  ;;  %v2545_v34 = vpop.f32.mrb[9].mxu0  ;;  %v9461_v62 = vld [vmem:[#allocation115_spill] sm:$0xff] }
 0x755   : >>> { %vm2584_vm5 = vcmp.ge.f32.partialorder %v2545_v34, 99.0  ;;  %v4979_v43 = vpop.f32.mrb[10].mxu0  ;;  %v3036_v1 = vsel %vm2586_vm4, %v9454_v14, %v9458_v9  ;;  %v3116_v49 = vsel %vm2586_vm4, %v9459_v20, %v4757_v5  ;;  %v9464_v20 = vld [vmem:[#allocation88_spill] sm:$0xff] }
 0x756   : >>> { %vm2587_vm6 = vcmp.ge.f32.partialorder %v4979_v43, 99.0  ;;  %v2548_v46 = vpop.f32.mrb[11].mxu0  ;;  %v3034_v12 = vsel %vm2584_vm5, %v9455_v41, %v9460_v63  ;;  %v3114_v34 = vsel %vm2584_vm5, %v9461_v62, %v4755_v21  ;;  %v9462_v43 = vld [vmem:[#allocation86_spill] sm:$0xff] }
 0x757   : >>> { %vm2585_vm7 = vcmp.ge.f32.partialorder %v2548_v46, 99.0  ;;  %v5010_v53 = vpop.f32.mrb[8].mxu1  ;;  %v3037_v55 = vsel %vm2587_vm6, %v9456_v19, %v9462_v43  ;;  %v3117_v16 = vsel %vm2587_vm6, %v9463_v52, %v4758_v23  ;;  %v4744_v43 = vadd.s32 4294967295, %v7869_v28 }
 0x758   : >>> { %vm2803_vm8 = vcmp.ge.f32.partialorder %v5010_v53, 99.0  ;;  %v2762_v30 = vpop.f32.mrb[9].mxu1  ;;  %v3035_v41 = vsel %vm2585_vm7, %v9457_v33, %v9464_v20  ;;  %v9465_v53 = vld [vmem:[#allocation113_spill] sm:$0xff]  ;;  %v4761_v33 = vadd.s32 4294967295, %v7757_v7 }
 0x759   : >>> { %v8130_v14 = vsel %vm2803_vm8, %v7644_v13, %v3036_v1  ;;  %v8132_v5 = vsel %vm2803_vm8, %v4741_v36, %v3116_v49  ;;  %vm2801_vm9 = vcmp.ge.f32.partialorder %v2762_v30, 99.0  ;;  %v5011_v9 = vpop.f32.mrb[10].mxu1  ;;  %v3115_v52 = vsel %vm2585_vm7, %v9465_v53, %v4756_v40  ;;  %v9466_v40 = vld [vmem:[#allocation124_spill] sm:$0xff]  ;;  %v9470_v53 = vld [vmem:[#allocation82_spill] sm:$0xff] }
 0x75a   : >>> { %v8138_v21 = vsel %vm2801_vm9, %v7613_v22, %v3034_v12  ;;  %v8140_v63 = vsel %vm2801_vm9, %v4739_v37, %v3114_v34  ;;  %vm2804_vm10 = vcmp.ge.f32.partialorder %v5011_v9, 99.0  ;;  %v2765_v19 = vpop.f32.mrb[11].mxu1  ;;  %v4759_v1 = vadd.s32 4294967295, %v7732_v44  ;;  %v9468_v9 = vld [vmem:[#allocation85_spill] sm:$0xff] }
 0x75b   : >>> { %v8145_v13 = vsel %vm2804_vm10, %v7633_v50, %v3037_v55  ;;  %v8147_v23 = vsel %vm2804_vm10, %v4742_v2, %v3117_v16  ;;  %vm2802_vm11 = vcmp.ge.f32.partialorder %v2765_v19, 99.0  ;;  %v4762_v50 = vadd.s32 4294967295, %v7749_v10 }
 0x75c   : >>> { %v8150_v30 = vsel %vm2802_vm11, %v7592_v25, %v3035_v41  ;;  %v8152_v36 = vsel %vm2802_vm11, %v4740_v31, %v3115_v52  ;;  %v4745_v16 = vadd.s32 4294967295, %v7905_v8  ;;  %v4760_v25 = vadd.s32 4294967295, %v9466_v40  ;;  %v9467_v31 = vld [vmem:[#allocation83_spill] sm:$0xff] }
 0x75d   : >>> { %v4743_v2 = vadd.s32 4294967295, %v7877_v18  ;;  %v4746_v49 = vadd.s32 4294967295, %v7893_v38  ;;  %v9469_v41 = vld [vmem:[#allocation123_spill] sm:$0xff] }
 0x763   : >>> { %v4982_v22 = vpop.f32.mrb[12].mxu0 }
 0x764   : >>> { %vm2590_vm12 = vcmp.ge.f32.partialorder %v4982_v22, 99.0  ;;  %v2561_v37 = vpop.f32.mrb[13].mxu0 }
 0x765   : >>> { %vm2588_vm13 = vcmp.ge.f32.partialorder %v2561_v37, 99.0  ;;  %v4983_v46 = vpop.f32.mrb[14].mxu0  ;;  %v3040_v12 = vsel %vm2590_vm12, %v7757_v7, %v9467_v31  ;;  %v3120_v62 = vsel %vm2590_vm12, %v7738_v24, %v4761_v33  ;;  %v9471_v37 = vld [vmem:[#allocation125_spill] sm:$0xff]  ;;  %v9472_v31 = vld [vmem:[#allocation84_spill] sm:$0xff] }
 0x766   : >>> { %vm2591_vm14 = vcmp.ge.f32.partialorder %v4983_v46, 99.0  ;;  %v2564_v55 = vpop.f32.mrb[15].mxu0  ;;  %v3038_v20 = vsel %vm2588_vm13, %v7732_v44, %v9468_v9  ;;  %v3118_v19 = vsel %vm2588_vm13, %v9469_v41, %v4759_v1 }
 0x767   : >>> { %vm2589_vm15 = vcmp.ge.f32.partialorder %v2564_v55, 99.0  ;;  %v5014_v34 = vpop.f32.mrb[12].mxu1  ;;  %v3041_v52 = vsel %vm2591_vm14, %v7749_v10, %v9470_v53  ;;  %v3121_v46 = vsel %vm2591_vm14, %v9471_v37, %v4762_v50  ;;  %v9474_v55 = vld [vmem:[#allocation79_spill] sm:$0xff] }
 0x768   : >>> { %vm2807_vm2 = vcmp.ge.f32.partialorder %v5014_v34, 99.0  ;;  %v2778_v22 = vpop.f32.mrb[13].mxu1  ;;  %v3039_v44 = vsel %vm2589_vm15, %v9466_v40, %v9472_v31  ;;  %v9473_v34 = vld [vmem:[#allocation121_spill] sm:$0xff]  ;;  %v9484_v53 = vld [vmem:[#allocation71_spill] sm:$0xff] }
 0x769   : >>> { %v8172_v7 = vsel %vm2807_vm2, %v7725_v32, %v3040_v12  ;;  %v8174_v24 = vsel %vm2807_vm2, %v4745_v16, %v3120_v62  ;;  %vm2805_vm3 = vcmp.ge.f32.partialorder %v2778_v22, 99.0  ;;  %v5015_v33 = vpop.f32.mrb[14].mxu1  ;;  %v3119_v50 = vsel %vm2589_vm15, %v9473_v34, %v4760_v25 }
 0x76a   : >>> { %v8180_v1 = vsel %vm2805_vm3, %v7689_v35, %v3038_v20  ;;  %v8182_v9 = vsel %vm2805_vm3, %v4743_v2, %v3118_v19  ;;  %vm2808_vm4 = vcmp.ge.f32.partialorder %v5015_v33, 99.0  ;;  %v2781_v10 = vpop.f32.mrb[15].mxu1  ;;  %v9477_v20 = vld [vmem:[#allocation127_spill] sm:$0xff]  ;;  %v9480_v19 = vld [vmem:[#allocation126_spill] sm:$0xff] }
 0x76b   : >>> { %v8187_v32 = vsel %vm2808_vm4, %v7709_v15, %v3041_v52  ;;  %v8189_v16 = vsel %vm2808_vm4, %v4746_v49, %v3121_v46  ;;  %vm2806_vm5 = vcmp.ge.f32.partialorder %v2781_v10, 99.0  ;;  %v9486_v52 = vld [vmem:[#allocation73_spill] sm:$0xff] }
 0x76c   : >>> { %v8192_v12 = vsel %vm2806_vm5, %v7668_v61, %v3039_v44  ;;  %v8194_v40 = vsel %vm2806_vm5, %v4744_v43, %v3119_v50  ;;  %v9476_v61 = vld [vmem:[#allocation81_spill] sm:$0xff] }
 0x773   : >>> { %v5034_v35 = vpop.f32.mrb[16].mxu0 }
 0x774   : >>> { %vm3012_vm6 = vcmp.ge.f32.partialorder %v5034_v35, 99.0  ;;  %v2947_v2 = vpop.f32.mrb[17].mxu0  ;;  %v9497_v35 = vld [vmem:[#allocation128_spill] sm:$0xff] }
 0x775   : >>> { %v8198_v62 = vsel %vm3012_vm6, %v7829_v59, %v8038_v3   ;;  %v8202_v25 = vsel %vm3012_vm6, %v9474_v55, %v8044_v45   ;;  %vm3010_vm7 = vcmp.ge.f32.partialorder %v2947_v2, 99.0  ;;  %v5035_v15 = vpop.f32.mrb[18].mxu0  ;;  %v9479_v3 = vld [vmem:[#allocation78_spill] sm:$0xff] }
 0x776   : >>> { %v8206_v49 = vsel %vm3010_vm7, %v7747_v60, %v8051_v57   ;;  %v8210_v2 = vsel %vm3010_vm7, %v9476_v61, %v8054_v51   ;;  %vm3013_vm8 = vcmp.ge.f32.partialorder %v5035_v15, 99.0  ;;  %v2950_v43 = vpop.f32.mrb[19].mxu0  ;;  %v9482_v60 = vld [vmem:[#allocation80_spill] sm:$0xff] }
 0x777   : >>> { %v9475_v41 = vmov %v8206_v49  ;;  %v8214_v50 = vsel %vm3013_vm8, %v9477_v20, %v8058_v4   ;;  %v8218_v55 = vsel %vm3013_vm8, %v9479_v3, %v8061_v17   ;;  %vm3011_vm9 = vcmp.ge.f32.partialorder %v2950_v43, 99.0  ;;  %v5042_v45 = vpop.f32.mrb[16].mxu1 }
 0x778   : >>> { %v9478_v59 = vmov %v8214_v50  ;;  %v8222_v44 = vsel %vm3011_vm9, %v9480_v19, %v8065_v11   ;;  %v8226_v49 = vsel %vm3011_vm9, %v9482_v60, %v8068_v27   ;;  %vm3020_vm10 = vcmp.ge.f32.partialorder %v5042_v45, 99.0  ;;  %v2979_v51 = vpop.f32.mrb[17].mxu1  ;;  %v9496_v50 = vld [vmem:[#allocation105_spill] sm:$0xff]  ;;  %v9541_v55 = vld [vmem:[#allocation20_spill] sm:$0xff] (%p8303_p1) }
 0x779   : >>> { %v9481_v57 = vmov %v8222_v44  ;;  %v8230_v61 = vsel %vm3020_vm10, %v7853_v6, %v8130_v14   ;;  %v3148_v3 = vsel %vm3020_vm10, %v9484_v53, %v8132_v5   ;;  %vm3018_vm11 = vcmp.ge.f32.partialorder %v2979_v51, 99.0  ;;  %v5043_v17 = vpop.f32.mrb[18].mxu1  ;;  %v9488_v6 = vld [vmem:[#allocation70_spill] sm:$0xff]  ;;  %v9489_v5 = vld [vmem:[#allocation72_spill] sm:$0xff] }
 0x77a   : >>> { %v9483_v4 = vmov %v8230_v61  ;;  %v8236_v60 = vsel %vm3018_vm11, %v7797_v56, %v8138_v21   ;;  %v3146_v22 = vsel %vm3018_vm11, %v9486_v52, %v8140_v63   ;;  %vm3021_vm12 = vcmp.ge.f32.partialorder %v5043_v17, 99.0  ;;  %v2982_v27 = vpop.f32.mrb[19].mxu1  ;;  %v9500_v61 = vld [vmem:[#allocation76_spill] sm:$0xff] }
 0x77b   : >>> { %v9485_v11 = vmov %v8236_v60  ;;  %v8242_v56 = vsel %vm3021_vm12, %v7839_v47, %v8145_v13   ;;  %v3149_v46 = vsel %vm3021_vm12, %v9488_v6, %v8147_v23   ;;  %vm3019_vm13 = vcmp.ge.f32.partialorder %v2982_v27, 99.0  ;;  %v9492_v23 = vld [vmem:[#allocation77_spill] sm:$0xff]  ;;  %v9547_v27 = vld [vmem:[#allocation27_spill] sm:$0xff] (%p8303_p1) }
 0x77c   : >>> { %v9487_v37 = vmov %v8242_v56  ;;  %v8248_v14 = vsel %vm3019_vm13, %v7791_v42, %v8150_v30   ;;  %v3147_v33 = vsel %vm3019_vm13, %v9489_v5, %v8152_v36   ;;  %v9490_v56 = vld [vmem:[#allocation75_spill] sm:$0xff]  ;;  %v9493_v36 = vld [vmem:[#allocation129_spill] sm:$0xff]  ;;  %v9528_v6 = vmov %v8198_v62  ;;  %v9538_v46 = vld [vmem:[#allocation16_spill] sm:$0xff] (%p8303_p1) }
 0x783   : >>> { %v5038_v21 = vpop.f32.mrb[20].mxu0 }
 0x784   : >>> { %vm3016_vm14 = vcmp.ge.f32.partialorder %v5038_v21, 99.0  ;;  %v2963_v63 = vpop.f32.mrb[21].mxu0 }
 0x785   : >>> { %v8254_v31 = vsel %vm3016_vm14, %v7843_v54, %v8088_v29   ;;  %v3144_v17 = vsel %vm3016_vm14, %v9490_v56, %v8090_v39   ;;  %vm3014_vm15 = vcmp.ge.f32.partialorder %v2963_v63, 99.0  ;;  %v5039_v47 = vpop.f32.mrb[22].mxu0  ;;  %v9494_v54 = vld [vmem:[#allocation102_spill] sm:$0xff]  ;;  %v9519_v56 = vmov %v9487_v37 }
 0x786   : >>> { %v8260_v13 = vsel %vm3014_vm15, %v7810_v26, %v8096_v0   ;;  %v3142_v44 = vsel %vm3014_vm15, %v9492_v23, %v8098_v58   ;;  %vm3017_vm2 = vcmp.ge.f32.partialorder %v5039_v47, 99.0  ;;  %v2966_v30 = vpop.f32.mrb[23].mxu0  ;;  %v9495_v29 = vld [vmem:[#allocation74_spill] sm:$0xff]  ;;  %v9499_v0 = vld [vmem:[#allocation104_spill] sm:$0xff]  ;;  %v9514_v47 = vmov %v8202_v25 }
 0x787   : >>> { %v9491_v42 = vmov %v8260_v13  ;;  %v8266_v10 = vsel %vm3017_vm2, %v9493_v36, %v8103_v48   ;;  %v3145_v34 = vsel %vm3017_vm2, %v9495_v29, %v9494_v54   ;;  %vm3015_vm3 = vcmp.ge.f32.partialorder %v2966_v30, 99.0  ;;  %v5046_v39 = vpop.f32.mrb[20].mxu1  ;;  %v9502_v48 = vld [vmem:[#allocation67_spill] sm:$0xff]  ;;  %v9552_v56 = vld [vmem:[#allocation46_spill] sm:$0xff] (%p8303_p1)  ;;  %v9554_v23 = vld [vmem:[#allocation28_spill] sm:$0xff] (%p8303_p1) }
 0x788   : >>> { %v8272_v26 = vsel %vm3015_vm3, %v9497_v35, %v9496_v50   ;;  %v3143_v5 = vsel %vm3015_vm3, %v9500_v61, %v9499_v0   ;;  %vm3024_vm4 = vcmp.ge.f32.partialorder %v5046_v39, 99.0  ;;  %v2995_v58 = vpop.f32.mrb[21].mxu1  ;;  %v9511_v30 = vmov %v3146_v22  ;;  %v9557_v29 = vld [vmem:[#allocation38_spill] sm:$0xff] (%p8303_p1)  ;;  %v9558_v39 = vld [vmem:[#allocation24_spill] sm:$0xff] (%p8303_p1) }
 0x789   : >>> { %v9498_v15 = vmov %v8272_v26  ;;  %v8278_v43 = vsel %vm3024_vm4, %v7905_v8, %v8172_v7   ;;  %v3152_v20 = vsel %vm3024_vm4, %v9502_v48, %v8174_v24   ;;  %vm3022_vm5 = vcmp.ge.f32.partialorder %v2995_v58, 99.0  ;;  %v5047_v19 = vpop.f32.mrb[22].mxu1  ;;  %v9504_v26 = vld [vmem:[#allocation69_spill] sm:$0xff]  ;;  %v9505_v8 = vld [vmem:[#allocation66_spill] sm:$0xff]  ;;  %v9507_v24 = vld [vmem:[#allocation68_spill] sm:$0xff] }
 0x78a   : >>> { %v9501_v45 = vmov %v8278_v43  ;;  %v8284_v0 = vsel %vm3022_vm5, %v7877_v18, %v8180_v1   ;;  %v3150_v21 = vsel %vm3022_vm5, %v9504_v26, %v8182_v9   ;;  %vm3025_vm6 = vcmp.ge.f32.partialorder %v5047_v19, 99.0  ;;  %v2998_v60 = vpop.f32.mrb[23].mxu1  ;;  %v9532_v1 = vld [vmem:[#allocation10_spill] sm:$0xff] (%p8303_p1)  ;;  %v9561_v58 = vld [vmem:[#allocation35_spill] sm:$0xff] (%p8303_p1) }
 0x78b   : >>> { %v9503_v51 = vmov %v8284_v0  ;;  %v8290_v53 = vsel %vm3025_vm6, %v7893_v38, %v8187_v32   ;;  %v3153_v63 = vsel %vm3025_vm6, %v9505_v8, %v8189_v16   ;;  %vm3023_vm7 = vcmp.ge.f32.partialorder %v2998_v60, 99.0  ;;  %2053 = sbr.rel (!%p8303_p1) target bundleno = 1471 (0x5bf), region = 141  ;;  %5048 = vmatprep.subr.bf16.mxu0 (%p8303_p1), %v9532_v1  ;;  %v9533_v16 = vld [vmem:[#allocation11_spill] sm:$0xff] (%p8303_p1) }
 0x78c   : >>> { %v8296_v18 = vsel %vm3023_vm7, %v7869_v28, %v8192_v12   ;;  %v3151_v19 = vsel %vm3023_vm7, %v9507_v24, %v8194_v40   ;;  %v9509_v9 = vmov %v3152_v20  ;;  %v9510_v28 = vmov %v3147_v33  ;;  %5049 = vmatpush3.bf16.msra.mxu0 (%p8303_p1), %v9532_v1  ;;  %v9534_v40 = vld [vmem:[#allocation12_spill] sm:$0xff] (%p8303_p1)  ;;  %v9550_v33 = vld [vmem:[#allocation29_spill] sm:$0xff] (%p8303_p1) }
 0x78d   : >>> { %v9506_v7 = vmov %v8296_v18  ;;  %v9512_v8 = vmov %v3145_v34  ;;  %v9513_v12 = vmov %v3142_v44  ;;  %v9515_v20 = vmov %v8290_v53  ;;  %5050 = vmatprep.subr.bf16.mxu0 (%p8303_p1), %v9533_v16  ;;  %v9535_v28 = vld [vmem:[#allocation13_spill] sm:$0xff] (%p8303_p1) }
 0x78e   : >>> { %v9516_v43 = vmov %v9501_v45  ;;  %v9517_v18 = vmov %v9506_v7  ;;  %v9518_v0 = vmov %v9503_v51  ;;  %v9520_v61 = vmov %v9483_v4  ;;  %v9539_v9 = vld [vmem:[#allocation17_spill] sm:$0xff] (%p8303_p1) }
 0x78f   : >>> { %v9521_v36 = vmov %v8248_v14  ;;  %v9522_v60 = vmov %v9485_v11  ;;  %v9523_v38 = vmov %v8266_v10  ;;  %v9524_v48 = vmov %v8254_v31  ;;  %v9536_v18 = vld [vmem:[#allocation14_spill] sm:$0xff] (%p8303_p1)  ;;  %v9560_v0 = vld [vmem:[#allocation41_spill] sm:$0xff] (%p8303_p1) }
 0x790   : >>> { %v9525_v26 = vmov %v9498_v15  ;;  %v9526_v25 = vmov %v9491_v42  ;;  %v9527_v50 = vmov %v9478_v59  ;;  %v9529_v44 = vmov %v9481_v57  ;;  %5051 = vmatpush3.bf16.msra.mxu0 (%p8303_p1), %v9533_v16  ;;  %v9537_v38 = vld [vmem:[#allocation15_spill] sm:$0xff] (%p8303_p1)  ;;  %v9555_v36 = vld [vmem:[#allocation21_spill] sm:$0xff] (%p8303_p1)  ;;  %v9571_v16 = vld [vmem:[#allocation48_spill] sm:$0xff] (%p8303_p1) }
 0x791   : >>> { %v9530_v13 = vmov %v9475_v41  ;;  %v6075_v32 = vmov (%p8303_p1), 0   ;;  %5052 = vmatprep.subr.bf16.mxu0 (%p8303_p1), %v9534_v40  ;;  %v9542_v25 = vld [vmem:[#allocation36_spill] sm:$0xff] (%p8303_p1)  ;;  %v9562_v48 = vld [vmem:[#allocation23_spill] sm:$0xff] (%p8303_p1) }
 0x792   : >> { %5612 = vset.pattern.permute.xlu1 %v6075_v32  ;;  %5611 = vset.pattern.permute.xlu0 %v6075_v32  ;;  %v9553_v13 = vld [vmem:[#allocation42_spill] sm:$0xff]  ;;  %v9565_v26 = vld [vmem:[#allocation39_spill] sm:$0xff] }
 0x793   : >> { %3161 = vperm.xlu1 %5612, %v8198_v62   ;;  %3155 = vperm.xlu0 %5611, %v9475_v41   ;;  %v9540_v62 = vld [vmem:[#allocation18_spill] sm:$0xff] }
 0x794   : >> { %5053 = vmatpush3.bf16.msra.mxu0 %v9534_v40  ;;  %v9570_v32 = vld [vmem:[#allocation30_spill] sm:$0xff] }
 0x795   : >> { %5054 = vmatprep.subr.bf16.mxu0 %v9535_v28 }
 0x797   : >> { %3164 = vperm.xlu1 %5612, %v9478_v59   ;;  %3158 = vperm.xlu0 %5611, %v9481_v57   ;;  %v9543_v59 = vld [vmem:[#allocation34_spill] sm:$0xff]  ;;  %v9544_v57 = vld [vmem:[#allocation25_spill] sm:$0xff] }
 0x798   : >> { %5055 = vmatpush3.bf16.msra.mxu0 %v9535_v28  ;;  %v9572_v28 = vld [vmem:[#allocation47_spill] sm:$0xff] }
 0x799   : >> { %5056 = vmatprep.subr.bf16.mxu0 %v9536_v18 }
 0x79b   : >> { %3170 = vperm.xlu1 %5612, %v9498_v15   ;;  %3167 = vperm.xlu0 %5611, %v9491_v42   ;;  %v9559_v15 = vld [vmem:[#allocation19_spill] sm:$0xff] }
 0x79c   : >> { %5057 = vmatpush3.bf16.msra.mxu0 %v9536_v18 }
 0x79d   : >> { %5058 = vmatprep.subr.bf16.mxu0 %v9537_v38 }
 0x79f   : >> { %3176 = vperm.xlu1 %5612, %v8266_v10   ;;  %3173 = vperm.xlu0 %5611, %v8254_v31   ;;  %v9551_v31 = vld [vmem:[#allocation26_spill] sm:$0xff]  ;;  %v9556_v10 = vld [vmem:[#allocation44_spill] sm:$0xff] }
 0x7a0   : >> { %5059 = vmatpush3.bf16.msra.mxu0 %v9537_v38  ;;  %v9573_v38 = vld [vmem:[#allocation32_spill] sm:$0xff] }
 0x7a1   : >> { %5060 = vmatprep.subr.bf16.mxu0 %v9538_v46 }
 0x7a3   : >> { %3182 = vperm.xlu1 %5612, %v8248_v14   ;;  %3179 = vperm.xlu0 %5611, %v9485_v11   ;;  %v9546_v11 = vld [vmem:[#allocation22_spill] sm:$0xff]  ;;  %v9549_v14 = vld [vmem:[#allocation43_spill] sm:$0xff] }
 0x7a4   : >> { %5061 = vmatpush3.bf16.msra.mxu0 %v9538_v46  ;;  %v9574_v46 = vld [vmem:[#allocation49_spill] sm:$0xff] }
 0x7a5   : >> { %5062 = vmatprep.subr.bf16.mxu0 %v9539_v9 }
 0x7a7   : >> { %3188 = vperm.xlu1 %5612, %v9487_v37   ;;  %3185 = vperm.xlu0 %5611, %v9483_v4   ;;  %v9545_v4 = vld [vmem:[#allocation40_spill] sm:$0xff]  ;;  %v9548_v37 = vld [vmem:[#allocation37_spill] sm:$0xff] }
 0x7a8   : >> { %5063 = vmatpush3.bf16.msra.mxu0 %v9539_v9 }
 0x7ab   : >> { %3194 = vperm.xlu1 %5612, %v9506_v7   ;;  %3191 = vperm.xlu0 %5611, %v9503_v51   ;;  %v9564_v51 = vld [vmem:[#allocation31_spill] sm:$0xff]  ;;  %v9567_v7 = vld [vmem:[#allocation33_spill] sm:$0xff] }
 0x7af   : >> { %3200 = vperm.xlu1 %5612, %v8290_v53   ;;  %3197 = vperm.xlu0 %5611, %v9501_v45   ;;  %v9566_v53 = vld [vmem:[#allocation45_spill] sm:$0xff] }
 0x812   : >> { %v8429_v12 = vpop.permute.xlu1 %3161  ;;  %v8431_v2 = vpop.permute.xlu0 %3155 }
 0x813   : >> { %vm3204_vm8 = vcmp.ge.s32.totalorder %v9540_v62, %v8429_v12  ;;  %vm3202_vm9 = vcmp.ge.s32.totalorder %v9541_v55, %v8431_v2 }
 0x814   : >> { %v3218_v49 = vsel %vm3202_vm9, %v9542_v25, 0.0  ;;  %v3220_v3 = vsel %vm3204_vm8, %v9543_v59, 0.0 }
 0x815   : >> { %3234 = vadd.xlane.f32.xlu0 %v3218_v49  ;;  %v9575_v49 = vld [vmem:[#allocation53_spill] sm:$0xff] }
 0x816   : >> { %v8441_v41 = vpop.permute.xlu1 %3164  ;;  %v8443_v43 = vpop.permute.xlu0 %3158  ;;  %5613 = vrcp.f32 %v9575_v49  ;;  %v8569_v49 = vstv %s6420_s18 }
 0x817   : >> { %vm3203_vm10 = vcmp.ge.s32.totalorder %v9544_v57, %v8443_v43  ;;  %vm3205_vm11 = vcmp.ge.s32.totalorder %v9546_v11, %v8441_v41 }
 0x818   : >> { %v3219_v17 = vsel %vm3203_vm10, %v9545_v4, 0.0  ;;  %v3221_v6 = vsel %vm3205_vm11, %v9548_v37, 0.0 }
 0x819   : >> { %3238 = vadd.xlane.f32.xlu0 %v3220_v3  ;;  %3236 = vadd.xlane.f32.xlu1 %v3219_v17  ;;  %v9576_v3 = vld [vmem:[#allocation56_spill] sm:$0xff] }
 0x81a   : >> { %v8457_v52 = vpop.permute.xlu1 %3170  ;;  %v8459_v22 = vpop.permute.xlu0 %3167  ;;  %5615 = vrcp.f32 %v9576_v3 }
 0x81b   : >> { %vm3206_vm12 = vcmp.ge.s32.totalorder %v9547_v27, %v8459_v22  ;;  %vm3207_vm13 = vcmp.ge.s32.totalorder %v9550_v33, %v8457_v52 }
 0x81c   : >> { %v3222_v5 = vsel %vm3206_vm12, %v9549_v14, 0.0  ;;  %v3223_v47 = vsel %vm3207_vm13, %v9552_v56, 0.0 }
 0x81d   : >> { %3240 = vadd.xlane.f32.xlu0 %v3221_v6  ;;  %3242 = vadd.xlane.f32.xlu1 %v3222_v5  ;;  %v9577_v6 = vld [vmem:[#allocation50_spill] sm:$0xff]  ;;  %v9578_v5 = vld [vmem:[#allocation52_spill] sm:$0xff] }
 0x81e   : >> { %v8473_v21 = vpop.permute.xlu1 %3176  ;;  %v8475_v63 = vpop.permute.xlu0 %3173  ;;  %5617 = vrcp.f32 %v9577_v6 }
 0x81f   : >> { %vm3208_vm14 = vcmp.ge.s32.totalorder %v9551_v31, %v8475_v63  ;;  %vm3209_vm15 = vcmp.ge.s32.totalorder %v9554_v23, %v8473_v21 }
 0x820   : >> { %v3224_v42 = vsel %vm3208_vm14, %v9553_v13, 0.0  ;;  %v3225_v54 = vsel %vm3209_vm15, %v9556_v10, 0.0 }
 0x821   : >> { %3244 = vadd.xlane.f32.xlu0 %v3223_v47  ;;  %3246 = vadd.xlane.f32.xlu1 %v3224_v42  ;;  %v9579_v47 = vld [vmem:[#allocation59_spill] sm:$0xff] }
 0x822   : >> { %v8489_v44 = vpop.permute.xlu1 %3182  ;;  %v8491_v30 = vpop.permute.xlu0 %3179 }
 0x823   : >> { %vm3210_vm2 = vcmp.ge.s32.totalorder %v9555_v36, %v8491_v30  ;;  %vm3211_vm3 = vcmp.ge.s32.totalorder %v9558_v39, %v8489_v44 }
 0x824   : >> { %v3226_v34 = vsel %vm3210_vm2, %v9557_v29, 0.0  ;;  %v3227_v61 = vsel %vm3211_vm3, %v9560_v0, 0.0 }
 0x825   : >> { %3248 = vadd.xlane.f32.xlu0 %v3225_v54  ;;  %3250 = vadd.xlane.f32.xlu1 %v3226_v34  ;;  %v9580_v34 = vld [vmem:[#allocation62_spill] sm:$0xff] }
 0x826   : >> { %v8505_v50 = vpop.permute.xlu1 %3188  ;;  %v8507_v35 = vpop.permute.xlu0 %3185 }
 0x827   : >> { %vm3212_vm4 = vcmp.ge.s32.totalorder %v9559_v15, %v8507_v35  ;;  %vm3213_vm5 = vcmp.ge.s32.totalorder %v9562_v48, %v8505_v50 }
 0x828   : >> { %v3228_v45 = vsel %vm3212_vm4, %v9561_v58, 0.0  ;;  %v3229_v60 = vsel %vm3213_vm5, %v9565_v26, 0.0 }
 0x829   : >> { %3252 = vadd.xlane.f32.xlu0 %v3227_v61  ;;  %3254 = vadd.xlane.f32.xlu1 %v3228_v45  ;;  %v5614_v61 = vpop.eup %5613  ;;  %v8564_v45 = vstv %s6418_s17 }
 0x82a   : >> { %v8521_v20 = vpop.permute.xlu1 %3194  ;;  %v8523_v19 = vpop.permute.xlu0 %3191 }
 0x82b   : >> { %9563 = vst [vmem:[#allocation10_spill] sm:$0xff] %v8521_v20  ;;  %vm3214_vm6 = vcmp.ge.s32.totalorder %v9564_v51, %v8523_v19  ;;  %vm3215_vm7 = vcmp.ge.s32.totalorder %v9567_v7, %v8521_v20 }
 0x82c   : >> { %v3230_v8 = vsel %vm3214_vm6, %v9566_v53, 0.0  ;;  %v3231_v40 = vsel %vm3215_vm7, %v9571_v16, 0.0 }
 0x82d   : >> { %3256 = vadd.xlane.f32.xlu0 %v3229_v60  ;;  %3258 = vadd.xlane.f32.xlu1 %v3230_v8  ;;  %v9581_v60 = vld [vmem:[#allocation57_spill] sm:$0xff] }
 0x82e   : >> { %v8537_v24 = vpop.permute.xlu1 %3200  ;;  %v8539_v1 = vpop.permute.xlu0 %3197 }
 0x82f   : >> { %9568 = vst [vmem:[#allocation11_spill] sm:$0xff] %v8537_v24  ;;  %9569 = vst [vmem:[#allocation12_spill] sm:$0xff] %v8539_v1  ;;  %vm3216_vm0 = vcmp.ge.s32.totalorder %v9570_v32, %v8539_v1  ;;  %vm3217_vm1 = vcmp.ge.s32.totalorder %v9573_v38, %v8537_v24  ;;  %v9585_v24 = vld [vmem:[#allocation51_spill] sm:$0xff] }
 0x830   : >> { %v3232_v18 = vsel %vm3216_vm0, %v9572_v28, 0.0  ;;  %v3233_v9 = vsel %vm3217_vm1, %v9574_v46, 0.0 }
 0x831   : >> { %3260 = vadd.xlane.f32.xlu0 %v3231_v40  ;;  %3262 = vadd.xlane.f32.xlu1 %v3232_v18  ;;  %v9582_v18 = vld [vmem:[#allocation60_spill] sm:$0xff] }
 0x835   : >> { %3264 = vadd.xlane.f32.xlu0 %v3233_v9  ;;  %v5616_v9 = vpop.eup %5615 }
 0x836   : >> { %v5618_v3 = vpop.eup %5617 }
 0x8a2   : >> { %v3235_v17 = vpop.xlane.xlu0 %3234 }
 0x8a3   : >> { %5619 = vrcp.f32 %v3235_v17  ;;  %v3268_v17 = vmul.f32 %v5614_v61, %v8564_v45  ;;  %v3272_v61 = vmul.f32 %v5618_v3, %v8564_v45 }
 0x8a4   : >> { %5621 = vrcp.f32 %v9578_v5  ;;  %v9583_v5 = vld [vmem:[#allocation55_spill] sm:$0xff] }
 0x8a5   : >> { %5623 = vrcp.f32 %v9579_v47 }
 0x8a6   : >> { %v3237_v42 = vpop.xlane.xlu1 %3236  ;;  %v3239_v54 = vpop.xlane.xlu0 %3238  ;;  %5625 = vrcp.f32 %v9580_v34 }
 0x8a7   : >> { %5627 = vrcp.f32 %v3237_v42 }
 0x8a8   : >> { %5629 = vrcp.f32 %v3239_v54 }
 0x8a9   : >> { %5631 = vrcp.f32 %v9581_v60  ;;  %v9584_v60 = vld [vmem:[#allocation58_spill] sm:$0xff] }
 0x8aa   : >> { %v3243_v8 = vpop.xlane.xlu1 %3242  ;;  %v3241_v40 = vpop.xlane.xlu0 %3240  ;;  %5633 = vrcp.f32 %v9582_v18 }
 0x8ab   : >> { %5635 = vrcp.f32 %v3243_v8  ;;  %v3270_v8 = vmul.f32 %v5616_v9, %v8564_v45 }
 0x8ac   : >> { %5637 = vrcp.f32 %v3241_v40 }
 0x8ad   : >> { %v5620_v6 = vpop.eup %5619  ;;  %5639 = vrcp.f32 %v9583_v5 }
 0x8ae   : >> { %v5622_v47 = vpop.eup %5621  ;;  %v3247_v42 = vpop.xlane.xlu1 %3246  ;;  %v3301_v34 = vmul.f32 %v5620_v6, %v8569_v49  ;;  %5641 = vrcp.f32 %v9584_v60  ;;  %v9586_v6 = vld [vmem:[#allocation54_spill] sm:$0xff] }
 0x8af   : >> { %v3245_v54 = vpop.xlane.xlu0 %3244  ;;  %v5624_v46 = vpop.eup %5623  ;;  %5643 = vrcp.f32 %v3247_v42 }
 0x8b0   : >> { %v5626_v18 = vpop.eup %5625  ;;  %5645 = vrcp.f32 %v3245_v54  ;;  %v3332_v28 = vadd.f32 %v3301_v34, %v3268_v17  ;;  %v3276_v53 = vmul.f32 %v5624_v46, %v8564_v45 }
 0x8b1   : >> { %v5628_v40 = vpop.eup %5627  ;;  %5647 = vrcp.f32 %v9585_v24  ;;  %v3274_v24 = vmul.f32 %v5622_v47, %v8564_v45  ;;  %v3278_v47 = vmul.f32 %v5626_v18, %v8564_v45 }
 0x8b2   : >> { %v5630_v5 = vpop.eup %5629  ;;  %v3251_v38 = vpop.xlane.xlu1 %3250  ;;  %v3303_v32 = vmul.f32 %v5628_v40, %v8569_v49  ;;  %5649 = vrcp.f32 %v9586_v6  ;;  %v3348_v3 = vsel %vm3202_vm9, %v3332_v28, %v3268_v17  ;;  %v9587_v40 = vld [vmem:[#allocation61_spill] sm:$0xff] }
 0x8b3   : >> { %v3249_v1 = vpop.xlane.xlu0 %3248  ;;  %v5632_v60 = vpop.eup %5631  ;;  %v3305_v42 = vmul.f32 %v5630_v5, %v8569_v49  ;;  %5651 = vrcp.f32 %v3251_v38  ;;  %v3364_v28 = vmul.f32 %v9542_v25, %v3348_v3 }
 0x8b4   : >> { %v5634_v54 = vpop.eup %5633  ;;  %5653 = vrcp.f32 %v3249_v1  ;;  %v3333_v9 = vadd.f32 %v3303_v32, %v3270_v8  ;;  %v9588_v32 = vld [vmem:[#allocation64_spill] sm:$0xff] }
 0x8b5   : >> { %v5636_v34 = vpop.eup %5635  ;;  %v3334_v16 = vadd.f32 %v3305_v42, %v3272_v61  ;;  %5655 = vrcp.f32 %v9587_v40  ;;  %v3280_v42 = vmul.f32 %v5632_v60, %v8564_v45 }
 0x8b6   : >> { %v5638_v6 = vpop.eup %5637  ;;  %v3309_v20 = vmul.f32 %v5636_v34, %v8569_v49  ;;  %v3255_v5 = vpop.xlane.xlu1 %3254  ;;  %v3349_v1 = vsel %vm3203_vm10, %v3333_v9, %v3270_v8  ;;  %5657 = vrcp.f32 %v9588_v32 }
 0x8b7   : >> { %v3253_v38 = vpop.xlane.xlu0 %3252  ;;  %v5640_v2 = vpop.eup %5639  ;;  %v3307_v55 = vmul.f32 %v5638_v6, %v8569_v49  ;;  %5659 = vrcp.f32 %v3255_v5  ;;  %v3365_v46 = vmul.f32 %v9545_v4, %v3349_v1  ;;  %v3350_v57 = vsel %vm3204_vm8, %v3334_v16, %v3272_v61  ;;  %v9589_v4 = vld [vmem:[#allocation63_spill] sm:$0xff] }
 0x8b8   : >> { %v5642_v17 = vpop.eup %5641  ;;  %5661 = vrcp.f32 %v3253_v38  ;;  %v3336_v8 = vadd.f32 %v3309_v20, %v3276_v53  ;;  %v3366_v12 = vmul.f32 %v9543_v59, %v3350_v57  ;;  %v3282_v20 = vmul.f32 %v5634_v54, %v8564_v45  ;;  %v9590_v59 = vld [vmem:[#allocation65_spill] sm:$0xff] }
 0x8b9   : >> { %v5644_v34 = vpop.eup %5643  ;;  %v3380_v40 = vpack.c.bf16 %v3365_v46, %v3364_v28  ;;  %v3335_v43 = vadd.f32 %v3307_v55, %v3274_v24  ;;  %5663 = vrcp.f32 %v9589_v4  ;;  %v3284_v55 = vmul.f32 %v5640_v2, %v8564_v45 }
 0x8ba   : >> { %v5646_v9 = vpop.eup %5645  ;;  %v3313_v6 = vmul.f32 %v5644_v34, %v8569_v49  ;;  %v3259_v25 = vpop.xlane.xlu1 %3258  ;;  %v3352_v1 = vsel %vm3206_vm12, %v3336_v8, %v3276_v53  ;;  %v3286_v34 = vmul.f32 %v5642_v17, %v8564_v45 }
 0x8bb   : >> { %v3257_v3 = vpop.xlane.xlu0 %3256  ;;  %v5648_v5 = vpop.eup %5647  ;;  %v3311_v18 = vmul.f32 %v5646_v9, %v8569_v49  ;;  %5665 = vrcp.f32 %v3259_v25  ;;  %5064 = vmatprep.mubr.bf16.mxu0 %v3380_v40  ;;  %v3351_v60 = vsel %vm3205_vm11, %v3335_v43, %v3274_v24  ;;  %v3368_v53 = vmul.f32 %v9549_v14, %v3352_v1 }
 0x8bc   : >> { %v5650_v38 = vpop.eup %5649  ;;  %5667 = vrcp.f32 %v3257_v3  ;;  %v3367_v62 = vmul.f32 %v9548_v37, %v3351_v60  ;;  %v3338_v32 = vadd.f32 %v3313_v6, %v3280_v42  ;;  %v3288_v9 = vmul.f32 %v5648_v5, %v8564_v45 }
 0x8bd   : >> { %v5652_v16 = vpop.eup %5651  ;;  %v3337_v61 = vadd.f32 %v3311_v18, %v3278_v47  ;;  %5669 = vrcp.f32 %v9590_v59 }
 0x8be   : >> { %v5654_v28 = vpop.eup %5653  ;;  %v3317_v41 = vmul.f32 %v5652_v16, %v8569_v49  ;;  %v3263_v11 = vpop.xlane.xlu1 %3262  ;;  %v3381_v46 = vpack.c.bf16 %v3367_v62, %v3366_v12  ;;  %v3354_v57 = vsel %vm3208_vm14, %v3338_v32, %v3280_v42  ;;  %v3290_v42 = vmul.f32 %v5650_v38, %v8564_v45 }
 0x8bf   : >> { %v3261_v24 = vpop.xlane.xlu0 %3260  ;;  %v5656_v37 = vpop.eup %5655  ;;  %v3315_v54 = vmul.f32 %v5654_v28, %v8569_v49  ;;  %5671 = vrcp.f32 %v3263_v11  ;;  %v3353_v22 = vsel %vm3207_vm13, %v3337_v61, %v3278_v47  ;;  %v3370_v63 = vmul.f32 %v9553_v13, %v3354_v57 }
 0x8c0   : >> { %v5658_v27 = vpop.eup %5657  ;;  %5673 = vrcp.f32 %v3261_v24  ;;  %5065 = vmatmul.mubr.bf16.vlgmr.msra.gmra.mrb[0].mxu0 %v3381_v46  ;;  %v3369_v2 = vmul.f32 %v9552_v56, %v3353_v22  ;;  %v3340_v8 = vadd.f32 %v3317_v41, %v3284_v55  ;;  %v3292_v18 = vmul.f32 %v5656_v37, %v8564_v45  ;;  %v9593_v37 = vld [vmem:[#allocation48_spill] sm:$0xff]  ;;  %v3496_v22 = vld [vmem:[#allocation6 + $0x58] sm:$0xff] }
 0x8c1   : >> { %v5660_v40 = vpop.eup %5659  ;;  %v3339_v43 = vadd.f32 %v3315_v54, %v3282_v20  ;;  %v3294_v61 = vmul.f32 %v5658_v27, %v8564_v45  ;;  %vm9608_vm14 = vcmask 523264  }
 0x8c2   : >> { %v5662_v52 = vpop.eup %5661  ;;  %v3321_v33 = vmul.f32 %v5660_v40, %v8569_v49  ;;  %v3382_v6 = vpack.c.bf16 %v3369_v2, %v3368_v53  ;;  %v3356_v4 = vsel %vm3210_vm2, %v3340_v8, %v3284_v55  ;;  %v3511_v8 = vld [vmem:[%s3510_s25] sm:$0xff]  ;;  %vm9610_vm2 = vmmov %vm9608_vm14 }
 0x8c3   : >> { %v3265_v47 = vpop.xlane.xlu0 %3264  ;;  %v3319_v14 = vmul.f32 %v5662_v52, %v8569_v49  ;;  %v3355_v56 = vsel %vm3209_vm15, %v3339_v43, %v3282_v20  ;;  %v5664_v17 = vpop.eup %5663  ;;  %v3372_v38 = vmul.f32 %v9557_v29, %v3356_v4  ;;  %v9599_v43 = vld [vmem:[#allocation49_spill] sm:$0xff]  ;;  %5080 = vmatprep.subr.bf16.mxu1 %v3511_v8  ;;  %vm9609_vm15 = vmmov %vm9608_vm14 }
 0x8c4   : >> { %5675 = vrcp.f32 %v3265_v47  ;;  %5068 = vmatprep.mubr.bf16.mxu0 %v3382_v6  ;;  %v3371_v31 = vmul.f32 %v9556_v10, %v3355_v56  ;;  %v3342_v5 = vadd.f32 %v3321_v33, %v3288_v9  ;;  %v3296_v36 = vmul.f32 %v5664_v17, %v8564_v45  ;;  %5081 = vmatpush3.bf16.msra.mxu1 %v3511_v8  ;;  %v3500_v8 = vld [vmem:[#allocation6 + $0x78] sm:$0xff] }
 0x8c5   : >> { %v5666_v25 = vpop.eup %5665  ;;  %v3341_v3 = vadd.f32 %v3319_v14, %v3286_v34 }
 0x8c6   : >> { %v5668_v60 = vpop.eup %5667  ;;  %v3325_v21 = vmul.f32 %v5666_v25, %v8569_v49  ;;  %v3383_v23 = vpack.c.bf16 %v3371_v31, %v3370_v63  ;;  %v3358_v16 = vsel %vm3212_vm4, %v3342_v5, %v3288_v9  ;;  %vm9612_vm4 = vmmov %vm9610_vm2 }
 0x8c7   : >> { %v3323_v12 = vmul.f32 %v5668_v60, %v8569_v49  ;;  %v3357_v13 = vsel %vm3211_vm3, %v3341_v3, %v3286_v34  ;;  %v5670_v10 = vpop.eup %5669  ;;  %v9598_v34 = vld [vmem:[#allocation47_spill] sm:$0xff]  ;;  %vm9611_vm3 = vmmov %vm9610_vm2 }
 0x8c8   : >> { %5069 = vmatmul.mubr.bf16.gmra.mrb[4].mxu0 %v3383_v23  ;;  %v3373_v30 = vmul.f32 %v9560_v0, %v3357_v13  ;;  %v3344_v1 = vadd.f32 %v3325_v21, %v3292_v18  ;;  %v3374_v0 = vmul.f32 %v9561_v58, %v3358_v16  ;;  %v3298_v35 = vmul.f32 %v5670_v10, %v8564_v45  ;;  %v9592_v58 = vld [vmem:[#allocation45_spill] sm:$0xff] }
 0x8c9   : >> { %v5672_v62 = vpop.eup %5671  ;;  %v3343_v20 = vadd.f32 %v3323_v12, %v3290_v42  ;;  %v3488_v16 = vld [vmem:[#allocation6 + $0x18] sm:$0xff] }
 0x8ca   : >> { %v5674_v32 = vpop.eup %5673  ;;  %v3329_v44 = vmul.f32 %v5672_v62, %v8569_v49  ;;  %v3384_v39 = vpack.c.bf16 %v3373_v30, %v3372_v38  ;;  %v3360_v24 = vsel %vm3214_vm6, %v3344_v1, %v3292_v18  ;;  %v3485_v62 = vld [vmem:[#allocation6] sm:$0xff]  ;;  %vm9614_vm6 = vmmov %vm9610_vm2 }
 0x8cb   : >> { %v3327_v55 = vmul.f32 %v5674_v32, %v8569_v49  ;;  %v3359_v29 = vsel %vm3213_vm5, %v3343_v20, %v3290_v42  ;;  %v3486_v32 = vld [vmem:[#allocation6 + $0x8] sm:$0xff]  ;;  %vm9613_vm5 = vmmov %vm9610_vm2 }
 0x8cc   : >> { %5072 = vmatprep.mubr.bf16.mxu0 %v3384_v39  ;;  %v3375_v28 = vmul.f32 %v9565_v26, %v3359_v29  ;;  %v3346_v15 = vadd.f32 %v3329_v44, %v3296_v36  ;;  %v3376_v26 = vmul.f32 %v9592_v58, %v3360_v24 }
 0x8cd   : >> { %v3345_v11 = vadd.f32 %v3327_v55, %v3294_v61 }
 0x8ce   : >> { %v5676_v41 = vpop.eup %5675  ;;  %v3385_v59 = vpack.c.bf16 %v3375_v28, %v3374_v0  ;;  %v3362_v53 = vsel %vm3216_vm0, %v3346_v15, %v3296_v36  ;;  %vm9600_vm0 = vcmask 130048   ;;  %v3487_v36 = vld [vmem:[#allocation6 + $0x10] sm:$0xff] }
 0x8cf   : >> { %v3331_v46 = vmul.f32 %v5676_v41, %v8569_v49  ;;  %v3361_v48 = vsel %vm3215_vm7, %v3345_v11, %v3294_v61  ;;  %v3378_v40 = vmul.f32 %v9598_v34, %v3362_v53  ;;  %vm9602_vm8 = vmmov %vm9600_vm0  ;;  %v3491_v28 = vld [vmem:[#allocation6 + $0x30] sm:$0xff]  ;;  %v3492_v41 = vld [vmem:[#allocation6 + $0x38] sm:$0xff] }
 0x8d0   : >> { %5073 = vmatmul.mubr.bf16.gmra.mrb[8].mxu0 %v3385_v59  ;;  %v3377_v45 = vmul.f32 %v9593_v37, %v3361_v48  ;;  %vm9603_vm9 = vmmov %vm9600_vm0  ;;  %v3495_v37 = vld [vmem:[#allocation6 + $0x50] sm:$0xff] }
 0x8d1   : >> { %v3347_v54 = vadd.f32 %v3331_v46, %v3298_v35  ;;  %vm9604_vm10 = vmmov %vm9600_vm0  ;;  %v3490_v46 = vld [vmem:[#allocation6 + $0x28] sm:$0xff] }
 0x8d2   : >> { %v3386_v19 = vpack.c.bf16 %v3377_v45, %v3376_v26  ;;  %vm9605_vm11 = vmmov %vm9600_vm0  ;;  %v3493_v45 = vld [vmem:[#allocation6 + $0x40] sm:$0xff] }
 0x8d3   : >> { %v3363_v49 = vsel %vm3217_vm1, %v3347_v54, %v3298_v35  ;;  %vm9601_vm1 = vmmov %vm9600_vm0  ;;  %v3489_v35 = vld [vmem:[#allocation6 + $0x20] sm:$0xff] }
 0x8d4   : >> { %v3379_v7 = vmul.f32 %v9599_v43, %v3363_v49  ;;  %5076 = vmatprep.mubr.bf16.mxu0 %v3386_v19  ;;  %vm9606_vm12 = vmmov %vm9600_vm0  ;;  %v3494_v19 = vld [vmem:[#allocation6 + $0x48] sm:$0xff]  ;;  %v3499_v43 = vld [vmem:[#allocation6 + $0x70] sm:$0xff] }
 0x8d5   : >> { %vm9607_vm13 = vmmov %vm9600_vm0 }
 0x8d6   : >> { %v3387_v57 = vpack.c.bf16 %v3379_v7, %v3378_v40  ;;  %vm9615_vm7 = vmmov %vm9610_vm2  ;;  %v3497_v7 = vld [vmem:[#allocation6 + $0x60] sm:$0xff] }
 0x8d8   : >> { %5077 = vmatmul.mubr.bf16.gmra.mrb[12].mxu0 %v3387_v57 }
 0x993   : >> { %v5066_v9 = vpop.f32.mrb[0].mxu0 }
 0x994   : >> { %v3422_v52 = vpop.f32.mrb[1].mxu0 }
 0x995   : >> { %v5067_v33 = vpop.f32.mrb[2].mxu0 }
 0x996   : >> { %v3502_v47 = vpack.c.bf16 %v5067_v33, %v5066_v9  ;;  %v3425_v6 = vpop.f32.mrb[3].mxu0  ;;  %v3498_v33 = vld [vmem:[#allocation6 + $0x68] sm:$0xff] }
 0x997   : >> { %v3501_v14 = vpack.c.bf16 %v3425_v6, %v3422_v52 }
 0x999   : >> { %5082 = vmatprep.mubr.msk.bf16.mxu1 %vm9600_vm0, %v3501_v14  ;;  %vm9616_vm0 = vmmov %vm9610_vm2 }
 0x99a   : >> { %5083 = vmatmul.mubr.msk.bf16.vlgmr.msra.gmra.mrb[0].mxu1 %vm9601_vm1, %v3502_v47  ;;  %vm9617_vm1 = vmmov %vm9616_vm0 }
 0x99b   : >> { %v5070_v56 = vpop.f32.mrb[4].mxu0 }
 0x99c   : >> { %v3438_v17 = vpop.f32.mrb[5].mxu0 }
 0x99d   : >> { %v5071_v63 = vpop.f32.mrb[6].mxu0 }
 0x99e   : >> { %v3504_v31 = vpack.c.bf16 %v5071_v63, %v5070_v56  ;;  %v3441_v42 = vpop.f32.mrb[7].mxu0 }
 0x99f   : >> { %v3503_v25 = vpack.c.bf16 %v3441_v42, %v3438_v17 }
 0x9a1   : >> { %5086 = vmatprep.mubr.msk.bf16.mxu1 %vm9602_vm8, %v3503_v25  ;;  %vm9618_vm8 = vmmov %vm9616_vm0 }
 0x9a2   : >> { %5087 = vmatmul.mubr.msk.bf16.gmra.mrb[4].mxu1 %vm9603_vm9, %v3504_v31  ;;  %vm9619_vm9 = vmmov %vm9616_vm0 }
 0x9a3   : >> { %v5074_v3 = vpop.f32.mrb[8].mxu0 }
 0x9a4   : >> { %v3454_v4 = vpop.f32.mrb[9].mxu0 }
 0x9a5   : >> { %v5075_v5 = vpop.f32.mrb[10].mxu0 }
 0x9a6   : >> { %v3506_v18 = vpack.c.bf16 %v5075_v5, %v5074_v3  ;;  %v3457_v60 = vpop.f32.mrb[11].mxu0 }
 0x9a7   : >> { %v3505_v21 = vpack.c.bf16 %v3457_v60, %v3454_v4 }
 0x9a9   : >> { %5090 = vmatprep.mubr.msk.bf16.mxu1 %vm9604_vm10, %v3505_v21  ;;  %vm9620_vm10 = vmmov %vm9616_vm0 }
 0x9aa   : >> { %5091 = vmatmul.mubr.msk.bf16.gmra.mrb[8].mxu1 %vm9605_vm11, %v3506_v18  ;;  %vm9621_vm11 = vmmov %vm9616_vm0 }
 0x9ab   : >> { %v5078_v23 = vpop.f32.mrb[12].mxu0 }
 0x9ac   : >> { %v3470_v12 = vpop.f32.mrb[13].mxu0 }
 0x9ad   : >> { %v5079_v13 = vpop.f32.mrb[14].mxu0 }
 0x9ae   : >> { %v3508_v10 = vpack.c.bf16 %v5079_v13, %v5078_v23  ;;  %v3473_v38 = vpop.f32.mrb[15].mxu0 }
 0x9af   : >> { %v3507_v30 = vpack.c.bf16 %v3473_v38, %v3470_v12 }
 0x9b1   : >> { %5094 = vmatprep.mubr.msk.bf16.mxu1 %vm9606_vm12, %v3507_v30  ;;  %vm9622_vm12 = vmmov %vm9616_vm0 }
 0x9b2   : >> { %5095 = vmatmul.mubr.msk.bf16.gmra.mrb[12].mxu1 %vm9607_vm13, %v3508_v10  ;;  %vm9623_vm13 = vmmov %vm9616_vm0 }
 0xa6d   : >> { %v5084_v20 = vpop.f32.mrb[0].mxu1 }
 0xa6e   : >> { %v3635_v61 = vadd.f32 %v5084_v20, %v3487_v36  ;;  %v3570_v1 = vpop.f32.mrb[1].mxu1 }
 0xa6f   : >> { %v3633_v44 = vadd.f32 %v3570_v1, %v3485_v62  ;;  %v5085_v39 = vpop.f32.mrb[2].mxu1 }
 0xa70   : >> { %3651 = vst.msk [vmem:[#allocation6 + $0x10] sm:$0xff] %vm9608_vm14, %v3635_v61  ;;  %v3636_v55 = vadd.f32 %v5085_v39, %v3488_v16  ;;  %v3573_v29 = vpop.f32.mrb[3].mxu1  ;;  %vm9624_vm14 = vcmask (%p1421_p2), 523264  }
 0xa71   : >> { %3649 = vst.msk [vmem:[#allocation6] sm:$0xff] %vm9609_vm15, %v3633_v44  ;;  %v3634_v0 = vadd.f32 %v3573_v29, %v3486_v32  ;;  %vm9625_vm15 = vmmov (%p1421_p2), %vm9624_vm14 }
 0xa72   : >> { %3652 = vst.msk [vmem:[#allocation6 + $0x18] sm:$0xff] %vm9610_vm2, %v3636_v55  ;;  %vm9626_vm2 = vmmov (%p1421_p2), %vm9624_vm14 }
 0xa73   : >> { %3650 = vst.msk [vmem:[#allocation6 + $0x8] sm:$0xff] %vm9611_vm3, %v3634_v0  ;;  %vm9627_vm3 = vmmov (%p1421_p2), %vm9626_vm2 }
 0xa75   : >> { %v5088_v15 = vpop.f32.mrb[4].mxu1 }
 0xa76   : >> { %v3639_v11 = vadd.f32 %v5088_v15, %v3491_v28  ;;  %v3586_v24 = vpop.f32.mrb[5].mxu1 }
 0xa77   : >> { %v3637_v59 = vadd.f32 %v3586_v24, %v3489_v35  ;;  %v5089_v50 = vpop.f32.mrb[6].mxu1  ;;  %v3667_v31 = vld [vmem:[#allocation6 + $0x10] sm:$0xff] (%p1421_p2) }
 0xa78   : >> { %3655 = vst.msk [vmem:[#allocation6 + $0x30] sm:$0xff] %vm9612_vm4, %v3639_v11  ;;  %v3640_v48 = vadd.f32 %v5089_v50, %v3492_v41  ;;  %v3589_v58 = vpop.f32.mrb[7].mxu1  ;;  %v3665_v63 = vld [vmem:[#allocation6] sm:$0xff] (%p1421_p2)  ;;  %v3687_v3 = vsel (%p1421_p2), %vm9625_vm15, %v3667_v31, 0.0  ;;  %vm9628_vm4 = vmmov (%p1421_p2), %vm9626_vm2 }
 0xa79   : >> { %3653 = vst.msk [vmem:[#allocation6 + $0x20] sm:$0xff] %vm9613_vm5, %v3637_v59  ;;  %v3638_v26 = vadd.f32 %v3589_v58, %v3490_v46  ;;  %v3681_v25 = vsel (%p1421_p2), %vm9624_vm14, %v3665_v63, 0.0  ;;  %v3668_v4 = vld [vmem:[#allocation6 + $0x18] sm:$0xff] (%p1421_p2)  ;;  %3688 = vadd.xlane.f32.xlu1 (%p1421_p2), %v3687_v3  ;;  %vm9629_vm5 = vmmov (%p1421_p2), %vm9626_vm2 }
 0xa7a   : >> { %3656 = vst.msk [vmem:[#allocation6 + $0x38] sm:$0xff] %vm9614_vm6, %v3640_v48  ;;  %v3666_v42 = vld [vmem:[#allocation6 + $0x8] sm:$0xff] (%p1421_p2)  ;;  %3682 = vadd.xlane.f32.xlu0 (%p1421_p2), %v3681_v25  ;;  %v3690_v21 = vsel (%p1421_p2), %vm9627_vm3, %v3668_v4, 0.0  ;;  %vm9630_vm6 = vmmov (%p1421_p2), %vm9626_vm2 }
 0xa7b   : >> { %3654 = vst.msk [vmem:[#allocation6 + $0x28] sm:$0xff] %vm9615_vm7, %v3638_v26  ;;  %v3684_v60 = vsel (%p1421_p2), %vm9626_vm2, %v3666_v42, 0.0  ;;  %vm9631_vm7 = vmmov (%p1421_p2), %vm9626_vm2 }
 0xa7d   : >> { %v5092_v54 = vpop.f32.mrb[8].mxu1  ;;  %3691 = vadd.xlane.f32.xlu1 (%p1421_p2), %v3690_v21 }
 0xa7e   : >> { %v3643_v27 = vadd.f32 %v5092_v54, %v3495_v37  ;;  %v3602_v53 = vpop.f32.mrb[9].mxu1  ;;  %3685 = vadd.xlane.f32.xlu0 (%p1421_p2), %v3684_v60 }
 0xa7f   : >> { %v3641_v51 = vadd.f32 %v3602_v53, %v3493_v45  ;;  %v5093_v2 = vpop.f32.mrb[10].mxu1  ;;  %v8711_v23 = vld [vmem:[#allocation6 + $0x30] sm:$0xff] (%p1421_p2) }
 0xa80   : >> { %3659 = vst.msk [vmem:[#allocation6 + $0x50] sm:$0xff] %vm9616_vm0, %v3643_v27  ;;  %v3644_v49 = vadd.f32 %v5093_v2, %v3496_v22  ;;  %v3605_v34 = vpop.f32.mrb[11].mxu1  ;;  %v8705_v5 = vld [vmem:[#allocation6 + $0x20] sm:$0xff] (%p1421_p2)  ;;  %v3699_v38 = vsel (%p1421_p2), %vm9630_vm6, %v8711_v23, 0.0  ;;  %vm9632_vm0 = vmmov (%p1421_p2), %vm9626_vm2 }
 0xa81   : >> { %3657 = vst.msk [vmem:[#allocation6 + $0x40] sm:$0xff] %vm9617_vm1, %v3641_v51  ;;  %v3642_v40 = vadd.f32 %v3605_v34, %v3494_v19  ;;  %v8713_v12 = vld [vmem:[#allocation6 + $0x38] sm:$0xff] (%p1421_p2)  ;;  %v3693_v13 = vsel (%p1421_p2), %vm9628_vm4, %v8705_v5, 0.0  ;;  %vm9633_vm1 = vmmov (%p1421_p2), %vm9632_vm0 }
 0xa82   : >> { %3660 = vst.msk [vmem:[#allocation6 + $0x58] sm:$0xff] %vm9618_vm8, %v3644_v49  ;;  %v8707_v18 = vld [vmem:[#allocation6 + $0x28] sm:$0xff] (%p1421_p2)  ;;  %v3702_v30 = vsel (%p1421_p2), %vm9631_vm7, %v8713_v12, 0.0  ;;  %3694 = vadd.xlane.f32.xlu0 (%p1421_p2), %v3693_v13  ;;  %vm9634_vm8 = vmmov (%p1421_p2), %vm9632_vm0 }
 0xa83   : >> { %3658 = vst.msk [vmem:[#allocation6 + $0x48] sm:$0xff] %vm9619_vm9, %v3642_v40  ;;  %v3696_v10 = vsel (%p1421_p2), %vm9629_vm5, %v8707_v18, 0.0  ;;  %vm9635_vm9 = vmmov (%p1421_p2), %vm9632_vm0 }
 0xa84   : > { %3697 = vadd.xlane.f32.xlu1 (%p1421_p2), %v3696_v10  ;;  %vm9640_vm14 = vmmov (%p1421_p2), %vm9632_vm0 }
 0xa85   : >> { %v5096_v57 = vpop.f32.mrb[12].mxu1  ;;  %1423 = sbr.rel (!%p1421_p2) target bundleno = 856 (0x358), region = 152  ;;  %vm9641_vm15 = vmmov (%p1421_p2), %vm9632_vm0 }
 0xa86   : >> { %v3647_v9 = vadd.f32 %v5096_v57, %v3499_v43  ;;  %v3618_v52 = vpop.f32.mrb[13].mxu1  ;;  %3700 = vadd.xlane.f32.xlu0 (%p1421_p2), %v3699_v38  ;;  %vm9642_vm2 = vmmov (%p1421_p2), %vm9632_vm0 }
 0xa87   : >> { %v3645_v47 = vadd.f32 %v3618_v52, %v3497_v7  ;;  %v5097_v6 = vpop.f32.mrb[14].mxu1  ;;  %v8731_v61 = vld [vmem:[#allocation6 + $0x50] sm:$0xff] (%p1421_p2)  ;;  %vm9643_vm3 = vmmov (%p1421_p2), %vm9632_vm0 }
 0xa88   : >> { %3663 = vst.msk [vmem:[#allocation6 + $0x70] sm:$0xff] %vm9620_vm10, %v3647_v9  ;;  %v3648_v14 = vadd.f32 %v5097_v6, %v3500_v8  ;;  %v3621_v56 = vpop.f32.mrb[15].mxu1  ;;  %v8723_v36 = vld [vmem:[#allocation6 + $0x40] sm:$0xff] (%p1421_p2)  ;;  %3703 = vadd.xlane.f32.xlu1 (%p1421_p2), %v3702_v30  ;;  %v3711_v32 = vsel (%p1421_p2), %vm9634_vm8, %v8731_v61, 0.0  ;;  %vm9636_vm10 = vmmov (%p1421_p2), %vm9632_vm0 }
 0xa89   : >> { %3661 = vst.msk [vmem:[#allocation6 + $0x60] sm:$0xff] %vm9621_vm11, %v3645_v47  ;;  %v3646_v17 = vadd.f32 %v3621_v56, %v3498_v33  ;;  %v3705_v20 = vsel (%p1421_p2), %vm9632_vm0, %v8723_v36, 0.0  ;;  %v8733_v1 = vld [vmem:[#allocation6 + $0x58] sm:$0xff] (%p1421_p2)  ;;  %vm9637_vm11 = vmmov (%p1421_p2), %vm9632_vm0 }
 0xa8a   : >> { %3664 = vst.msk [vmem:[#allocation6 + $0x78] sm:$0xff] %vm9622_vm12, %v3648_v14  ;;  %v8725_v62 = vld [vmem:[#allocation6 + $0x48] sm:$0xff] (%p1421_p2)  ;;  %3706 = vadd.xlane.f32.xlu0 (%p1421_p2), %v3705_v20  ;;  %v3714_v44 = vsel (%p1421_p2), %vm9635_vm9, %v8733_v1, 0.0  ;;  %vm9638_vm12 = vmmov (%p1421_p2), %vm9632_vm0 }
 0xa8b   : >> { %3662 = vst.msk [vmem:[#allocation6 + $0x68] sm:$0xff] %vm9623_vm13, %v3646_v17  ;;  %v3708_v16 = vsel (%p1421_p2), %vm9633_vm1, %v8725_v62, 0.0  ;;  %vm9639_vm13 = vmmov (%p1421_p2), %vm9632_vm0 }
 0xa8c   : > { %3709 = vadd.xlane.f32.xlu1 %v3708_v16  ;;  %vm9644_vm4 = vmmov %vm9632_vm0 }
 0xa8d   : > { %vm9645_vm5 = vmmov %vm9632_vm0 }
 0xa8e   : > { %3712 = vadd.xlane.f32.xlu0 %v3711_v32  ;;  %vm9646_vm6 = vmmov %vm9632_vm0 }
 0xa8f   : > { %v8747_v28 = vld [vmem:[#allocation6 + $0x70] sm:$0xff]  ;;  %vm9647_vm7 = vmmov %vm9632_vm0 }
 0xa90   : > { %v8739_v39 = vld [vmem:[#allocation6 + $0x60] sm:$0xff]  ;;  %3715 = vadd.xlane.f32.xlu1 %v3714_v44  ;;  %v3723_v15 = vsel %vm9638_vm12, %v8747_v28, 0.0  ;;  %vm9648_vm1 = vmmov %vm9632_vm0 }
 0xa91   : > { %v3717_v29 = vsel %vm9636_vm10, %v8739_v39, 0.0  ;;  %v8749_v35 = vld [vmem:[#allocation6 + $0x78] sm:$0xff]  ;;  %vm9649_vm8 = vmmov %vm9632_vm0 }
 0xa92   : > { %v8741_v55 = vld [vmem:[#allocation6 + $0x68] sm:$0xff]  ;;  %3718 = vadd.xlane.f32.xlu0 %v3717_v29  ;;  %v3726_v41 = vsel %vm9639_vm13, %v8749_v35, 0.0  ;;  %vm9650_vm9 = vmmov %vm9632_vm0 }
 0xa93   : > { %v3720_v0 = vsel %vm9637_vm11, %v8741_v55, 0.0  ;;  %vm9651_vm10 = vmmov %vm9632_vm0 }
 0xa94   : > { %3721 = vadd.xlane.f32.xlu1 %v3720_v0  ;;  %vm9652_vm11 = vmmov %vm9632_vm0 }
 0xa95   : > { %vm9653_vm12 = vmmov %vm9632_vm0 }
 0xa96   : > { %3724 = vadd.xlane.f32.xlu0 %v3723_v15  ;;  %vm9654_vm13 = vmmov %vm9632_vm0 }
 0xa98   : > { %3727 = vadd.xlane.f32.xlu1 %v3726_v41 }
 0xb06   : > { %v3689_v24 = vpop.xlane.xlu1 %3688 }
 0xb07   : > { %v3683_v11 = vpop.xlane.xlu0 %3682  ;;  %v3731_v59 = vmul.f32 0.015625, %v3689_v24 }
 0xb08   : > { %v3729_v46 = vmul.f32 0.015625, %v3683_v11 }
 0xb09   : > { %v8757_v48 = vsub.f32 %v3667_v31, %v3731_v59 }
 0xb0a   : > { %v8755_v50 = vsub.f32 %v3665_v63, %v3729_v46  ;;  %v3692_v26 = vpop.xlane.xlu1 %3691 }
 0xb0b   : > { %v3686_v58 = vpop.xlane.xlu0 %3685  ;;  %v3732_v45 = vmul.f32 0.015625, %v3692_v26  ;;  %v3763_v22 = vmul.f32 %v8757_v48, %v8757_v48 }
 0xb0c   : > { %v3730_v37 = vmul.f32 0.015625, %v3686_v58  ;;  %v3761_v54 = vmul.f32 %v8755_v50, %v8755_v50 }
 0xb0d   : > { %v8765_v53 = vsub.f32 %v3668_v4, %v3732_v45  ;;  %v3783_v49 = vsel %vm9641_vm15, %v3763_v22, 0.0  ;;  %vm9656_vm15 = vmmov %vm9632_vm0 }
 0xb0e   : > { %v8763_v27 = vsub.f32 %v3666_v42, %v3730_v37  ;;  %v3777_v19 = vsel %vm9640_vm14, %v3761_v54, 0.0  ;;  %vm9655_vm14 = vmmov %vm9632_vm0 }
 0xb0f   : > { %3778 = vadd.xlane.f32.xlu0 %v3777_v19  ;;  %v3695_v51 = vpop.xlane.xlu0 %3694  ;;  %v3764_v7 = vmul.f32 %v8765_v53, %v8765_v53 }
 0xb10   : > { %v3733_v34 = vmul.f32 0.015625, %v3695_v51  ;;  %v3762_v43 = vmul.f32 %v8763_v27, %v8763_v27 }
 0xb11   : > { %v3698_v2 = vpop.xlane.xlu1 %3697  ;;  %v3786_v47 = vsel %vm9643_vm3, %v3764_v7, 0.0  ;;  %vm9658_vm3 = vmmov %vm9632_vm0 }
 0xb12   : > { %v3734_v40 = vmul.f32 0.015625, %v3698_v2  ;;  %v8774_v57 = vsub.f32 %v8705_v5, %v3733_v34  ;;  %v3780_v9 = vsel %vm9642_vm2, %v3762_v43, 0.0  ;;  %vm9657_vm2 = vmmov %vm9632_vm0 }
 0xb13   : > { %3784 = vadd.xlane.f32.xlu0 %v3783_v49  ;;  %3781 = vadd.xlane.f32.xlu1 %v3780_v9  ;;  %v3701_v52 = vpop.xlane.xlu0 %3700 }
 0xb14   : > { %v8777_v8 = vsub.f32 %v8707_v18, %v3734_v40  ;;  %v3735_v6 = vmul.f32 0.015625, %v3701_v52  ;;  %v3765_v56 = vmul.f32 %v8774_v57, %v8774_v57 }
 0xb15   : > { %v3704_v33 = vpop.xlane.xlu1 %3703 }
 0xb16   : > { %v3736_v14 = vmul.f32 0.015625, %v3704_v33  ;;  %v3766_v17 = vmul.f32 %v8777_v8, %v8777_v8  ;;  %v8786_v63 = vsub.f32 %v8711_v23, %v3735_v6  ;;  %v3789_v42 = vsel %vm9644_vm4, %v3765_v56, 0.0  ;;  %v5677_v33 = vld [vmem:[%s9065_s10] sm:$0xff]   ;;  %v5678_v6 = vld [vmem:[%s9065_s10 + $0x8] sm:$0xff]   ;;  %v5680_v56 = vld [vmem:[%s9065_s10 + $0x18] sm:$0xff]  }
 0xb17   : > { %3787 = vadd.xlane.f32.xlu1 %v3786_v47  ;;  %3790 = vadd.xlane.f32.xlu0 %v3789_v42  ;;  %v3707_v25 = vpop.xlane.xlu0 %3706  ;;  %v8868_v42 = vld [vmem:[%s9067_s12 + $0x8] sm:$0xff]   ;;  %vm9659_vm4 = vmmov %vm9632_vm0 }
 0xb18   : > { %v8789_v31 = vsub.f32 %v8713_v12, %v3736_v14  ;;  %v3792_v4 = vsel %vm9645_vm5, %v3766_v17, 0.0  ;;  %v3737_v5 = vmul.f32 0.015625, %v3707_v25  ;;  %v3767_v60 = vmul.f32 %v8786_v63, %v8786_v63  ;;  %5098 = vmatprep.subr.bf16.mxu0 %v5677_v33  ;;  %v5679_v14 = vld [vmem:[%s9065_s10 + $0x10] sm:$0xff]   ;;  %v8862_v17 = vld [vmem:[%s9067_s12] sm:$0xff]   ;;  %vm9660_vm5 = vmmov %vm9632_vm0 }
 0xb19   : > { %v3710_v3 = vpop.xlane.xlu1 %3709  ;;  %5099 = vmatpush3.bf16.msra.mxu0 %v5677_v33  ;;  %5194 = vmatprep.subr.bf16.mxu1 %v8862_v17 }
 0xb1a   : > { %v3738_v18 = vmul.f32 0.015625, %v3710_v3  ;;  %v3768_v21 = vmul.f32 %v8789_v31, %v8789_v31  ;;  %v8798_v23 = vsub.f32 %v8723_v36, %v3737_v5  ;;  %v3795_v13 = vsel %vm9646_vm6, %v3767_v60, 0.0  ;;  %5100 = vmatprep.subr.bf16.mxu0 %v5678_v6  ;;  %5202 = vmatpush3.bf16.msra.mxu1 %v8862_v17  ;;  %vm9661_vm6 = vmmov %vm9632_vm0 }
 0xb1b   : > { %3793 = vadd.xlane.f32.xlu1 %v3792_v4  ;;  %3796 = vadd.xlane.f32.xlu0 %v3795_v13  ;;  %v3713_v10 = vpop.xlane.xlu0 %3712 }
 0xb1c   : > { %v8801_v12 = vsub.f32 %v8725_v62, %v3738_v18  ;;  %v3798_v30 = vsel %vm9647_vm7, %v3768_v21, 0.0  ;;  %v3739_v20 = vmul.f32 0.015625, %v3713_v10  ;;  %v3769_v32 = vmul.f32 %v8798_v23, %v8798_v23  ;;  %5195 = vmatprep.subr.bf16.mxu1 %v8868_v42  ;;  %vm9662_vm7 = vmmov %vm9632_vm0 }
 0xb1d   : > { %v3716_v38 = vpop.xlane.xlu1 %3715  ;;  %5101 = vmatpush3.bf16.msra.mxu0 %v5678_v6 }
 0xb1e   : > { %v3740_v16 = vmul.f32 0.015625, %v3716_v38  ;;  %v3770_v36 = vmul.f32 %v8801_v12, %v8801_v12  ;;  %v8810_v44 = vsub.f32 %v8731_v61, %v3739_v20  ;;  %v3801_v29 = vsel %vm9632_vm0, %v3769_v32, 0.0  ;;  %5102 = vmatprep.subr.bf16.mxu0 %v5679_v14  ;;  %5203 = vmatpush3.bf16.msra.mxu1 %v8868_v42 }
 0xb1f   : > { %3799 = vadd.xlane.f32.xlu1 %v3798_v30  ;;  %3802 = vadd.xlane.f32.xlu0 %v3801_v29  ;;  %v3719_v0 = vpop.xlane.xlu0 %3718 }
 0xb20   : > { %v8813_v62 = vsub.f32 %v8733_v1, %v3740_v16  ;;  %v3804_v41 = vsel %vm9648_vm1, %v3770_v36, 0.0  ;;  %v3741_v11 = vmul.f32 0.015625, %v3719_v0  ;;  %v3771_v46 = vmul.f32 %v8810_v44, %v8810_v44  ;;  %vm9663_vm1 = vmmov %vm9632_vm0 }
 0xb21   : > { %v3722_v15 = vpop.xlane.xlu1 %3721  ;;  %5103 = vmatpush3.bf16.msra.mxu0 %v5679_v14 }
 0xb22   : > { %v3742_v24 = vmul.f32 0.015625, %v3722_v15  ;;  %v3772_v59 = vmul.f32 %v8813_v62, %v8813_v62  ;;  %v8822_v58 = vsub.f32 %v8739_v39, %v3741_v11  ;;  %v3807_v37 = vsel %vm9649_vm8, %v3771_v46, 0.0  ;;  %5104 = vmatprep.subr.bf16.mxu0 %v5680_v56  ;;  %vm9664_vm8 = vmmov %vm9632_vm0 }
 0xb23   : > { %3805 = vadd.xlane.f32.xlu1 %v3804_v41  ;;  %3808 = vadd.xlane.f32.xlu0 %v3807_v37  ;;  %v3725_v45 = vpop.xlane.xlu0 %3724 }
 0xb24   : > { %v8825_v26 = vsub.f32 %v8741_v55, %v3742_v24  ;;  %v3810_v22 = vsel %vm9650_vm9, %v3772_v59, 0.0  ;;  %v3743_v19 = vmul.f32 0.015625, %v3725_v45  ;;  %v3773_v2 = vmul.f32 %v8822_v58, %v8822_v58  ;;  %vm9665_vm9 = vmmov %vm9632_vm0 }
 0xb25   : > { %v3728_v54 = vpop.xlane.xlu1 %3727  ;;  %5105 = vmatpush3.bf16.msra.mxu0 %v5680_v56 }
 0xb26   : > { %v3744_v51 = vmul.f32 0.015625, %v3728_v54  ;;  %v3774_v49 = vmul.f32 %v8825_v26, %v8825_v26  ;;  %v8834_v34 = vsub.f32 %v8747_v28, %v3743_v19  ;;  %v3813_v40 = vsel %vm9651_vm10, %v3773_v2, 0.0  ;;  %5122 = vmatprep.subr.bf16.mxu0 %v8862_v17  ;;  %v8878_v19 = vld [vmem:[%s9063_s8] ss:$0 sm:$0xff]  ;;  %vm9666_vm10 = vmmov %vm9632_vm0 }
 0xb27   : > { %3811 = vadd.xlane.f32.xlu1 %v3810_v22  ;;  %3814 = vadd.xlane.f32.xlu0 %v3813_v40 }
 0xb28   : > { %v8837_v55 = vsub.f32 %v8749_v35, %v3744_v51  ;;  %v3816_v43 = vsel %vm9652_vm11, %v3774_v49, 0.0  ;;  %v3775_v7 = vmul.f32 %v8834_v34, %v8834_v34  ;;  %vm9667_vm11 = vmmov %vm9632_vm0 }
 0xb2a   : > { %v3776_v9 = vmul.f32 %v8837_v55, %v8837_v55  ;;  %v3819_v52 = vsel %vm9653_vm12, %v3775_v7, 0.0  ;;  %vm9668_vm12 = vmmov %vm9632_vm0 }
 0xb2b   : > { %3817 = vadd.xlane.f32.xlu1 %v3816_v43  ;;  %3820 = vadd.xlane.f32.xlu0 %v3819_v52 }
 0xb2c   : > { %v3822_v47 = vsel %vm9654_vm13, %v3776_v9, 0.0  ;;  %vm9669_vm13 = vmmov %vm9632_vm0 }
 0xb2f   : > { %3823 = vadd.xlane.f32.xlu1 %v3822_v47  ;;  %v8885_v47 = vld [vmem:[%s9064_s9] ss:$0 sm:$0xff] }
 0xb9c   : > { %v3779_v25 = vpop.xlane.xlu0 %3778 }
 0xb9d   : > { %v3825_v3 = vmul.f32 0.015625, %v3779_v25 }
 0xb9f   : > { %v3841_v4 = vadd.f32 1e-05, %v3825_v3 }
 0xba0   : > { %v3782_v5 = vpop.xlane.xlu1 %3781  ;;  %v3785_v18 = vpop.xlane.xlu0 %3784 }
 0xba1   : > { %5689 = vrsqrt.f32 %v3841_v4  ;;  %v3826_v60 = vmul.f32 0.015625, %v3782_v5  ;;  %v3827_v21 = vmul.f32 0.015625, %v3785_v18 }
 0xba3   : > { %v3842_v13 = vadd.f32 1e-05, %v3826_v60  ;;  %v3843_v10 = vadd.f32 1e-05, %v3827_v21 }
 0xba4   : > { %v3788_v38 = vpop.xlane.xlu1 %3787  ;;  %v3791_v30 = vpop.xlane.xlu0 %3790 }
 0xba5   : > { %5691 = vrsqrt.f32 %v3842_v13  ;;  %v3828_v20 = vmul.f32 0.015625, %v3788_v38  ;;  %v3829_v16 = vmul.f32 0.015625, %v3791_v30 }
 0xba6   : > { %5693 = vrsqrt.f32 %v3843_v10 }
 0xba7   : > { %v3844_v32 = vadd.f32 1e-05, %v3828_v20  ;;  %v3845_v36 = vadd.f32 1e-05, %v3829_v16 }
 0xba8   : > { %v3794_v29 = vpop.xlane.xlu1 %3793  ;;  %v3797_v0 = vpop.xlane.xlu0 %3796 }
 0xba9   : > { %5695 = vrsqrt.f32 %v3844_v32  ;;  %v3830_v15 = vmul.f32 0.015625, %v3794_v29  ;;  %v3831_v41 = vmul.f32 0.015625, %v3797_v0 }
 0xbaa   : > { %5697 = vrsqrt.f32 %v3845_v36 }
 0xbab   : > { %v5690_v11 = vpop.eup %5689  ;;  %v3846_v24 = vadd.f32 1e-05, %v3830_v15  ;;  %v3847_v46 = vadd.f32 1e-05, %v3831_v41 }
 0xbac   : > { %v3800_v59 = vpop.xlane.xlu1 %3799  ;;  %v3803_v37 = vpop.xlane.xlu0 %3802  ;;  %v3873_v45 = vmul.f32 %v5690_v11, %v8755_v50 }
 0xbad   : > { %5699 = vrsqrt.f32 %v3846_v24  ;;  %v3832_v54 = vmul.f32 0.015625, %v3800_v59  ;;  %v3833_v22 = vmul.f32 0.015625, %v3803_v37 }
 0xbae   : > { %5701 = vrsqrt.f32 %v3847_v46  ;;  %v3896_v52 = vmul.f32 %v8878_v19, %v3873_v45 }
 0xbaf   : > { %v5692_v51 = vpop.eup %5691  ;;  %v3848_v2 = vadd.f32 1e-05, %v3832_v54  ;;  %v3849_v49 = vadd.f32 1e-05, %v3833_v22 }
 0xbb0   : > { %v5694_v40 = vpop.eup %5693  ;;  %v3806_v43 = vpop.xlane.xlu1 %3805  ;;  %v3874_v9 = vmul.f32 %v5692_v51, %v8763_v27  ;;  %v3919_v18 = vadd.f32 %v8885_v47, %v3896_v52 }
 0xbb1   : > { %v3809_v7 = vpop.xlane.xlu0 %3808  ;;  %5703 = vrsqrt.f32 %v3848_v2  ;;  %v3834_v50 = vmul.f32 0.015625, %v3806_v43  ;;  %v3875_v6 = vmul.f32 %v5694_v40, %v8757_v48 }
 0xbb2   : > { %v3835_v33 = vmul.f32 0.015625, %v3809_v7  ;;  %5705 = vrsqrt.f32 %v3849_v49  ;;  %v3897_v14 = vmul.f32 %v8878_v19, %v3874_v9 }
 0xbb3   : > { %v5696_v56 = vpop.eup %5695  ;;  %v3850_v25 = vadd.f32 1e-05, %v3834_v50  ;;  %v3898_v13 = vmul.f32 %v8878_v19, %v3875_v6 }
 0xbb4   : > { %v3851_v3 = vadd.f32 1e-05, %v3835_v33  ;;  %v5698_v4 = vpop.eup %5697  ;;  %v3812_v27 = vpop.xlane.xlu1 %3811  ;;  %v3920_v60 = vadd.f32 %v8885_v47, %v3897_v14  ;;  %v3876_v21 = vmul.f32 %v5696_v56, %v8765_v53 }
 0xbb5   : > { %v3815_v5 = vpop.xlane.xlu0 %3814  ;;  %5707 = vrsqrt.f32 %v3850_v25  ;;  %v3836_v10 = vmul.f32 0.015625, %v3812_v27  ;;  %v3877_v20 = vmul.f32 %v5698_v4, %v8774_v57  ;;  %v3921_v53 = vadd.f32 %v8885_v47, %v3898_v13 }
 0xbb6   : > { %v3837_v48 = vmul.f32 0.015625, %v3815_v5  ;;  %5709 = vrsqrt.f32 %v3851_v3  ;;  %v3935_v38 = vpack.c.bf16 %v3920_v60, %v3919_v18  ;;  %v3899_v30 = vmul.f32 %v8878_v19, %v3876_v21 }
 0xbb7   : > { %v5700_v16 = vpop.eup %5699  ;;  %v3852_v32 = vadd.f32 1e-05, %v3836_v10  ;;  %v3900_v24 = vmul.f32 %v8878_v19, %v3877_v20 }
 0xbb8   : > { %v3853_v36 = vadd.f32 1e-05, %v3837_v48  ;;  %v5702_v29 = vpop.eup %5701  ;;  %v3818_v0 = vpop.xlane.xlu1 %3817  ;;  %5106 = vmatprep.mubr.msk.bf16.mxu0 %vm9655_vm14, %v3935_v38  ;;  %v3922_v41 = vadd.f32 %v8885_v47, %v3899_v30  ;;  %v3878_v11 = vmul.f32 %v5700_v16, %v8777_v8  ;;  %vm9670_vm14 = vmmov %vm9632_vm0 }
 0xbb9   : > { %v3821_v15 = vpop.xlane.xlu0 %3820  ;;  %5711 = vrsqrt.f32 %v3852_v32  ;;  %v3838_v46 = vmul.f32 0.015625, %v3818_v0  ;;  %v3879_v57 = vmul.f32 %v5702_v29, %v8786_v63  ;;  %v3923_v8 = vadd.f32 %v8885_v47, %v3900_v24 }
 0xbba   : > { %v3839_v59 = vmul.f32 0.015625, %v3821_v15  ;;  %5713 = vrsqrt.f32 %v3853_v36  ;;  %v3936_v37 = vpack.c.bf16 %v3922_v41, %v3921_v53  ;;  %v3901_v45 = vmul.f32 %v8878_v19, %v3878_v11 }
 0xbbb   : > { %v5704_v54 = vpop.eup %5703  ;;  %v3854_v22 = vadd.f32 1e-05, %v3838_v46  ;;  %v3902_v7 = vmul.f32 %v8878_v19, %v3879_v57  ;;  %v5683_v46 = vld [vmem:[%s9067_s12 + $0x10] sm:$0xff]   ;;  %v5688_v57 = vld [vmem:[%s9067_s12 + $0x38] sm:$0xff]  }
 0xbbc   : > { %v3855_v51 = vadd.f32 1e-05, %v3839_v59  ;;  %v5706_v2 = vpop.eup %5705  ;;  %v3824_v49 = vpop.xlane.xlu1 %3823  ;;  %5107 = vmatmul.mubr.msk.bf16.vlgmr.msra.gmra.mrb[0].mxu0 %vm9656_vm15, %v3936_v37  ;;  %v3924_v40 = vadd.f32 %v8885_v47, %v3901_v45  ;;  %v3880_v43 = vmul.f32 %v5704_v54, %v8789_v31  ;;  %5196 = vmatprep.subr.bf16.mxu1 %v5683_v46  ;;  %v5687_v59 = vld [vmem:[%s9067_s12 + $0x30] sm:$0xff]   ;;  %v8964_v37 = vld [vmem:[%s9066_s11] ss:$0 sm:$0xff]  ;;  %vm9671_vm15 = vmmov %vm9632_vm0 }
 0xbbd   : > { %5715 = vrsqrt.f32 %v3854_v22  ;;  %v3840_v63 = vmul.f32 0.015625, %v3824_v49  ;;  %v3881_v9 = vmul.f32 %v5706_v2, %v8798_v23  ;;  %5123 = vmatpush3.bf16.msra.mxu0 %v8862_v17  ;;  %v3925_v31 = vadd.f32 %v8885_v47, %v3902_v7  ;;  %5204 = vmatpush3.bf16.msra.mxu1 %v5683_v46 }
 0xbbe   : > { %5717 = vrsqrt.f32 %v3855_v51  ;;  %v3937_v52 = vpack.c.bf16 %v3924_v40, %v3923_v8  ;;  %v3903_v50 = vmul.f32 %v8878_v19, %v3880_v43  ;;  %5124 = vmatprep.subr.bf16.mxu0 %v8868_v42 }
 0xbbf   : > { %v5708_v33 = vpop.eup %5707  ;;  %v3856_v6 = vadd.f32 1e-05, %v3840_v63  ;;  %v3904_v23 = vmul.f32 %v8878_v19, %v3881_v9 }
 0xbc0   : > { %v5710_v14 = vpop.eup %5709  ;;  %5110 = vmatprep.mubr.msk.bf16.mxu0 %vm9657_vm2, %v3937_v52  ;;  %v3926_v56 = vadd.f32 %v8885_v47, %v3903_v50  ;;  %v3882_v25 = vmul.f32 %v5708_v33, %v8801_v12  ;;  %vm9672_vm2 = vmmov %vm9632_vm0 }
 0xbc1   : > { %5719 = vrsqrt.f32 %v3856_v6  ;;  %v3883_v17 = vmul.f32 %v5710_v14, %v8810_v44  ;;  %5125 = vmatpush3.bf16.msra.mxu0 %v8868_v42  ;;  %v3927_v18 = vadd.f32 %v8885_v47, %v3904_v23 }
 0xbc2   : > { %v3938_v3 = vpack.c.bf16 %v3926_v56, %v3925_v31  ;;  %v3905_v4 = vmul.f32 %v8878_v19, %v3882_v25  ;;  %5126 = vmatprep.subr.bf16.mxu0 %v5683_v46 }
 0xbc3   : > { %v5712_v27 = vpop.eup %5711  ;;  %v3906_v21 = vmul.f32 %v8878_v19, %v3883_v17 }
 0xbc4   : > { %v5714_v5 = vpop.eup %5713  ;;  %5111 = vmatmul.mubr.msk.bf16.gmra.mrb[4].mxu0 %vm9658_vm3, %v3938_v3  ;;  %v3928_v60 = vadd.f32 %v8885_v47, %v3905_v4  ;;  %v3884_v12 = vmul.f32 %v5712_v27, %v8813_v62  ;;  %vm9673_vm3 = vmmov %vm9632_vm0 }
 0xbc5   : > { %v3885_v13 = vmul.f32 %v5714_v5, %v8822_v58  ;;  %v3929_v38 = vadd.f32 %v8885_v47, %v3906_v21  ;;  %5127 = vmatpush3.bf16.msra.mxu0 %v5683_v46 }
 0xbc6   : > { %v3939_v44 = vpack.c.bf16 %v3928_v60, %v3927_v18  ;;  %v3907_v42 = vmul.f32 %v8878_v19, %v3884_v12 }
 0xbc7   : > { %v5716_v10 = vpop.eup %5715  ;;  %v3908_v16 = vmul.f32 %v8878_v19, %v3885_v13 }
 0xbc8   : > { %v5718_v48 = vpop.eup %5717  ;;  %5114 = vmatprep.mubr.msk.bf16.mxu0 %vm9659_vm4, %v3939_v44  ;;  %v3930_v30 = vadd.f32 %v8885_v47, %v3907_v42  ;;  %v3886_v20 = vmul.f32 %v5716_v10, %v8825_v26  ;;  %vm9674_vm4 = vmmov %vm9632_vm0 }
 0xbc9   : > { %v3887_v62 = vmul.f32 %v5718_v48, %v8834_v34  ;;  %v3931_v29 = vadd.f32 %v8885_v47, %v3908_v16 }
 0xbca   : > { %v3940_v32 = vpack.c.bf16 %v3930_v30, %v3929_v38  ;;  %v3909_v58 = vmul.f32 %v8878_v19, %v3886_v20 }
 0xbcb   : > { %v5720_v36 = vpop.eup %5719  ;;  %v3910_v53 = vmul.f32 %v8878_v19, %v3887_v62 }
 0xbcc   : > { %5115 = vmatmul.mubr.msk.bf16.gmra.mrb[8].mxu0 %vm9660_vm5, %v3940_v32  ;;  %v3932_v0 = vadd.f32 %v8885_v47, %v3909_v58  ;;  %v3888_v15 = vmul.f32 %v5720_v36, %v8837_v55  ;;  %v5684_v55 = vld [vmem:[%s9067_s12 + $0x18] sm:$0xff]   ;;  %vm9675_vm5 = vmmov %vm9632_vm0 }
 0xbcd   : > { %v3933_v34 = vadd.f32 %v8885_v47, %v3910_v53  ;;  %5128 = vmatprep.subr.bf16.mxu0 %v5684_v55  ;;  %5197 = vmatprep.subr.bf16.mxu1 %v5684_v55 }
 0xbce   : > { %v3941_v41 = vpack.c.bf16 %v3932_v0, %v3931_v29  ;;  %v3911_v26 = vmul.f32 %v8878_v19, %v3888_v15  ;;  %5129 = vmatpush3.bf16.msra.mxu0 %v5684_v55  ;;  %5205 = vmatpush3.bf16.msra.mxu1 %v5684_v55  ;;  %v5685_v19 = vld [vmem:[%s9067_s12 + $0x20] sm:$0xff]  }
 0xbcf   : > { %5130 = vmatprep.subr.bf16.mxu0 %v5685_v19  ;;  %5198 = vmatprep.subr.bf16.mxu1 %v5685_v19 }
 0xbd0   : > { %5118 = vmatprep.mubr.msk.bf16.mxu0 %vm9661_vm6, %v3941_v41  ;;  %v3934_v11 = vadd.f32 %v8885_v47, %v3911_v26  ;;  %v5686_v47 = vld [vmem:[%s9067_s12 + $0x28] sm:$0xff]   ;;  %vm9676_vm6 = vmmov %vm9632_vm0 }
 0xbd2   : > { %v3942_v24 = vpack.c.bf16 %v3934_v11, %v3933_v34  ;;  %5131 = vmatpush3.bf16.msra.mxu0 %v5685_v19  ;;  %5206 = vmatpush3.bf16.msra.mxu1 %v5685_v19 }
 0xbd3   : > { %5132 = vmatprep.subr.bf16.mxu0 %v5686_v47  ;;  %5199 = vmatprep.subr.bf16.mxu1 %v5686_v47 }
 0xbd4   : > { %5119 = vmatmul.mubr.msk.bf16.gmra.mrb[12].mxu0 %vm9662_vm7, %v3942_v24  ;;  %vm9677_vm7 = vmmov %vm9632_vm0 }
 0xbd6   : > { %5133 = vmatpush3.bf16.msra.mxu0 %v5686_v47  ;;  %5207 = vmatpush3.bf16.msra.mxu1 %v5686_v47 }
 0xbd7   : > { %5134 = vmatprep.subr.bf16.mxu0 %v5687_v59  ;;  %5200 = vmatprep.subr.bf16.mxu1 %v5687_v59 }
 0xbda   : > { %5135 = vmatpush3.bf16.msra.mxu0 %v5687_v59  ;;  %5208 = vmatpush3.bf16.msra.mxu1 %v5687_v59 }
 0xbdb   : > { %5136 = vmatprep.subr.bf16.mxu0 %v5688_v57  ;;  %5201 = vmatprep.subr.bf16.mxu1 %v5688_v57 }
 0xbde   : > { %5137 = vmatpush3.bf16.msra.mxu0 %v5688_v57  ;;  %5209 = vmatpush3.bf16.msra.mxu1 %v5688_v57 }
 0xc8f   : > { %v5108_v45 = vpop.f32.mrb[0].mxu0 }
 0xc90   : > { %v4049_v54 = vadd.f32 %v5108_v45, %v8964_v37  ;;  %v4040_v22 = vpop.f32.mrb[1].mxu0 }
 0xc91   : > { %v4041_v51 = vadd.f32 %v8964_v37, %v4040_v22  ;;  %v5109_v2 = vpop.f32.mrb[2].mxu0 }
 0xc92   : > { %v4121_v49 = vmul.f32 0.70710677, %v4049_v54  ;;  %v4052_v8 = vadd.f32 %v5109_v2, %v8964_v37  ;;  %v4043_v40 = vpop.f32.mrb[3].mxu0  ;;  %v4105_v10 = vmul.f32 0.5, %v4049_v54 }
 0xc93   : > { %v4119_v43 = vmul.f32 0.70710677, %v4041_v51  ;;  %v4044_v7 = vadd.f32 %v8964_v37, %v4043_v40  ;;  %v4103_v16 = vmul.f32 0.5, %v4041_v51 }
 0xc94   : > { %5721 = verf.f32 %v4121_v49  ;;  %v4122_v63 = vmul.f32 0.70710677, %v4052_v8  ;;  %v4106_v48 = vmul.f32 0.5, %v4052_v8 }
 0xc95   : > { %5723 = verf.f32 %v4119_v43  ;;  %v4120_v9 = vmul.f32 0.70710677, %v4044_v7  ;;  %v4104_v62 = vmul.f32 0.5, %v4044_v7 }
 0xc96   : > { %5725 = verf.f32 %v4122_v63 }
 0xc97   : > { %5727 = verf.f32 %v4120_v9  ;;  %v5112_v52 = vpop.f32.mrb[4].mxu0 }
 0xc98   : > { %v4065_v50 = vadd.f32 %v5112_v52, %v8964_v37  ;;  %v4056_v33 = vpop.f32.mrb[5].mxu0 }
 0xc99   : > { %v4057_v6 = vadd.f32 %v8964_v37, %v4056_v33  ;;  %v5113_v14 = vpop.f32.mrb[6].mxu0 }
 0xc9a   : > { %v4125_v31 = vmul.f32 0.70710677, %v4065_v50  ;;  %v4068_v56 = vadd.f32 %v5113_v14, %v8964_v37  ;;  %v4059_v25 = vpop.f32.mrb[7].mxu0  ;;  %v4109_v45 = vmul.f32 0.5, %v4065_v50 }
 0xc9b   : > { %v4123_v23 = vmul.f32 0.70710677, %v4057_v6  ;;  %v8974_v17 = vadd.f32 %v8964_v37, %v4059_v25  ;;  %v4107_v63 = vmul.f32 0.5, %v4057_v6 }
 0xc9c   : > { %5729 = verf.f32 %v4125_v31  ;;  %v4126_v3 = vmul.f32 0.70710677, %v4068_v56  ;;  %v4110_v49 = vmul.f32 0.5, %v4068_v56 }
 0xc9d   : > { %5731 = verf.f32 %v4123_v23  ;;  %v4124_v4 = vmul.f32 0.70710677, %v8974_v17  ;;  %v4108_v31 = vmul.f32 0.5, %v8974_v17 }
 0xc9e   : > { %v5722_v27 = vpop.eup %5721  ;;  %5733 = verf.f32 %v4126_v3 }
 0xc9f   : > { %v5724_v5 = vpop.eup %5723  ;;  %v4153_v18 = vadd.f32 1.0, %v5722_v27  ;;  %5735 = verf.f32 %v4124_v4  ;;  %v5116_v60 = vpop.f32.mrb[8].mxu0 }
 0xca0   : > { %v5726_v12 = vpop.eup %5725  ;;  %v4151_v21 = vadd.f32 1.0, %v5724_v5  ;;  %v8978_v13 = vadd.f32 %v5116_v60, %v8964_v37  ;;  %v4072_v44 = vpop.f32.mrb[9].mxu0 }
 0xca1   : > { %v5728_v42 = vpop.eup %5727  ;;  %v4154_v38 = vadd.f32 1.0, %v5726_v12  ;;  %v8981_v30 = vadd.f32 %v8964_v37, %v4072_v44  ;;  %v5117_v20 = vpop.f32.mrb[10].mxu0  ;;  %v4169_v29 = vmul.f32 %v4153_v18, %v4105_v10 }
 0xca2   : > { %v4152_v32 = vadd.f32 1.0, %v5728_v42  ;;  %v4129_v58 = vmul.f32 0.70710677, %v8978_v13  ;;  %v4075_v36 = vpop.f32.mrb[11].mxu0  ;;  %v4084_v53 = vadd.f32 %v5117_v20, %v8964_v37  ;;  %v4167_v41 = vmul.f32 %v4151_v21, %v4103_v16 }
 0xca3   : > { %v4170_v0 = vmul.f32 %v4154_v38, %v4106_v48  ;;  %v4127_v15 = vmul.f32 0.70710677, %v8981_v30  ;;  %v4076_v34 = vadd.f32 %v8964_v37, %v4075_v36  ;;  %v4111_v38 = vmul.f32 0.5, %v8981_v30 }
 0xca4   : > { %v4168_v26 = vmul.f32 %v4152_v32, %v4104_v62  ;;  %5737 = verf.f32 %v4129_v58  ;;  %v4130_v24 = vmul.f32 0.70710677, %v4084_v53  ;;  %v4114_v10 = vmul.f32 0.5, %v4084_v53 }
 0xca5   : > { %v4184_v11 = vpack.c.bf16 %v4170_v0, %v4169_v29  ;;  %5739 = verf.f32 %v4127_v15  ;;  %v4128_v55 = vmul.f32 0.70710677, %v4076_v34  ;;  %v4112_v20 = vmul.f32 0.5, %v4076_v34 }
 0xca6   : > { %v5730_v46 = vpop.eup %5729  ;;  %v4183_v19 = vpack.c.bf16 %v4168_v26, %v4167_v41  ;;  %5741 = verf.f32 %v4130_v24 }
 0xca7   : > { %v5732_v47 = vpop.eup %5731  ;;  %v5120_v59 = vpop.f32.mrb[12].mxu0  ;;  %v4157_v54 = vadd.f32 1.0, %v5730_v46  ;;  %5743 = verf.f32 %v4128_v55 }
 0xca8   : > { %v5734_v57 = vpop.eup %5733  ;;  %v4097_v22 = vadd.f32 %v5120_v59, %v8964_v37  ;;  %v4088_v51 = vpop.f32.mrb[13].mxu0  ;;  %5138 = vmatprep.mubr.bf16.mxu0 %v4183_v19  ;;  %v4155_v7 = vadd.f32 1.0, %v5732_v47 }
 0xca9   : > { %v5736_v2 = vpop.eup %5735  ;;  %v4158_v8 = vadd.f32 1.0, %v5734_v57  ;;  %v4089_v40 = vadd.f32 %v8964_v37, %v4088_v51  ;;  %v5121_v43 = vpop.f32.mrb[14].mxu0  ;;  %5139 = vmatmul.mubr.bf16.vlgmr.msra.gmra.mrb[16].mxu0 %v4184_v11  ;;  %v4173_v3 = vmul.f32 %v4157_v54, %v4109_v45 }
 0xcaa   : > { %v4133_v9 = vmul.f32 0.70710677, %v4097_v22  ;;  %v4100_v52 = vadd.f32 %v5121_v43, %v8964_v37  ;;  %v4091_v33 = vpop.f32.mrb[15].mxu0  ;;  %v4156_v50 = vadd.f32 1.0, %v5736_v2  ;;  %v4171_v27 = vmul.f32 %v4155_v7, %v4107_v63  ;;  %v5753_v7 = vld [vmem:[#allocation6 + $0x10] sm:$0xff] }
 0xcab   : > { %v4174_v14 = vmul.f32 %v4158_v8, %v4110_v49  ;;  %v4131_v25 = vmul.f32 0.70710677, %v4089_v40  ;;  %v4092_v23 = vadd.f32 %v8964_v37, %v4091_v33  ;;  %v4113_v37 = vmul.f32 0.5, %v8978_v13  ;;  %v5754_v33 = vld [vmem:[#allocation6] sm:$0xff] }
 0xcac   : > { %5745 = verf.f32 %v4133_v9  ;;  %v4134_v56 = vmul.f32 0.70710677, %v4100_v52  ;;  %v4172_v5 = vmul.f32 %v4156_v50, %v4108_v31  ;;  %v4117_v13 = vmul.f32 0.5, %v4097_v22  ;;  %v8997_v22 = vld [vmem:[%s9068_s13] ss:$0 sm:$0xff]  ;;  %v5755_v31 = vld [vmem:[#allocation6 + $0x18] sm:$0xff] }
 0xcad   : > { %5747 = verf.f32 %v4131_v25  ;;  %v4132_v4 = vmul.f32 0.70710677, %v4092_v23  ;;  %v4186_v6 = vpack.c.bf16 %v4174_v14, %v4173_v3  ;;  %v4118_v53 = vmul.f32 0.5, %v4100_v52 }
 0xcae   : > { %v5738_v18 = vpop.eup %5737  ;;  %5749 = verf.f32 %v4134_v56  ;;  %v4185_v12 = vpack.c.bf16 %v4172_v5, %v4171_v27  ;;  %v4115_v19 = vmul.f32 0.5, %v4089_v40  ;;  %v4116_v30 = vmul.f32 0.5, %v4092_v23  ;;  %v5756_v23 = vld [vmem:[#allocation6 + $0x8] sm:$0xff] }
 0xcaf   : > { %v5740_v60 = vpop.eup %5739  ;;  %5751 = verf.f32 %v4132_v4  ;;  %v4161_v21 = vadd.f32 1.0, %v5738_v18 }
 0xcb0   : > { %v5742_v44 = vpop.eup %5741  ;;  %v4159_v42 = vadd.f32 1.0, %v5740_v60  ;;  %5142 = vmatprep.mubr.bf16.mxu1 %v4185_v12 }
 0xcb1   : > { %v5744_v17 = vpop.eup %5743  ;;  %v4162_v48 = vadd.f32 1.0, %v5742_v44  ;;  %5143 = vmatmul.mubr.bf16.vlgmr.msra.gmra.mrb[0].mxu1 %v4186_v6  ;;  %v4177_v62 = vmul.f32 %v4161_v21, %v4113_v37  ;;  %v5757_v6 = vld [vmem:[#allocation6 + $0x30] sm:$0xff]  ;;  %v5758_v44 = vld [vmem:[#allocation6 + $0x20] sm:$0xff]  ;;  %v5759_v37 = vld [vmem:[#allocation6 + $0x38] sm:$0xff] }
 0xcb2   : > { %v4160_v16 = vadd.f32 1.0, %v5744_v17  ;;  %v4175_v58 = vmul.f32 %v4159_v42, %v4111_v38 }
 0xcb3   : > { %v4178_v32 = vmul.f32 %v4162_v48, %v4114_v10  ;;  %v5760_v48 = vld [vmem:[#allocation6 + $0x28] sm:$0xff] }
 0xcb4   : > { %v4176_v36 = vmul.f32 %v4160_v16, %v4112_v20 }
 0xcb5   : > { %v4188_v0 = vpack.c.bf16 %v4178_v32, %v4177_v62 }
 0xcb6   : > { %v5746_v29 = vpop.eup %5745  ;;  %v4187_v26 = vpack.c.bf16 %v4176_v36, %v4175_v58 }
 0xcb7   : > { %v5748_v15 = vpop.eup %5747  ;;  %v4165_v41 = vadd.f32 1.0, %v5746_v29 }
 0xcb8   : > { %v5750_v11 = vpop.eup %5749  ;;  %v4163_v24 = vadd.f32 1.0, %v5748_v15  ;;  %5146 = vmatprep.mubr.bf16.mxu1 %v4187_v26  ;;  %v5761_v15 = vld [vmem:[#allocation6 + $0x40] sm:$0xff] }
 0xcb9   : > { %v5752_v46 = vpop.eup %5751  ;;  %v4166_v55 = vadd.f32 1.0, %v5750_v11  ;;  %5147 = vmatmul.mubr.bf16.gmra.mrb[4].mxu1 %v4188_v0  ;;  %v4181_v47 = vmul.f32 %v4165_v41, %v4117_v13 }
 0xcba   : > { %v4164_v34 = vadd.f32 1.0, %v5752_v46  ;;  %v4179_v57 = vmul.f32 %v4163_v24, %v4115_v19  ;;  %v5762_v24 = vld [vmem:[#allocation6 + $0x48] sm:$0xff] }
 0xcbb   : > { %v4182_v59 = vmul.f32 %v4166_v55, %v4118_v53 }
 0xcbc   : > { %v4180_v45 = vmul.f32 %v4164_v34, %v4116_v30 }
 0xcbd   : > { %v4190_v54 = vpack.c.bf16 %v4182_v59, %v4181_v47 }
 0xcbe   : > { %v4189_v51 = vpack.c.bf16 %v4180_v45, %v4179_v57  ;;  %v5763_v45 = vld [vmem:[#allocation6 + $0x68] sm:$0xff] }
 0xcc0   : > { %5150 = vmatprep.mubr.bf16.mxu1 %v4189_v51 }
 0xcc1   : > { %5151 = vmatmul.mubr.bf16.gmra.mrb[8].mxu1 %v4190_v54 }
 0xd7c   : > { %v5140_v2 = vpop.f32.mrb[16].mxu0 }
 0xd7d   : > { %v4305_v49 = vadd.f32 %v5140_v2, %v8997_v22  ;;  %v4296_v8 = vpop.f32.mrb[17].mxu0 }
 0xd7e   : > { %v4297_v40 = vadd.f32 %v8997_v22, %v4296_v8  ;;  %v5141_v43 = vpop.f32.mrb[18].mxu0 }
 0xd7f   : > { %v4361_v63 = vadd.f32 %v5753_v7, %v4305_v49  ;;  %v4308_v9 = vadd.f32 %v5141_v43, %v8997_v22  ;;  %v4299_v52 = vpop.f32.mrb[19].mxu0 }
 0xd80   : > { %v4359_v50 = vadd.f32 %v5754_v33, %v4297_v40  ;;  %v4300_v14 = vadd.f32 %v8997_v22, %v4299_v52 }
 0xd81   : > { %4377 = vst.msk [vmem:[%s6184_s15 + $0x10] sm:$0xff] %vm9632_vm0, %v4361_v63  ;;  %v4362_v25 = vadd.f32 %v5755_v31, %v4308_v9 }
 0xd82   : > { %4375 = vst.msk [vmem:[%s6184_s15] sm:$0xff] %vm9663_vm1, %v4359_v50  ;;  %v4360_v3 = vadd.f32 %v5756_v23, %v4300_v14 }
 0xd83   : > { %4378 = vst.msk [vmem:[%s6184_s15 + $0x18] sm:$0xff] %vm9664_vm8, %v4362_v25 }
 0xd84   : > { %4376 = vst.msk [vmem:[%s6184_s15 + $0x8] sm:$0xff] %vm9665_vm9, %v4360_v3  ;;  %v5144_v56 = vpop.f32.mrb[0].mxu1 }
 0xd85   : > { %v4321_v4 = vadd.f32 %v5144_v56, %v8997_v22  ;;  %v4312_v27 = vpop.f32.mrb[1].mxu1 }
 0xd86   : > { %v4313_v5 = vadd.f32 %v8997_v22, %v4312_v27  ;;  %v5145_v18 = vpop.f32.mrb[2].mxu1 }
 0xd87   : > { %v4365_v60 = vadd.f32 %v5757_v6, %v4321_v4  ;;  %v4324_v12 = vadd.f32 %v5145_v18, %v8997_v22  ;;  %v4315_v21 = vpop.f32.mrb[3].mxu1 }
 0xd88   : > { %v4363_v42 = vadd.f32 %v5758_v44, %v4313_v5  ;;  %v4316_v17 = vadd.f32 %v8997_v22, %v4315_v21 }
 0xd89   : > { %4381 = vst.msk [vmem:[%s6184_s15 + $0x30] sm:$0xff] %vm9666_vm10, %v4365_v60  ;;  %v4366_v10 = vadd.f32 %v5759_v37, %v4324_v12 }
 0xd8a   : > { %4379 = vst.msk [vmem:[%s6184_s15 + $0x20] sm:$0xff] %vm9667_vm11, %v4363_v42  ;;  %v4364_v38 = vadd.f32 %v5760_v48, %v4316_v17 }
 0xd8b   : > { %4382 = vst.msk [vmem:[%s6184_s15 + $0x38] sm:$0xff] %vm9668_vm12, %v4366_v10 }
 0xd8c   : > { %4380 = vst.msk [vmem:[%s6184_s15 + $0x28] sm:$0xff] %vm9669_vm13, %v4364_v38  ;;  %v5148_v20 = vpop.f32.mrb[4].mxu1 }
 0xd8d   : > { %v4337_v16 = vadd.f32 %v5148_v20, %v8997_v22  ;;  %v4328_v62 = vpop.f32.mrb[5].mxu1 }
 0xd8e   : > { %v4329_v32 = vadd.f32 %v8997_v22, %v4328_v62  ;;  %v5149_v58 = vpop.f32.mrb[6].mxu1 }
 0xd8f   : > { %v4369_v36 = vadd.f32 %v4337_v16, %v8731_v61  ;;  %v4340_v29 = vadd.f32 %v5149_v58, %v8997_v22  ;;  %v4331_v0 = vpop.f32.mrb[7].mxu1 }
 0xd90   : > { %v4367_v41 = vadd.f32 %v5761_v15, %v4329_v32  ;;  %v4332_v26 = vadd.f32 %v8997_v22, %v4331_v0 }
 0xd91   : > { %4385 = vst.msk [vmem:[%s6184_s15 + $0x50] sm:$0xff] %vm9670_vm14, %v4369_v36  ;;  %v4370_v11 = vadd.f32 %v4340_v29, %v8733_v1 }
 0xd92   : > { %4383 = vst.msk [vmem:[%s6184_s15 + $0x40] sm:$0xff] %vm9671_vm15, %v4367_v41  ;;  %v4368_v46 = vadd.f32 %v5762_v24, %v4332_v26 }
 0xd93   : > { %4386 = vst.msk [vmem:[%s6184_s15 + $0x58] sm:$0xff] %vm9672_vm2, %v4370_v11 }
 0xd94   : > { %4384 = vst.msk [vmem:[%s6184_s15 + $0x48] sm:$0xff] %vm9673_vm3, %v4368_v46  ;;  %v5152_v61 = vpop.f32.mrb[8].mxu1 }
 0xd95   : > { %v4353_v13 = vadd.f32 %v5152_v61, %v8997_v22  ;;  %v4344_v53 = vpop.f32.mrb[9].mxu1 }
 0xd96   : > { %v4345_v55 = vadd.f32 %v8997_v22, %v4344_v53  ;;  %v5153_v19 = vpop.f32.mrb[10].mxu1 }
 0xd97   : > { %v4373_v1 = vadd.f32 %v4353_v13, %v8747_v28  ;;  %v4356_v30 = vadd.f32 %v5153_v19, %v8997_v22  ;;  %v4347_v34 = vpop.f32.mrb[11].mxu1 }
 0xd98   : > { %v4371_v47 = vadd.f32 %v4345_v55, %v8739_v39  ;;  %v4348_v59 = vadd.f32 %v8997_v22, %v4347_v34 }
 0xd99   : > { %4389 = vst.msk [vmem:[%s6184_s15 + $0x70] sm:$0xff] %vm9674_vm4, %v4373_v1  ;;  %v4374_v57 = vadd.f32 %v4356_v30, %v8749_v35 }
 0xd9a   : > { %4387 = vst.msk [vmem:[%s6184_s15 + $0x60] sm:$0xff] %vm9675_vm5, %v4371_v47  ;;  %v4372_v54 = vadd.f32 %v5763_v45, %v4348_v59 }
 0xd9b   : > { %4390 = vst.msk [vmem:[%s6184_s15 + $0x78] sm:$0xff] %vm9676_vm6, %v4374_v57 }
 0xd9c   : > { %4388 = vst.msk [vmem:[%s6184_s15 + $0x68] sm:$0xff] %vm9677_vm7, %v4372_v54 }
 0xd9d PF: > { %s25_s29 = sadd.s32 1, %s5925_s29  }
 0xd9e   : > { %p22_p3 = scmp.ge.s32.totalorder %s25_s29, 4  }
 0xda0   :  { %24 = sbr.rel (!%p22_p3) target bundleno = 1 (0x1), region = 163 }
 0xda7   :  { %4412 = vsyncpa [#allocation8], 1 }
 0xda8   :  { %4414 = vsyncpa [#allocation8 + $0x1], 1 }

</bundles_post_ra>
